<compile_context>
chip_gen: v5e
topology: v5e:2x2
jax: 0.10.0
libtpu: 0.0.40
codegen_flags: <defaults>
</compile_context>

<pallas_src>
import functools

import jax
import jax.numpy as jnp
from jax import lax
from jax.experimental import pallas as pl


_BN_EPS = 1e-5


def _apply_act(y, act):
    if act == "relu":
        return jnp.maximum(y, 0.0)
    if act == "tanh":
        return jnp.tanh(y)
    return y


# --------------------------------------------------------------------------
# weight preparation (done once, at init time)
# --------------------------------------------------------------------------
def _prep_w1(w):
    """ConvTranspose2d(nz, C1, 4, 1, 0) weight (nz, C1, 4, 4) -> (nz, 16*C1) bf16.

    On a 1x1 input: out[b, ky, kx, co] = sum_ci z[b, ci] * W[ci, co, ky, kx],
    i.e. a single matmul against W transposed to (nz, ky, kx, co) and flattened.
    """
    nz, c1 = w.shape[0], w.shape[1]
    return jnp.transpose(w, (0, 2, 3, 1)).reshape(nz, 16 * c1).astype(jnp.bfloat16)


def _prep_subpix_w(w, cout_pad=None):
    """ConvTranspose2d(Cin, Cout, 4, 2, 1) weight (Cin, Cout, 4, 4) ->
    per-output-parity-phase matrices (4, 4*Cin, Cout[_pad]) bf16.

    Phase p = py*2 + px produces output pixels (2q+py, 2r+px).  It only uses
    the 2x2 kernel-tap subset ky = 3-py-2*dy, kx = 3-px-2*dx for
    (dy, dx) in {0,1}^2, applied to the 1-padded input at xp[q+py+dy, r+px+dx].
    The 4 taps are folded into the contraction dimension.
    """
    cin, cout = w.shape[0], w.shape[1]
    phases = []
    for py in range(2):
        for px in range(2):
            taps = []
            for dy in range(2):
                for dx in range(2):
                    ky = 3 - py - 2 * dy
                    kx = 3 - px - 2 * dx
                    taps.append(w[:, :, ky, kx])               # (Cin, Cout)
            phases.append(jnp.concatenate(taps, axis=0))       # (4*Cin, Cout)
    wp = jnp.stack(phases, axis=0)                              # (4, 4*Cin, Cout)
    if cout_pad is not None and cout_pad > cout:
        wp = jnp.pad(wp, ((0, 0), (0, 0), (0, cout_pad - cout)))
    return wp.astype(jnp.bfloat16)


# --------------------------------------------------------------------------
# kernels
# --------------------------------------------------------------------------
def _layer1_kernel(z_ref, w_ref, o_ref, *, c1, n_valid):
    """Fused  z @ W1  +  train-mode BatchNorm  +  ReLU  (1x1 -> 4x4 layer).

    z_ref: (B, nz) bf16, w_ref: (nz, 16*c1) bf16, o_ref: (16, B, c1) bf16.
    Output tap t = ky*4 + kx is the (ky, kx) output pixel for every batch row.
    """
    h = jnp.dot(z_ref[...], w_ref[...], preferred_element_type=jnp.float32)
    taps = [h[:, t * c1:(t + 1) * c1] for t in range(16)]       # 16 x (B, c1)

    s = taps[0]
    for t in range(1, 16):
        s = s + taps[t]
    mean = jnp.sum(s, axis=0, keepdims=True) * (1.0 / n_valid)  # (1, c1)

    v = jnp.zeros_like(mean)
    for t in range(16):
        d = taps[t] - mean
        v = v + jnp.sum(d * d, axis=0, keepdims=True)
    inv_std = lax.rsqrt(v * (1.0 / n_valid) + _BN_EPS)          # EUP, ~free

    for t in range(16):
        y = (taps[t] - mean) * inv_std
        o_ref[t] = jnp.maximum(y, 0.0).astype(o_ref.dtype)


def _subpix_kernel(lhs_ref, w_ref, o_ref, *, use_bn, act, n_valid):
    """Fused stride-2 ConvTranspose2d (sub-pixel form) + [BatchNorm] + act.

    lhs_ref: (4, M, 4*Cin) bf16 -- phase-p rows are the 2x2-tap im2col of the
                                   1-padded input for output parity p.
    w_ref  : (4, 4*Cin, Cout)  bf16
    o_ref  : (4, M, Cout)      bf16 -- phase-major raw output, interleaved back
                                   to NHWC by the wrapper.
    """
    nph = lhs_ref.shape[0]
    if use_bn:
        accs = [jnp.dot(lhs_ref[p], w_ref[p], preferred_element_type=jnp.float32)
                for p in range(nph)]
        s = accs[0]
        for p in range(1, nph):
            s = s + accs[p]
        mean = jnp.sum(s, axis=0, keepdims=True) * (1.0 / n_valid)   # (1, Cout)
        v = jnp.zeros_like(mean)
        for p in range(nph):
            d = accs[p] - mean
            v = v + jnp.sum(d * d, axis=0, keepdims=True)
        inv_std = lax.rsqrt(v * (1.0 / n_valid) + _BN_EPS)
        for p in range(nph):
            y = (accs[p] - mean) * inv_std
            o_ref[p] = _apply_act(y, act).astype(o_ref.dtype)
    else:
        for p in range(nph):
            acc = jnp.dot(lhs_ref[p], w_ref[p], preferred_element_type=jnp.float32)
            o_ref[p] = _apply_act(acc, act).astype(o_ref.dtype)


# --------------------------------------------------------------------------
# layer wrappers (whole-array VMEM blocks, single invocation, no grid)
# --------------------------------------------------------------------------
def _layer1_block(z2d, w1r):
    B = z2d.shape[0]
    c1 = w1r.shape[1] // 16
    out = pl.pallas_call(
        functools.partial(_layer1_kernel, c1=c1, n_valid=float(16 * B)),
        out_shape=jax.ShapeDtypeStruct((16, B, c1), jnp.bfloat16),
    )(z2d, w1r)
    # (t=ky*4+kx, b, co) -> (b, ky, kx, co)  NHWC 4x4
    return jnp.transpose(out, (1, 0, 2)).reshape(B, 4, 4, c1)


def _build_subpixel_lhs(x):
    """x: (B, H, W, C) bf16 -> (4, B*H*W, 4*C) bf16 phase-major 2x2-tap im2col."""
    B, H, W, C = x.shape
    xp = jnp.pad(x, ((0, 0), (1, 1), (1, 1), (0, 0)))
    phases = []
    for py in range(2):
        for px in range(2):
            taps = [xp[:, py + dy:py + dy + H, px + dx:px + dx + W, :]
                    for dy in range(2) for dx in range(2)]
            phases.append(jnp.concatenate(taps, axis=-1).reshape(B * H * W, 4 * C))
    return jnp.stack(phases, axis=0)


def _subpix_convt_block(x, wp, *, use_bn, act, cout_valid=None):
    """x: (B, H, W, Cin) bf16, wp: (4, 4*Cin, Cout) bf16 -> (B, 2H, 2W, Cout)."""
    B, H, W, C = x.shape
    nph, kc, cout = wp.shape
    assert nph == 4 and kc == 4 * C
    M = B * H * W
    lhs = _build_subpixel_lhs(x.astype(jnp.bfloat16))
    out = pl.pallas_call(
        functools.partial(_subpix_kernel, use_bn=use_bn, act=act,
                          n_valid=float(4 * M)),
        out_shape=jax.ShapeDtypeStruct((4, M, cout), jnp.bfloat16),
    )(lhs, wp)
    if cout_valid is not None and cout_valid < cout:
        out = out[:, :, :cout_valid]            # drop lane-padding channels
        cout = cout_valid
    # interleave the 4 parity phases back into NHWC
    out = out.reshape(2, 2, B, H, W, cout)
    out = jnp.transpose(out, (2, 3, 0, 4, 1, 5))        # (b, q, py, r, px, co)
    return out.reshape(B, 2 * H, 2 * W, cout)


# --------------------------------------------------------------------------
# PresGAN (imgSize < 64 branch of the Generator)
# --------------------------------------------------------------------------
def init_presgan_params(key, img_size, nz, ngf, nc):
    assert img_size < 64, "demo uses the imgSize<64 generator branch"
    k1, k2, k3, k4 = jax.random.split(key, 4)

    def w(kk, cin, cout):
        return 0.02 * jax.random.normal(kk, (cin, cout, 4, 4), jnp.float32)

    return {
        # all repacking / flipping / padding / bf16 casting done ONCE here
        "w1": _prep_w1(w(k1, nz, ngf * 4)),                    # (nz, 16*4ngf)
        "w2": _prep_subpix_w(w(k2, ngf * 4, ngf * 2)),         # (4, 16ngf, 2ngf)
        "w3": _prep_subpix_w(w(k3, ngf * 2, ngf)),             # (4, 8ngf, ngf)
        "w4": _prep_subpix_w(w(k4, ngf, nc), cout_pad=128),    # (4, 4ngf, 128)
        # present in the PyTorch module but unused by forward()
        "log_sigma": jnp.zeros((1, img_size, img_size), jnp.float32),
    }


def presgan_forward(params, z_nchw, *, nc):
    """PresGAN.forward(input) == netG(input): (B, nz, 1, 1) -> (B, nc, 32, 32)."""
    B = z_nchw.shape[0]
    z2d = z_nchw.reshape(B, -1).astype(jnp.bfloat16)
    # ConvT(nz, 4ngf, 4, 1, 0) + BN + ReLU          : 1x1   -> 4x4
    h = _layer1_block(z2d, params["w1"])
    # ConvT(4ngf, 2ngf, 4, 2, 1) + BN + ReLU        : 4x4   -> 8x8
    h = _subpix_convt_block(h, params["w2"], use_bn=True, act="relu")
    # ConvT(2ngf, ngf, 4, 2, 1) + BN + ReLU         : 8x8   -> 16x16
    h = _subpix_convt_block(h, params["w3"], use_bn=True, act="relu")
    # ConvT(ngf, nc, 4, 2, 1) + Tanh                : 16x16 -> 32x32
    h = _subpix_convt_block(h, params["w4"], use_bn=False, act="tanh",
                            cout_valid=nc)
    return jnp.transpose(h, (0, 3, 1, 2)).astype(jnp.float32)   # NCHW f32


# TODO(synk): Discriminator (netD) and the HMC posterior sampling utilities
# (get_samples/_helper) are training-time components, not part of
# PresGAN.forward, and are not ported.


if __name__ == "__main__":
    B, nz, ngf, nc, img_size = 2, 32, 16, 3, 32

    key = jax.random.PRNGKey(0)
    pkey, zkey = jax.random.split(key)
    params = init_presgan_params(pkey, img_size, nz, ngf, nc)
    z = jax.random.normal(zkey, (B, nz, 1, 1), jnp.float32)

    fwd = jax.jit(functools.partial(presgan_forward, nc=nc))
    out = jax.block_until_ready(fwd(params, z))

    assert out.shape == (B, nc, img_size, img_size), out.shape
    assert bool(jnp.all(jnp.isfinite(out)))
    assert bool(jnp.all(jnp.abs(out) <= 1.0 + 1e-6))  # Tanh output range
    print("KERNEL_OK")
</pallas_src>

<mosaic_0001>
module attributes {stable_mosaic.version = 11 : i64} {
  func.func @_layer1_kernel(%arg0: memref<2x32xbf16, #tpu.memory_space<vmem>>, %arg1: memref<32x1024xbf16, #tpu.memory_space<vmem>>, %arg2: memref<16x2x64xbf16, #tpu.memory_space<vmem>>) attributes {dimension_semantics = [], scalar_prefetch = 0 : i64, scratch_operands = 0 : i64, tpu.core_type = #tpu.core_type<tc>} {
    %c0 = arith.constant 0 : index
    %c0_0 = arith.constant 0 : index
    %0 = vector.load %arg0[%c0, %c0_0] : memref<2x32xbf16, #tpu.memory_space<vmem>>, vector<2x32xbf16>
    %c0_1 = arith.constant 0 : index
    %c0_2 = arith.constant 0 : index
    %1 = vector.load %arg1[%c0_1, %c0_2] : memref<32x1024xbf16, #tpu.memory_space<vmem>>, vector<32x1024xbf16>
    %cst = arith.constant dense<0.000000e+00> : vector<2x1024xf32>
    %2 = tpu.matmul %0, %1, %cst {dimension_numbers = #tpu.dot_dimension_numbers<[1], [0], [0], [1], [0, 0, 1, 1], [], []>} : vector<2x32xbf16>, vector<32x1024xbf16>, vector<2x1024xf32> -> vector<2x1024xf32>
    %3 = vector.extract_strided_slice %2 {offsets = [0, 0], sizes = [2, 64], strides = [1, 1]} : vector<2x1024xf32> to vector<2x64xf32>
    %4 = vector.extract_strided_slice %2 {offsets = [0, 64], sizes = [2, 64], strides = [1, 1]} : vector<2x1024xf32> to vector<2x64xf32>
    %5 = vector.extract_strided_slice %2 {offsets = [0, 128], sizes = [2, 64], strides = [1, 1]} : vector<2x1024xf32> to vector<2x64xf32>
    %6 = vector.extract_strided_slice %2 {offsets = [0, 192], sizes = [2, 64], strides = [1, 1]} : vector<2x1024xf32> to vector<2x64xf32>
    %7 = vector.extract_strided_slice %2 {offsets = [0, 256], sizes = [2, 64], strides = [1, 1]} : vector<2x1024xf32> to vector<2x64xf32>
    %8 = vector.extract_strided_slice %2 {offsets = [0, 320], sizes = [2, 64], strides = [1, 1]} : vector<2x1024xf32> to vector<2x64xf32>
    %9 = vector.extract_strided_slice %2 {offsets = [0, 384], sizes = [2, 64], strides = [1, 1]} : vector<2x1024xf32> to vector<2x64xf32>
    %10 = vector.extract_strided_slice %2 {offsets = [0, 448], sizes = [2, 64], strides = [1, 1]} : vector<2x1024xf32> to vector<2x64xf32>
    %11 = vector.extract_strided_slice %2 {offsets = [0, 512], sizes = [2, 64], strides = [1, 1]} : vector<2x1024xf32> to vector<2x64xf32>
    %12 = vector.extract_strided_slice %2 {offsets = [0, 576], sizes = [2, 64], strides = [1, 1]} : vector<2x1024xf32> to vector<2x64xf32>
    %13 = vector.extract_strided_slice %2 {offsets = [0, 640], sizes = [2, 64], strides = [1, 1]} : vector<2x1024xf32> to vector<2x64xf32>
    %14 = vector.extract_strided_slice %2 {offsets = [0, 704], sizes = [2, 64], strides = [1, 1]} : vector<2x1024xf32> to vector<2x64xf32>
    %15 = vector.extract_strided_slice %2 {offsets = [0, 768], sizes = [2, 64], strides = [1, 1]} : vector<2x1024xf32> to vector<2x64xf32>
    %16 = vector.extract_strided_slice %2 {offsets = [0, 832], sizes = [2, 64], strides = [1, 1]} : vector<2x1024xf32> to vector<2x64xf32>
    %17 = vector.extract_strided_slice %2 {offsets = [0, 896], sizes = [2, 64], strides = [1, 1]} : vector<2x1024xf32> to vector<2x64xf32>
    %18 = vector.extract_strided_slice %2 {offsets = [0, 960], sizes = [2, 64], strides = [1, 1]} : vector<2x1024xf32> to vector<2x64xf32>
    %19 = arith.addf %3, %4 : vector<2x64xf32>
    %20 = arith.addf %19, %5 : vector<2x64xf32>
    %21 = arith.addf %20, %6 : vector<2x64xf32>
    %22 = arith.addf %21, %7 : vector<2x64xf32>
    %23 = arith.addf %22, %8 : vector<2x64xf32>
    %24 = arith.addf %23, %9 : vector<2x64xf32>
    %25 = arith.addf %24, %10 : vector<2x64xf32>
    %26 = arith.addf %25, %11 : vector<2x64xf32>
    %27 = arith.addf %26, %12 : vector<2x64xf32>
    %28 = arith.addf %27, %13 : vector<2x64xf32>
    %29 = arith.addf %28, %14 : vector<2x64xf32>
    %30 = arith.addf %29, %15 : vector<2x64xf32>
    %31 = arith.addf %30, %16 : vector<2x64xf32>
    %32 = arith.addf %31, %17 : vector<2x64xf32>
    %33 = arith.addf %32, %18 : vector<2x64xf32>
    %cst_3 = arith.constant dense<0.000000e+00> : vector<64xf32>
    %34 = vector.multi_reduction <add>, %33, %cst_3 [0] : vector<2x64xf32> to vector<64xf32>
    %35 = vector.shape_cast %34 : vector<64xf32> to vector<1x64xf32>
    %cst_4 = arith.constant 3.125000e-02 : f32
    %36 = vector.broadcast %cst_4 : f32 to vector<1x64xf32>
    %37 = arith.mulf %35, %36 : vector<1x64xf32>
    %cst_5 = arith.constant 0.000000e+00 : f32
    %38 = vector.broadcast %cst_5 : f32 to vector<1x64xf32>
    %39 = vector.broadcast %37 : vector<1x64xf32> to vector<2x64xf32>
    %40 = arith.subf %3, %39 : vector<2x64xf32>
    %41 = arith.mulf %40, %40 : vector<2x64xf32>
    %cst_6 = arith.constant dense<0.000000e+00> : vector<64xf32>
    %42 = vector.multi_reduction <add>, %41, %cst_6 [0] : vector<2x64xf32> to vector<64xf32>
    %43 = vector.shape_cast %42 : vector<64xf32> to vector<1x64xf32>
    %44 = arith.addf %38, %43 : vector<1x64xf32>
    %45 = vector.broadcast %37 : vector<1x64xf32> to vector<2x64xf32>
    %46 = arith.subf %4, %45 : vector<2x64xf32>
    %47 = arith.mulf %46, %46 : vector<2x64xf32>
    %cst_7 = arith.constant dense<0.000000e+00> : vector<64xf32>
    %48 = vector.multi_reduction <add>, %47, %cst_7 [0] : vector<2x64xf32> to vector<64xf32>
    %49 = vector.shape_cast %48 : vector<64xf32> to vector<1x64xf32>
    %50 = arith.addf %44, %49 : vector<1x64xf32>
    %51 = vector.broadcast %37 : vector<1x64xf32> to vector<2x64xf32>
    %52 = arith.subf %5, %51 : vector<2x64xf32>
    %53 = arith.mulf %52, %52 : vector<2x64xf32>
    %cst_8 = arith.constant dense<0.000000e+00> : vector<64xf32>
    %54 = vector.multi_reduction <add>, %53, %cst_8 [0] : vector<2x64xf32> to vector<64xf32>
    %55 = vector.shape_cast %54 : vector<64xf32> to vector<1x64xf32>
    %56 = arith.addf %50, %55 : vector<1x64xf32>
    %57 = vector.broadcast %37 : vector<1x64xf32> to vector<2x64xf32>
    %58 = arith.subf %6, %57 : vector<2x64xf32>
    %59 = arith.mulf %58, %58 : vector<2x64xf32>
    %cst_9 = arith.constant dense<0.000000e+00> : vector<64xf32>
    %60 = vector.multi_reduction <add>, %59, %cst_9 [0] : vector<2x64xf32> to vector<64xf32>
    %61 = vector.shape_cast %60 : vector<64xf32> to vector<1x64xf32>
    %62 = arith.addf %56, %61 : vector<1x64xf32>
    %63 = vector.broadcast %37 : vector<1x64xf32> to vector<2x64xf32>
    %64 = arith.subf %7, %63 : vector<2x64xf32>
    %65 = arith.mulf %64, %64 : vector<2x64xf32>
    %cst_10 = arith.constant dense<0.000000e+00> : vector<64xf32>
    %66 = vector.multi_reduction <add>, %65, %cst_10 [0] : vector<2x64xf32> to vector<64xf32>
    %67 = vector.shape_cast %66 : vector<64xf32> to vector<1x64xf32>
    %68 = arith.addf %62, %67 : vector<1x64xf32>
    %69 = vector.broadcast %37 : vector<1x64xf32> to vector<2x64xf32>
    %70 = arith.subf %8, %69 : vector<2x64xf32>
    %71 = arith.mulf %70, %70 : vector<2x64xf32>
    %cst_11 = arith.constant dense<0.000000e+00> : vector<64xf32>
    %72 = vector.multi_reduction <add>, %71, %cst_11 [0] : vector<2x64xf32> to vector<64xf32>
    %73 = vector.shape_cast %72 : vector<64xf32> to vector<1x64xf32>
    %74 = arith.addf %68, %73 : vector<1x64xf32>
    %75 = vector.broadcast %37 : vector<1x64xf32> to vector<2x64xf32>
    %76 = arith.subf %9, %75 : vector<2x64xf32>
    %77 = arith.mulf %76, %76 : vector<2x64xf32>
    %cst_12 = arith.constant dense<0.000000e+00> : vector<64xf32>
    %78 = vector.multi_reduction <add>, %77, %cst_12 [0] : vector<2x64xf32> to vector<64xf32>
    %79 = vector.shape_cast %78 : vector<64xf32> to vector<1x64xf32>
    %80 = arith.addf %74, %79 : vector<1x64xf32>
    %81 = vector.broadcast %37 : vector<1x64xf32> to vector<2x64xf32>
    %82 = arith.subf %10, %81 : vector<2x64xf32>
    %83 = arith.mulf %82, %82 : vector<2x64xf32>
    %cst_13 = arith.constant dense<0.000000e+00> : vector<64xf32>
    %84 = vector.multi_reduction <add>, %83, %cst_13 [0] : vector<2x64xf32> to vector<64xf32>
    %85 = vector.shape_cast %84 : vector<64xf32> to vector<1x64xf32>
    %86 = arith.addf %80, %85 : vector<1x64xf32>
    %87 = vector.broadcast %37 : vector<1x64xf32> to vector<2x64xf32>
    %88 = arith.subf %11, %87 : vector<2x64xf32>
    %89 = arith.mulf %88, %88 : vector<2x64xf32>
    %cst_14 = arith.constant dense<0.000000e+00> : vector<64xf32>
    %90 = vector.multi_reduction <add>, %89, %cst_14 [0] : vector<2x64xf32> to vector<64xf32>
    %91 = vector.shape_cast %90 : vector<64xf32> to vector<1x64xf32>
    %92 = arith.addf %86, %91 : vector<1x64xf32>
    %93 = vector.broadcast %37 : vector<1x64xf32> to vector<2x64xf32>
    %94 = arith.subf %12, %93 : vector<2x64xf32>
    %95 = arith.mulf %94, %94 : vector<2x64xf32>
    %cst_15 = arith.constant dense<0.000000e+00> : vector<64xf32>
    %96 = vector.multi_reduction <add>, %95, %cst_15 [0] : vector<2x64xf32> to vector<64xf32>
    %97 = vector.shape_cast %96 : vector<64xf32> to vector<1x64xf32>
    %98 = arith.addf %92, %97 : vector<1x64xf32>
    %99 = vector.broadcast %37 : vector<1x64xf32> to vector<2x64xf32>
    %100 = arith.subf %13, %99 : vector<2x64xf32>
    %101 = arith.mulf %100, %100 : vector<2x64xf32>
    %cst_16 = arith.constant dense<0.000000e+00> : vector<64xf32>
    %102 = vector.multi_reduction <add>, %101, %cst_16 [0] : vector<2x64xf32> to vector<64xf32>
    %103 = vector.shape_cast %102 : vector<64xf32> to vector<1x64xf32>
    %104 = arith.addf %98, %103 : vector<1x64xf32>
    %105 = vector.broadcast %37 : vector<1x64xf32> to vector<2x64xf32>
    %106 = arith.subf %14, %105 : vector<2x64xf32>
    %107 = arith.mulf %106, %106 : vector<2x64xf32>
    %cst_17 = arith.constant dense<0.000000e+00> : vector<64xf32>
    %108 = vector.multi_reduction <add>, %107, %cst_17 [0] : vector<2x64xf32> to vector<64xf32>
    %109 = vector.shape_cast %108 : vector<64xf32> to vector<1x64xf32>
    %110 = arith.addf %104, %109 : vector<1x64xf32>
    %111 = vector.broadcast %37 : vector<1x64xf32> to vector<2x64xf32>
    %112 = arith.subf %15, %111 : vector<2x64xf32>
    %113 = arith.mulf %112, %112 : vector<2x64xf32>
    %cst_18 = arith.constant dense<0.000000e+00> : vector<64xf32>
    %114 = vector.multi_reduction <add>, %113, %cst_18 [0] : vector<2x64xf32> to vector<64xf32>
    %115 = vector.shape_cast %114 : vector<64xf32> to vector<1x64xf32>
    %116 = arith.addf %110, %115 : vector<1x64xf32>
    %117 = vector.broadcast %37 : vector<1x64xf32> to vector<2x64xf32>
    %118 = arith.subf %16, %117 : vector<2x64xf32>
    %119 = arith.mulf %118, %118 : vector<2x64xf32>
    %cst_19 = arith.constant dense<0.000000e+00> : vector<64xf32>
    %120 = vector.multi_reduction <add>, %119, %cst_19 [0] : vector<2x64xf32> to vector<64xf32>
    %121 = vector.shape_cast %120 : vector<64xf32> to vector<1x64xf32>
    %122 = arith.addf %116, %121 : vector<1x64xf32>
    %123 = vector.broadcast %37 : vector<1x64xf32> to vector<2x64xf32>
    %124 = arith.subf %17, %123 : vector<2x64xf32>
    %125 = arith.mulf %124, %124 : vector<2x64xf32>
    %cst_20 = arith.constant dense<0.000000e+00> : vector<64xf32>
    %126 = vector.multi_reduction <add>, %125, %cst_20 [0] : vector<2x64xf32> to vector<64xf32>
    %127 = vector.shape_cast %126 : vector<64xf32> to vector<1x64xf32>
    %128 = arith.addf %122, %127 : vector<1x64xf32>
    %129 = vector.broadcast %37 : vector<1x64xf32> to vector<2x64xf32>
    %130 = arith.subf %18, %129 : vector<2x64xf32>
    %131 = arith.mulf %130, %130 : vector<2x64xf32>
    %cst_21 = arith.constant dense<0.000000e+00> : vector<64xf32>
    %132 = vector.multi_reduction <add>, %131, %cst_21 [0] : vector<2x64xf32> to vector<64xf32>
    %133 = vector.shape_cast %132 : vector<64xf32> to vector<1x64xf32>
    %134 = arith.addf %128, %133 : vector<1x64xf32>
    %cst_22 = arith.constant 3.125000e-02 : f32
    %135 = vector.broadcast %cst_22 : f32 to vector<1x64xf32>
    %136 = arith.mulf %134, %135 : vector<1x64xf32>
    %cst_23 = arith.constant 9.99999974E-6 : f32
    %137 = vector.broadcast %cst_23 : f32 to vector<1x64xf32>
    %138 = arith.addf %136, %137 : vector<1x64xf32>
    %139 = math.rsqrt %138 : vector<1x64xf32>
    %140 = vector.broadcast %37 : vector<1x64xf32> to vector<2x64xf32>
    %141 = arith.subf %3, %140 : vector<2x64xf32>
    %142 = vector.broadcast %139 : vector<1x64xf32> to vector<2x64xf32>
    %143 = arith.mulf %141, %142 : vector<2x64xf32>
    %cst_24 = arith.constant 0.000000e+00 : f32
    %144 = vector.broadcast %cst_24 : f32 to vector<2x64xf32>
    %145 = arith.maximumf %143, %144 : vector<2x64xf32>
    %146 = arith.truncf %145 : vector<2x64xf32> to vector<2x64xbf16>
    %c0_25 = arith.constant 0 : index
    %c0_26 = arith.constant 0 : index
    %c0_27 = arith.constant 0 : index
    %147 = vector.load %arg2[%c0_25, %c0_26, %c0_27] : memref<16x2x64xbf16, #tpu.memory_space<vmem>>, vector<1x2x64xbf16>
    %148 = vector.shape_cast %147 : vector<1x2x64xbf16> to vector<2x64xbf16>
    %149 = vector.shape_cast %146 : vector<2x64xbf16> to vector<1x2x64xbf16>
    tpu.vector_store %arg2[%c0_25, %c0_26, %c0_27], %149 {strides = array<i32>} : memref<16x2x64xbf16, #tpu.memory_space<vmem>>, vector<1x2x64xbf16>,
    %150 = vector.broadcast %37 : vector<1x64xf32> to vector<2x64xf32>
    %151 = arith.subf %4, %150 : vector<2x64xf32>
    %152 = vector.broadcast %139 : vector<1x64xf32> to vector<2x64xf32>
    %153 = arith.mulf %151, %152 : vector<2x64xf32>
    %cst_28 = arith.constant 0.000000e+00 : f32
    %154 = vector.broadcast %cst_28 : f32 to vector<2x64xf32>
    %155 = arith.maximumf %153, %154 : vector<2x64xf32>
    %156 = arith.truncf %155 : vector<2x64xf32> to vector<2x64xbf16>
    %c1 = arith.constant 1 : index
    %c0_29 = arith.constant 0 : index
    %c0_30 = arith.constant 0 : index
    %157 = vector.load %arg2[%c1, %c0_29, %c0_30] : memref<16x2x64xbf16, #tpu.memory_space<vmem>>, vector<1x2x64xbf16>
    %158 = vector.shape_cast %157 : vector<1x2x64xbf16> to vector<2x64xbf16>
    %159 = vector.shape_cast %156 : vector<2x64xbf16> to vector<1x2x64xbf16>
    tpu.vector_store %arg2[%c1, %c0_29, %c0_30], %159 {strides = array<i32>} : memref<16x2x64xbf16, #tpu.memory_space<vmem>>, vector<1x2x64xbf16>,
    %160 = vector.broadcast %37 : vector<1x64xf32> to vector<2x64xf32>
    %161 = arith.subf %5, %160 : vector<2x64xf32>
    %162 = vector.broadcast %139 : vector<1x64xf32> to vector<2x64xf32>
    %163 = arith.mulf %161, %162 : vector<2x64xf32>
    %cst_31 = arith.constant 0.000000e+00 : f32
    %164 = vector.broadcast %cst_31 : f32 to vector<2x64xf32>
    %165 = arith.maximumf %163, %164 : vector<2x64xf32>
    %166 = arith.truncf %165 : vector<2x64xf32> to vector<2x64xbf16>
    %c2 = arith.constant 2 : index
    %c0_32 = arith.constant 0 : index
    %c0_33 = arith.constant 0 : index
    %167 = vector.load %arg2[%c2, %c0_32, %c0_33] : memref<16x2x64xbf16, #tpu.memory_space<vmem>>, vector<1x2x64xbf16>
    %168 = vector.shape_cast %167 : vector<1x2x64xbf16> to vector<2x64xbf16>
    %169 = vector.shape_cast %166 : vector<2x64xbf16> to vector<1x2x64xbf16>
    tpu.vector_store %arg2[%c2, %c0_32, %c0_33], %169 {strides = array<i32>} : memref<16x2x64xbf16, #tpu.memory_space<vmem>>, vector<1x2x64xbf16>,
    %170 = vector.broadcast %37 : vector<1x64xf32> to vector<2x64xf32>
    %171 = arith.subf %6, %170 : vector<2x64xf32>
    %172 = vector.broadcast %139 : vector<1x64xf32> to vector<2x64xf32>
    %173 = arith.mulf %171, %172 : vector<2x64xf32>
    %cst_34 = arith.constant 0.000000e+00 : f32
    %174 = vector.broadcast %cst_34 : f32 to vector<2x64xf32>
    %175 = arith.maximumf %173, %174 : vector<2x64xf32>
    %176 = arith.truncf %175 : vector<2x64xf32> to vector<2x64xbf16>
    %c3 = arith.constant 3 : index
    %c0_35 = arith.constant 0 : index
    %c0_36 = arith.constant 0 : index
    %177 = vector.load %arg2[%c3, %c0_35, %c0_36] : memref<16x2x64xbf16, #tpu.memory_space<vmem>>, vector<1x2x64xbf16>
    %178 = vector.shape_cast %177 : vector<1x2x64xbf16> to vector<2x64xbf16>
    %179 = vector.shape_cast %176 : vector<2x64xbf16> to vector<1x2x64xbf16>
    tpu.vector_store %arg2[%c3, %c0_35, %c0_36], %179 {strides = array<i32>} : memref<16x2x64xbf16, #tpu.memory_space<vmem>>, vector<1x2x64xbf16>,
    %180 = vector.broadcast %37 : vector<1x64xf32> to vector<2x64xf32>
    %181 = arith.subf %7, %180 : vector<2x64xf32>
    %182 = vector.broadcast %139 : vector<1x64xf32> to vector<2x64xf32>
    %183 = arith.mulf %181, %182 : vector<2x64xf32>
    %cst_37 = arith.constant 0.000000e+00 : f32
    %184 = vector.broadcast %cst_37 : f32 to vector<2x64xf32>
    %185 = arith.maximumf %183, %184 : vector<2x64xf32>
    %186 = arith.truncf %185 : vector<2x64xf32> to vector<2x64xbf16>
    %c4 = arith.constant 4 : index
    %c0_38 = arith.constant 0 : index
    %c0_39 = arith.constant 0 : index
    %187 = vector.load %arg2[%c4, %c0_38, %c0_39] : memref<16x2x64xbf16, #tpu.memory_space<vmem>>, vector<1x2x64xbf16>
    %188 = vector.shape_cast %187 : vector<1x2x64xbf16> to vector<2x64xbf16>
    %189 = vector.shape_cast %186 : vector<2x64xbf16> to vector<1x2x64xbf16>
    tpu.vector_store %arg2[%c4, %c0_38, %c0_39], %189 {strides = array<i32>} : memref<16x2x64xbf16, #tpu.memory_space<vmem>>, vector<1x2x64xbf16>,
    %190 = vector.broadcast %37 : vector<1x64xf32> to vector<2x64xf32>
    %191 = arith.subf %8, %190 : vector<2x64xf32>
    %192 = vector.broadcast %139 : vector<1x64xf32> to vector<2x64xf32>
    %193 = arith.mulf %191, %192 : vector<2x64xf32>
    %cst_40 = arith.constant 0.000000e+00 : f32
    %194 = vector.broadcast %cst_40 : f32 to vector<2x64xf32>
    %195 = arith.maximumf %193, %194 : vector<2x64xf32>
    %196 = arith.truncf %195 : vector<2x64xf32> to vector<2x64xbf16>
    %c5 = arith.constant 5 : index
    %c0_41 = arith.constant 0 : index
    %c0_42 = arith.constant 0 : index
    %197 = vector.load %arg2[%c5, %c0_41, %c0_42] : memref<16x2x64xbf16, #tpu.memory_space<vmem>>, vector<1x2x64xbf16>
    %198 = vector.shape_cast %197 : vector<1x2x64xbf16> to vector<2x64xbf16>
    %199 = vector.shape_cast %196 : vector<2x64xbf16> to vector<1x2x64xbf16>
    tpu.vector_store %arg2[%c5, %c0_41, %c0_42], %199 {strides = array<i32>} : memref<16x2x64xbf16, #tpu.memory_space<vmem>>, vector<1x2x64xbf16>,
    %200 = vector.broadcast %37 : vector<1x64xf32> to vector<2x64xf32>
    %201 = arith.subf %9, %200 : vector<2x64xf32>
    %202 = vector.broadcast %139 : vector<1x64xf32> to vector<2x64xf32>
    %203 = arith.mulf %201, %202 : vector<2x64xf32>
    %cst_43 = arith.constant 0.000000e+00 : f32
    %204 = vector.broadcast %cst_43 : f32 to vector<2x64xf32>
    %205 = arith.maximumf %203, %204 : vector<2x64xf32>
    %206 = arith.truncf %205 : vector<2x64xf32> to vector<2x64xbf16>
    %c6 = arith.constant 6 : index
    %c0_44 = arith.constant 0 : index
    %c0_45 = arith.constant 0 : index
    %207 = vector.load %arg2[%c6, %c0_44, %c0_45] : memref<16x2x64xbf16, #tpu.memory_space<vmem>>, vector<1x2x64xbf16>
    %208 = vector.shape_cast %207 : vector<1x2x64xbf16> to vector<2x64xbf16>
    %209 = vector.shape_cast %206 : vector<2x64xbf16> to vector<1x2x64xbf16>
    tpu.vector_store %arg2[%c6, %c0_44, %c0_45], %209 {strides = array<i32>} : memref<16x2x64xbf16, #tpu.memory_space<vmem>>, vector<1x2x64xbf16>,
    %210 = vector.broadcast %37 : vector<1x64xf32> to vector<2x64xf32>
    %211 = arith.subf %10, %210 : vector<2x64xf32>
    %212 = vector.broadcast %139 : vector<1x64xf32> to vector<2x64xf32>
    %213 = arith.mulf %211, %212 : vector<2x64xf32>
    %cst_46 = arith.constant 0.000000e+00 : f32
    %214 = vector.broadcast %cst_46 : f32 to vector<2x64xf32>
    %215 = arith.maximumf %213, %214 : vector<2x64xf32>
    %216 = arith.truncf %215 : vector<2x64xf32> to vector<2x64xbf16>
    %c7 = arith.constant 7 : index
    %c0_47 = arith.constant 0 : index
    %c0_48 = arith.constant 0 : index
    %217 = vector.load %arg2[%c7, %c0_47, %c0_48] : memref<16x2x64xbf16, #tpu.memory_space<vmem>>, vector<1x2x64xbf16>
    %218 = vector.shape_cast %217 : vector<1x2x64xbf16> to vector<2x64xbf16>
    %219 = vector.shape_cast %216 : vector<2x64xbf16> to vector<1x2x64xbf16>
    tpu.vector_store %arg2[%c7, %c0_47, %c0_48], %219 {strides = array<i32>} : memref<16x2x64xbf16, #tpu.memory_space<vmem>>, vector<1x2x64xbf16>,
    %220 = vector.broadcast %37 : vector<1x64xf32> to vector<2x64xf32>
    %221 = arith.subf %11, %220 : vector<2x64xf32>
    %222 = vector.broadcast %139 : vector<1x64xf32> to vector<2x64xf32>
    %223 = arith.mulf %221, %222 : vector<2x64xf32>
    %cst_49 = arith.constant 0.000000e+00 : f32
    %224 = vector.broadcast %cst_49 : f32 to vector<2x64xf32>
    %225 = arith.maximumf %223, %224 : vector<2x64xf32>
    %226 = arith.truncf %225 : vector<2x64xf32> to vector<2x64xbf16>
    %c8 = arith.constant 8 : index
    %c0_50 = arith.constant 0 : index
    %c0_51 = arith.constant 0 : index
    %227 = vector.load %arg2[%c8, %c0_50, %c0_51] : memref<16x2x64xbf16, #tpu.memory_space<vmem>>, vector<1x2x64xbf16>
    %228 = vector.shape_cast %227 : vector<1x2x64xbf16> to vector<2x64xbf16>
    %229 = vector.shape_cast %226 : vector<2x64xbf16> to vector<1x2x64xbf16>
    tpu.vector_store %arg2[%c8, %c0_50, %c0_51], %229 {strides = array<i32>} : memref<16x2x64xbf16, #tpu.memory_space<vmem>>, vector<1x2x64xbf16>,
    %230 = vector.broadcast %37 : vector<1x64xf32> to vector<2x64xf32>
    %231 = arith.subf %12, %230 : vector<2x64xf32>
    %232 = vector.broadcast %139 : vector<1x64xf32> to vector<2x64xf32>
    %233 = arith.mulf %231, %232 : vector<2x64xf32>
    %cst_52 = arith.constant 0.000000e+00 : f32
    %234 = vector.broadcast %cst_52 : f32 to vector<2x64xf32>
    %235 = arith.maximumf %233, %234 : vector<2x64xf32>
    %236 = arith.truncf %235 : vector<2x64xf32> to vector<2x64xbf16>
    %c9 = arith.constant 9 : index
    %c0_53 = arith.constant 0 : index
    %c0_54 = arith.constant 0 : index
    %237 = vector.load %arg2[%c9, %c0_53, %c0_54] : memref<16x2x64xbf16, #tpu.memory_space<vmem>>, vector<1x2x64xbf16>
    %238 = vector.shape_cast %237 : vector<1x2x64xbf16> to vector<2x64xbf16>
    %239 = vector.shape_cast %236 : vector<2x64xbf16> to vector<1x2x64xbf16>
    tpu.vector_store %arg2[%c9, %c0_53, %c0_54], %239 {strides = array<i32>} : memref<16x2x64xbf16, #tpu.memory_space<vmem>>, vector<1x2x64xbf16>,
    %240 = vector.broadcast %37 : vector<1x64xf32> to vector<2x64xf32>
    %241 = arith.subf %13, %240 : vector<2x64xf32>
    %242 = vector.broadcast %139 : vector<1x64xf32> to vector<2x64xf32>
    %243 = arith.mulf %241, %242 : vector<2x64xf32>
    %cst_55 = arith.constant 0.000000e+00 : f32
    %244 = vector.broadcast %cst_55 : f32 to vector<2x64xf32>
    %245 = arith.maximumf %243, %244 : vector<2x64xf32>
    %246 = arith.truncf %245 : vector<2x64xf32> to vector<2x64xbf16>
    %c10 = arith.constant 10 : index
    %c0_56 = arith.constant 0 : index
    %c0_57 = arith.constant 0 : index
    %247 = vector.load %arg2[%c10, %c0_56, %c0_57] : memref<16x2x64xbf16, #tpu.memory_space<vmem>>, vector<1x2x64xbf16>
    %248 = vector.shape_cast %247 : vector<1x2x64xbf16> to vector<2x64xbf16>
    %249 = vector.shape_cast %246 : vector<2x64xbf16> to vector<1x2x64xbf16>
    tpu.vector_store %arg2[%c10, %c0_56, %c0_57], %249 {strides = array<i32>} : memref<16x2x64xbf16, #tpu.memory_space<vmem>>, vector<1x2x64xbf16>,
    %250 = vector.broadcast %37 : vector<1x64xf32> to vector<2x64xf32>
    %251 = arith.subf %14, %250 : vector<2x64xf32>
    %252 = vector.broadcast %139 : vector<1x64xf32> to vector<2x64xf32>
    %253 = arith.mulf %251, %252 : vector<2x64xf32>
    %cst_58 = arith.constant 0.000000e+00 : f32
    %254 = vector.broadcast %cst_58 : f32 to vector<2x64xf32>
    %255 = arith.maximumf %253, %254 : vector<2x64xf32>
    %256 = arith.truncf %255 : vector<2x64xf32> to vector<2x64xbf16>
    %c11 = arith.constant 11 : index
    %c0_59 = arith.constant 0 : index
    %c0_60 = arith.constant 0 : index
    %257 = vector.load %arg2[%c11, %c0_59, %c0_60] : memref<16x2x64xbf16, #tpu.memory_space<vmem>>, vector<1x2x64xbf16>
    %258 = vector.shape_cast %257 : vector<1x2x64xbf16> to vector<2x64xbf16>
    %259 = vector.shape_cast %256 : vector<2x64xbf16> to vector<1x2x64xbf16>
    tpu.vector_store %arg2[%c11, %c0_59, %c0_60], %259 {strides = array<i32>} : memref<16x2x64xbf16, #tpu.memory_space<vmem>>, vector<1x2x64xbf16>,
    %260 = vector.broadcast %37 : vector<1x64xf32> to vector<2x64xf32>
    %261 = arith.subf %15, %260 : vector<2x64xf32>
    %262 = vector.broadcast %139 : vector<1x64xf32> to vector<2x64xf32>
    %263 = arith.mulf %261, %262 : vector<2x64xf32>
    %cst_61 = arith.constant 0.000000e+00 : f32
    %264 = vector.broadcast %cst_61 : f32 to vector<2x64xf32>
    %265 = arith.maximumf %263, %264 : vector<2x64xf32>
    %266 = arith.truncf %265 : vector<2x64xf32> to vector<2x64xbf16>
    %c12 = arith.constant 12 : index
    %c0_62 = arith.constant 0 : index
    %c0_63 = arith.constant 0 : index
    %267 = vector.load %arg2[%c12, %c0_62, %c0_63] : memref<16x2x64xbf16, #tpu.memory_space<vmem>>, vector<1x2x64xbf16>
    %268 = vector.shape_cast %267 : vector<1x2x64xbf16> to vector<2x64xbf16>
    %269 = vector.shape_cast %266 : vector<2x64xbf16> to vector<1x2x64xbf16>
    tpu.vector_store %arg2[%c12, %c0_62, %c0_63], %269 {strides = array<i32>} : memref<16x2x64xbf16, #tpu.memory_space<vmem>>, vector<1x2x64xbf16>,
    %270 = vector.broadcast %37 : vector<1x64xf32> to vector<2x64xf32>
    %271 = arith.subf %16, %270 : vector<2x64xf32>
    %272 = vector.broadcast %139 : vector<1x64xf32> to vector<2x64xf32>
    %273 = arith.mulf %271, %272 : vector<2x64xf32>
    %cst_64 = arith.constant 0.000000e+00 : f32
    %274 = vector.broadcast %cst_64 : f32 to vector<2x64xf32>
    %275 = arith.maximumf %273, %274 : vector<2x64xf32>
    %276 = arith.truncf %275 : vector<2x64xf32> to vector<2x64xbf16>
    %c13 = arith.constant 13 : index
    %c0_65 = arith.constant 0 : index
    %c0_66 = arith.constant 0 : index
    %277 = vector.load %arg2[%c13, %c0_65, %c0_66] : memref<16x2x64xbf16, #tpu.memory_space<vmem>>, vector<1x2x64xbf16>
    %278 = vector.shape_cast %277 : vector<1x2x64xbf16> to vector<2x64xbf16>
    %279 = vector.shape_cast %276 : vector<2x64xbf16> to vector<1x2x64xbf16>
    tpu.vector_store %arg2[%c13, %c0_65, %c0_66], %279 {strides = array<i32>} : memref<16x2x64xbf16, #tpu.memory_space<vmem>>, vector<1x2x64xbf16>,
    %280 = vector.broadcast %37 : vector<1x64xf32> to vector<2x64xf32>
    %281 = arith.subf %17, %280 : vector<2x64xf32>
    %282 = vector.broadcast %139 : vector<1x64xf32> to vector<2x64xf32>
    %283 = arith.mulf %281, %282 : vector<2x64xf32>
    %cst_67 = arith.constant 0.000000e+00 : f32
    %284 = vector.broadcast %cst_67 : f32 to vector<2x64xf32>
    %285 = arith.maximumf %283, %284 : vector<2x64xf32>
    %286 = arith.truncf %285 : vector<2x64xf32> to vector<2x64xbf16>
    %c14 = arith.constant 14 : index
    %c0_68 = arith.constant 0 : index
    %c0_69 = arith.constant 0 : index
    %287 = vector.load %arg2[%c14, %c0_68, %c0_69] : memref<16x2x64xbf16, #tpu.memory_space<vmem>>, vector<1x2x64xbf16>
    %288 = vector.shape_cast %287 : vector<1x2x64xbf16> to vector<2x64xbf16>
    %289 = vector.shape_cast %286 : vector<2x64xbf16> to vector<1x2x64xbf16>
    tpu.vector_store %arg2[%c14, %c0_68, %c0_69], %289 {strides = array<i32>} : memref<16x2x64xbf16, #tpu.memory_space<vmem>>, vector<1x2x64xbf16>,
    %290 = vector.broadcast %37 : vector<1x64xf32> to vector<2x64xf32>
    %291 = arith.subf %18, %290 : vector<2x64xf32>
    %292 = vector.broadcast %139 : vector<1x64xf32> to vector<2x64xf32>
    %293 = arith.mulf %291, %292 : vector<2x64xf32>
    %cst_70 = arith.constant 0.000000e+00 : f32
    %294 = vector.broadcast %cst_70 : f32 to vector<2x64xf32>
    %295 = arith.maximumf %293, %294 : vector<2x64xf32>
    %296 = arith.truncf %295 : vector<2x64xf32> to vector<2x64xbf16>
    %c15 = arith.constant 15 : index
    %c0_71 = arith.constant 0 : index
    %c0_72 = arith.constant 0 : index
    %297 = vector.load %arg2[%c15, %c0_71, %c0_72] : memref<16x2x64xbf16, #tpu.memory_space<vmem>>, vector<1x2x64xbf16>
    %298 = vector.shape_cast %297 : vector<1x2x64xbf16> to vector<2x64xbf16>
    %299 = vector.shape_cast %296 : vector<2x64xbf16> to vector<1x2x64xbf16>
    tpu.vector_store %arg2[%c15, %c0_71, %c0_72], %299 {strides = array<i32>} : memref<16x2x64xbf16, #tpu.memory_space<vmem>>, vector<1x2x64xbf16>,
    return
  }
}

module attributes {stable_mosaic.version = 11 : i64} {
  func.func @_subpix_kernel(%arg0: memref<4x32x256xbf16, #tpu.memory_space<vmem>>, %arg1: memref<4x256x32xbf16, #tpu.memory_space<vmem>>, %arg2: memref<4x32x32xbf16, #tpu.memory_space<vmem>>) attributes {dimension_semantics = [], scalar_prefetch = 0 : i64, scratch_operands = 0 : i64, tpu.core_type = #tpu.core_type<tc>} {
    %c0 = arith.constant 0 : index
    %c0_0 = arith.constant 0 : index
    %c0_1 = arith.constant 0 : index
    %0 = vector.load %arg0[%c0, %c0_0, %c0_1] : memref<4x32x256xbf16, #tpu.memory_space<vmem>>, vector<1x32x256xbf16>
    %1 = vector.shape_cast %0 : vector<1x32x256xbf16> to vector<32x256xbf16>
    %c0_2 = arith.constant 0 : index
    %c0_3 = arith.constant 0 : index
    %c0_4 = arith.constant 0 : index
    %2 = vector.load %arg1[%c0_2, %c0_3, %c0_4] : memref<4x256x32xbf16, #tpu.memory_space<vmem>>, vector<1x256x32xbf16>
    %3 = vector.shape_cast %2 : vector<1x256x32xbf16> to vector<256x32xbf16>
    %cst = arith.constant dense<0.000000e+00> : vector<32x32xf32>
    %4 = tpu.matmul %1, %3, %cst {dimension_numbers = #tpu.dot_dimension_numbers<[1], [0], [0], [1], [0, 0, 1, 1], [], []>} : vector<32x256xbf16>, vector<256x32xbf16>, vector<32x32xf32> -> vector<32x32xf32>
    %c1 = arith.constant 1 : index
    %c0_5 = arith.constant 0 : index
    %c0_6 = arith.constant 0 : index
    %5 = vector.load %arg0[%c1, %c0_5, %c0_6] : memref<4x32x256xbf16, #tpu.memory_space<vmem>>, vector<1x32x256xbf16>
    %6 = vector.shape_cast %5 : vector<1x32x256xbf16> to vector<32x256xbf16>
    %c1_7 = arith.constant 1 : index
    %c0_8 = arith.constant 0 : index
    %c0_9 = arith.constant 0 : index
    %7 = vector.load %arg1[%c1_7, %c0_8, %c0_9] : memref<4x256x32xbf16, #tpu.memory_space<vmem>>, vector<1x256x32xbf16>
    %8 = vector.shape_cast %7 : vector<1x256x32xbf16> to vector<256x32xbf16>
    %cst_10 = arith.constant dense<0.000000e+00> : vector<32x32xf32>
    %9 = tpu.matmul %6, %8, %cst_10 {dimension_numbers = #tpu.dot_dimension_numbers<[1], [0], [0], [1], [0, 0, 1, 1], [], []>} : vector<32x256xbf16>, vector<256x32xbf16>, vector<32x32xf32> -> vector<32x32xf32>
    %c2 = arith.constant 2 : index
    %c0_11 = arith.constant 0 : index
    %c0_12 = arith.constant 0 : index
    %10 = vector.load %arg0[%c2, %c0_11, %c0_12] : memref<4x32x256xbf16, #tpu.memory_space<vmem>>, vector<1x32x256xbf16>
    %11 = vector.shape_cast %10 : vector<1x32x256xbf16> to vector<32x256xbf16>
    %c2_13 = arith.constant 2 : index
    %c0_14 = arith.constant 0 : index
    %c0_15 = arith.constant 0 : index
    %12 = vector.load %arg1[%c2_13, %c0_14, %c0_15] : memref<4x256x32xbf16, #tpu.memory_space<vmem>>, vector<1x256x32xbf16>
    %13 = vector.shape_cast %12 : vector<1x256x32xbf16> to vector<256x32xbf16>
    %cst_16 = arith.constant dense<0.000000e+00> : vector<32x32xf32>
    %14 = tpu.matmul %11, %13, %cst_16 {dimension_numbers = #tpu.dot_dimension_numbers<[1], [0], [0], [1], [0, 0, 1, 1], [], []>} : vector<32x256xbf16>, vector<256x32xbf16>, vector<32x32xf32> -> vector<32x32xf32>
    %c3 = arith.constant 3 : index
    %c0_17 = arith.constant 0 : index
    %c0_18 = arith.constant 0 : index
    %15 = vector.load %arg0[%c3, %c0_17, %c0_18] : memref<4x32x256xbf16, #tpu.memory_space<vmem>>, vector<1x32x256xbf16>
    %16 = vector.shape_cast %15 : vector<1x32x256xbf16> to vector<32x256xbf16>
    %c3_19 = arith.constant 3 : index
    %c0_20 = arith.constant 0 : index
    %c0_21 = arith.constant 0 : index
    %17 = vector.load %arg1[%c3_19, %c0_20, %c0_21] : memref<4x256x32xbf16, #tpu.memory_space<vmem>>, vector<1x256x32xbf16>
    %18 = vector.shape_cast %17 : vector<1x256x32xbf16> to vector<256x32xbf16>
    %cst_22 = arith.constant dense<0.000000e+00> : vector<32x32xf32>
    %19 = tpu.matmul %16, %18, %cst_22 {dimension_numbers = #tpu.dot_dimension_numbers<[1], [0], [0], [1], [0, 0, 1, 1], [], []>} : vector<32x256xbf16>, vector<256x32xbf16>, vector<32x32xf32> -> vector<32x32xf32>
    %20 = arith.addf %4, %9 : vector<32x32xf32>
    %21 = arith.addf %20, %14 : vector<32x32xf32>
    %22 = arith.addf %21, %19 : vector<32x32xf32>
    %cst_23 = arith.constant dense<0.000000e+00> : vector<32xf32>
    %23 = vector.multi_reduction <add>, %22, %cst_23 [0] : vector<32x32xf32> to vector<32xf32>
    %24 = vector.shape_cast %23 : vector<32xf32> to vector<1x32xf32>
    %cst_24 = arith.constant 7.812500e-03 : f32
    %25 = vector.broadcast %cst_24 : f32 to vector<1x32xf32>
    %26 = arith.mulf %24, %25 : vector<1x32xf32>
    %cst_25 = arith.constant 0.000000e+00 : f32
    %27 = vector.broadcast %cst_25 : f32 to vector<1x32xf32>
    %28 = vector.broadcast %26 : vector<1x32xf32> to vector<32x32xf32>
    %29 = arith.subf %4, %28 : vector<32x32xf32>
    %30 = arith.mulf %29, %29 : vector<32x32xf32>
    %cst_26 = arith.constant dense<0.000000e+00> : vector<32xf32>
    %31 = vector.multi_reduction <add>, %30, %cst_26 [0] : vector<32x32xf32> to vector<32xf32>
    %32 = vector.shape_cast %31 : vector<32xf32> to vector<1x32xf32>
    %33 = arith.addf %27, %32 : vector<1x32xf32>
    %34 = vector.broadcast %26 : vector<1x32xf32> to vector<32x32xf32>
    %35 = arith.subf %9, %34 : vector<32x32xf32>
    %36 = arith.mulf %35, %35 : vector<32x32xf32>
    %cst_27 = arith.constant dense<0.000000e+00> : vector<32xf32>
    %37 = vector.multi_reduction <add>, %36, %cst_27 [0] : vector<32x32xf32> to vector<32xf32>
    %38 = vector.shape_cast %37 : vector<32xf32> to vector<1x32xf32>
    %39 = arith.addf %33, %38 : vector<1x32xf32>
    %40 = vector.broadcast %26 : vector<1x32xf32> to vector<32x32xf32>
    %41 = arith.subf %14, %40 : vector<32x32xf32>
    %42 = arith.mulf %41, %41 : vector<32x32xf32>
    %cst_28 = arith.constant dense<0.000000e+00> : vector<32xf32>
    %43 = vector.multi_reduction <add>, %42, %cst_28 [0] : vector<32x32xf32> to vector<32xf32>
    %44 = vector.shape_cast %43 : vector<32xf32> to vector<1x32xf32>
    %45 = arith.addf %39, %44 : vector<1x32xf32>
    %46 = vector.broadcast %26 : vector<1x32xf32> to vector<32x32xf32>
    %47 = arith.subf %19, %46 : vector<32x32xf32>
    %48 = arith.mulf %47, %47 : vector<32x32xf32>
    %cst_29 = arith.constant dense<0.000000e+00> : vector<32xf32>
    %49 = vector.multi_reduction <add>, %48, %cst_29 [0] : vector<32x32xf32> to vector<32xf32>
    %50 = vector.shape_cast %49 : vector<32xf32> to vector<1x32xf32>
    %51 = arith.addf %45, %50 : vector<1x32xf32>
    %cst_30 = arith.constant 7.812500e-03 : f32
    %52 = vector.broadcast %cst_30 : f32 to vector<1x32xf32>
    %53 = arith.mulf %51, %52 : vector<1x32xf32>
    %cst_31 = arith.constant 9.99999974E-6 : f32
    %54 = vector.broadcast %cst_31 : f32 to vector<1x32xf32>
    %55 = arith.addf %53, %54 : vector<1x32xf32>
    %56 = math.rsqrt %55 : vector<1x32xf32>
    %57 = vector.broadcast %26 : vector<1x32xf32> to vector<32x32xf32>
    %58 = arith.subf %4, %57 : vector<32x32xf32>
    %59 = vector.broadcast %56 : vector<1x32xf32> to vector<32x32xf32>
    %60 = arith.mulf %58, %59 : vector<32x32xf32>
    %cst_32 = arith.constant 0.000000e+00 : f32
    %61 = vector.broadcast %cst_32 : f32 to vector<32x32xf32>
    %62 = arith.maximumf %60, %61 : vector<32x32xf32>
    %63 = arith.truncf %62 : vector<32x32xf32> to vector<32x32xbf16>
    %c0_33 = arith.constant 0 : index
    %c0_34 = arith.constant 0 : index
    %c0_35 = arith.constant 0 : index
    %64 = vector.load %arg2[%c0_33, %c0_34, %c0_35] : memref<4x32x32xbf16, #tpu.memory_space<vmem>>, vector<1x32x32xbf16>
    %65 = vector.shape_cast %64 : vector<1x32x32xbf16> to vector<32x32xbf16>
    %66 = vector.shape_cast %63 : vector<32x32xbf16> to vector<1x32x32xbf16>
    tpu.vector_store %arg2[%c0_33, %c0_34, %c0_35], %66 {strides = array<i32>} : memref<4x32x32xbf16, #tpu.memory_space<vmem>>, vector<1x32x32xbf16>,
    %67 = vector.broadcast %26 : vector<1x32xf32> to vector<32x32xf32>
    %68 = arith.subf %9, %67 : vector<32x32xf32>
    %69 = vector.broadcast %56 : vector<1x32xf32> to vector<32x32xf32>
    %70 = arith.mulf %68, %69 : vector<32x32xf32>
    %cst_36 = arith.constant 0.000000e+00 : f32
    %71 = vector.broadcast %cst_36 : f32 to vector<32x32xf32>
    %72 = arith.maximumf %70, %71 : vector<32x32xf32>
    %73 = arith.truncf %72 : vector<32x32xf32> to vector<32x32xbf16>
    %c1_37 = arith.constant 1 : index
    %c0_38 = arith.constant 0 : index
    %c0_39 = arith.constant 0 : index
    %74 = vector.load %arg2[%c1_37, %c0_38, %c0_39] : memref<4x32x32xbf16, #tpu.memory_space<vmem>>, vector<1x32x32xbf16>
    %75 = vector.shape_cast %74 : vector<1x32x32xbf16> to vector<32x32xbf16>
    %76 = vector.shape_cast %73 : vector<32x32xbf16> to vector<1x32x32xbf16>
    tpu.vector_store %arg2[%c1_37, %c0_38, %c0_39], %76 {strides = array<i32>} : memref<4x32x32xbf16, #tpu.memory_space<vmem>>, vector<1x32x32xbf16>,
    %77 = vector.broadcast %26 : vector<1x32xf32> to vector<32x32xf32>
    %78 = arith.subf %14, %77 : vector<32x32xf32>
    %79 = vector.broadcast %56 : vector<1x32xf32> to vector<32x32xf32>
    %80 = arith.mulf %78, %79 : vector<32x32xf32>
    %cst_40 = arith.constant 0.000000e+00 : f32
    %81 = vector.broadcast %cst_40 : f32 to vector<32x32xf32>
    %82 = arith.maximumf %80, %81 : vector<32x32xf32>
    %83 = arith.truncf %82 : vector<32x32xf32> to vector<32x32xbf16>
    %c2_41 = arith.constant 2 : index
    %c0_42 = arith.constant 0 : index
    %c0_43 = arith.constant 0 : index
    %84 = vector.load %arg2[%c2_41, %c0_42, %c0_43] : memref<4x32x32xbf16, #tpu.memory_space<vmem>>, vector<1x32x32xbf16>
    %85 = vector.shape_cast %84 : vector<1x32x32xbf16> to vector<32x32xbf16>
    %86 = vector.shape_cast %83 : vector<32x32xbf16> to vector<1x32x32xbf16>
    tpu.vector_store %arg2[%c2_41, %c0_42, %c0_43], %86 {strides = array<i32>} : memref<4x32x32xbf16, #tpu.memory_space<vmem>>, vector<1x32x32xbf16>,
    %87 = vector.broadcast %26 : vector<1x32xf32> to vector<32x32xf32>
    %88 = arith.subf %19, %87 : vector<32x32xf32>
    %89 = vector.broadcast %56 : vector<1x32xf32> to vector<32x32xf32>
    %90 = arith.mulf %88, %89 : vector<32x32xf32>
    %cst_44 = arith.constant 0.000000e+00 : f32
    %91 = vector.broadcast %cst_44 : f32 to vector<32x32xf32>
    %92 = arith.maximumf %90, %91 : vector<32x32xf32>
    %93 = arith.truncf %92 : vector<32x32xf32> to vector<32x32xbf16>
    %c3_45 = arith.constant 3 : index
    %c0_46 = arith.constant 0 : index
    %c0_47 = arith.constant 0 : index
    %94 = vector.load %arg2[%c3_45, %c0_46, %c0_47] : memref<4x32x32xbf16, #tpu.memory_space<vmem>>, vector<1x32x32xbf16>
    %95 = vector.shape_cast %94 : vector<1x32x32xbf16> to vector<32x32xbf16>
    %96 = vector.shape_cast %93 : vector<32x32xbf16> to vector<1x32x32xbf16>
    tpu.vector_store %arg2[%c3_45, %c0_46, %c0_47], %96 {strides = array<i32>} : memref<4x32x32xbf16, #tpu.memory_space<vmem>>, vector<1x32x32xbf16>,
    return
  }
}

module attributes {stable_mosaic.version = 11 : i64} {
  func.func @_subpix_kernel(%arg0: memref<4x128x128xbf16, #tpu.memory_space<vmem>>, %arg1: memref<4x128x16xbf16, #tpu.memory_space<vmem>>, %arg2: memref<4x128x16xbf16, #tpu.memory_space<vmem>>) attributes {dimension_semantics = [], scalar_prefetch = 0 : i64, scratch_operands = 0 : i64, tpu.core_type = #tpu.core_type<tc>} {
    %c0 = arith.constant 0 : index
    %c0_0 = arith.constant 0 : index
    %c0_1 = arith.constant 0 : index
    %0 = vector.load %arg0[%c0, %c0_0, %c0_1] : memref<4x128x128xbf16, #tpu.memory_space<vmem>>, vector<1x128x128xbf16>
    %1 = vector.shape_cast %0 : vector<1x128x128xbf16> to vector<128x128xbf16>
    %c0_2 = arith.constant 0 : index
    %c0_3 = arith.constant 0 : index
    %c0_4 = arith.constant 0 : index
    %2 = vector.load %arg1[%c0_2, %c0_3, %c0_4] : memref<4x128x16xbf16, #tpu.memory_space<vmem>>, vector<1x128x16xbf16>
    %3 = vector.shape_cast %2 : vector<1x128x16xbf16> to vector<128x16xbf16>
    %cst = arith.constant dense<0.000000e+00> : vector<128x16xf32>
    %4 = tpu.matmul %1, %3, %cst {dimension_numbers = #tpu.dot_dimension_numbers<[1], [0], [0], [1], [0, 0, 1, 1], [], []>} : vector<128x128xbf16>, vector<128x16xbf16>, vector<128x16xf32> -> vector<128x16xf32>
    %c1 = arith.constant 1 : index
    %c0_5 = arith.constant 0 : index
    %c0_6 = arith.constant 0 : index
    %5 = vector.load %arg0[%c1, %c0_5, %c0_6] : memref<4x128x128xbf16, #tpu.memory_space<vmem>>, vector<1x128x128xbf16>
    %6 = vector.shape_cast %5 : vector<1x128x128xbf16> to vector<128x128xbf16>
    %c1_7 = arith.constant 1 : index
    %c0_8 = arith.constant 0 : index
    %c0_9 = arith.constant 0 : index
    %7 = vector.load %arg1[%c1_7, %c0_8, %c0_9] : memref<4x128x16xbf16, #tpu.memory_space<vmem>>, vector<1x128x16xbf16>
    %8 = vector.shape_cast %7 : vector<1x128x16xbf16> to vector<128x16xbf16>
    %cst_10 = arith.constant dense<0.000000e+00> : vector<128x16xf32>
    %9 = tpu.matmul %6, %8, %cst_10 {dimension_numbers = #tpu.dot_dimension_numbers<[1], [0], [0], [1], [0, 0, 1, 1], [], []>} : vector<128x128xbf16>, vector<128x16xbf16>, vector<128x16xf32> -> vector<128x16xf32>
    %c2 = arith.constant 2 : index
    %c0_11 = arith.constant 0 : index
    %c0_12 = arith.constant 0 : index
    %10 = vector.load %arg0[%c2, %c0_11, %c0_12] : memref<4x128x128xbf16, #tpu.memory_space<vmem>>, vector<1x128x128xbf16>
    %11 = vector.shape_cast %10 : vector<1x128x128xbf16> to vector<128x128xbf16>
    %c2_13 = arith.constant 2 : index
    %c0_14 = arith.constant 0 : index
    %c0_15 = arith.constant 0 : index
    %12 = vector.load %arg1[%c2_13, %c0_14, %c0_15] : memref<4x128x16xbf16, #tpu.memory_space<vmem>>, vector<1x128x16xbf16>
    %13 = vector.shape_cast %12 : vector<1x128x16xbf16> to vector<128x16xbf16>
    %cst_16 = arith.constant dense<0.000000e+00> : vector<128x16xf32>
    %14 = tpu.matmul %11, %13, %cst_16 {dimension_numbers = #tpu.dot_dimension_numbers<[1], [0], [0], [1], [0, 0, 1, 1], [], []>} : vector<128x128xbf16>, vector<128x16xbf16>, vector<128x16xf32> -> vector<128x16xf32>
    %c3 = arith.constant 3 : index
    %c0_17 = arith.constant 0 : index
    %c0_18 = arith.constant 0 : index
    %15 = vector.load %arg0[%c3, %c0_17, %c0_18] : memref<4x128x128xbf16, #tpu.memory_space<vmem>>, vector<1x128x128xbf16>
    %16 = vector.shape_cast %15 : vector<1x128x128xbf16> to vector<128x128xbf16>
    %c3_19 = arith.constant 3 : index
    %c0_20 = arith.constant 0 : index
    %c0_21 = arith.constant 0 : index
    %17 = vector.load %arg1[%c3_19, %c0_20, %c0_21] : memref<4x128x16xbf16, #tpu.memory_space<vmem>>, vector<1x128x16xbf16>
    %18 = vector.shape_cast %17 : vector<1x128x16xbf16> to vector<128x16xbf16>
    %cst_22 = arith.constant dense<0.000000e+00> : vector<128x16xf32>
    %19 = tpu.matmul %16, %18, %cst_22 {dimension_numbers = #tpu.dot_dimension_numbers<[1], [0], [0], [1], [0, 0, 1, 1], [], []>} : vector<128x128xbf16>, vector<128x16xbf16>, vector<128x16xf32> -> vector<128x16xf32>
    %20 = arith.addf %4, %9 : vector<128x16xf32>
    %21 = arith.addf %20, %14 : vector<128x16xf32>
    %22 = arith.addf %21, %19 : vector<128x16xf32>
    %cst_23 = arith.constant dense<0.000000e+00> : vector<16xf32>
    %23 = vector.multi_reduction <add>, %22, %cst_23 [0] : vector<128x16xf32> to vector<16xf32>
    %24 = vector.shape_cast %23 : vector<16xf32> to vector<1x16xf32>
    %cst_24 = arith.constant 0.001953125 : f32
    %25 = vector.broadcast %cst_24 : f32 to vector<1x16xf32>
    %26 = arith.mulf %24, %25 : vector<1x16xf32>
    %cst_25 = arith.constant 0.000000e+00 : f32
    %27 = vector.broadcast %cst_25 : f32 to vector<1x16xf32>
    %28 = vector.broadcast %26 : vector<1x16xf32> to vector<128x16xf32>
    %29 = arith.subf %4, %28 : vector<128x16xf32>
    %30 = arith.mulf %29, %29 : vector<128x16xf32>
    %cst_26 = arith.constant dense<0.000000e+00> : vector<16xf32>
    %31 = vector.multi_reduction <add>, %30, %cst_26 [0] : vector<128x16xf32> to vector<16xf32>
    %32 = vector.shape_cast %31 : vector<16xf32> to vector<1x16xf32>
    %33 = arith.addf %27, %32 : vector<1x16xf32>
    %34 = vector.broadcast %26 : vector<1x16xf32> to vector<128x16xf32>
    %35 = arith.subf %9, %34 : vector<128x16xf32>
    %36 = arith.mulf %35, %35 : vector<128x16xf32>
    %cst_27 = arith.constant dense<0.000000e+00> : vector<16xf32>
    %37 = vector.multi_reduction <add>, %36, %cst_27 [0] : vector<128x16xf32> to vector<16xf32>
    %38 = vector.shape_cast %37 : vector<16xf32> to vector<1x16xf32>
    %39 = arith.addf %33, %38 : vector<1x16xf32>
    %40 = vector.broadcast %26 : vector<1x16xf32> to vector<128x16xf32>
    %41 = arith.subf %14, %40 : vector<128x16xf32>
    %42 = arith.mulf %41, %41 : vector<128x16xf32>
    %cst_28 = arith.constant dense<0.000000e+00> : vector<16xf32>
    %43 = vector.multi_reduction <add>, %42, %cst_28 [0] : vector<128x16xf32> to vector<16xf32>
    %44 = vector.shape_cast %43 : vector<16xf32> to vector<1x16xf32>
    %45 = arith.addf %39, %44 : vector<1x16xf32>
    %46 = vector.broadcast %26 : vector<1x16xf32> to vector<128x16xf32>
    %47 = arith.subf %19, %46 : vector<128x16xf32>
    %48 = arith.mulf %47, %47 : vector<128x16xf32>
    %cst_29 = arith.constant dense<0.000000e+00> : vector<16xf32>
    %49 = vector.multi_reduction <add>, %48, %cst_29 [0] : vector<128x16xf32> to vector<16xf32>
    %50 = vector.shape_cast %49 : vector<16xf32> to vector<1x16xf32>
    %51 = arith.addf %45, %50 : vector<1x16xf32>
    %cst_30 = arith.constant 0.001953125 : f32
    %52 = vector.broadcast %cst_30 : f32 to vector<1x16xf32>
    %53 = arith.mulf %51, %52 : vector<1x16xf32>
    %cst_31 = arith.constant 9.99999974E-6 : f32
    %54 = vector.broadcast %cst_31 : f32 to vector<1x16xf32>
    %55 = arith.addf %53, %54 : vector<1x16xf32>
    %56 = math.rsqrt %55 : vector<1x16xf32>
    %57 = vector.broadcast %26 : vector<1x16xf32> to vector<128x16xf32>
    %58 = arith.subf %4, %57 : vector<128x16xf32>
    %59 = vector.broadcast %56 : vector<1x16xf32> to vector<128x16xf32>
    %60 = arith.mulf %58, %59 : vector<128x16xf32>
    %cst_32 = arith.constant 0.000000e+00 : f32
    %61 = vector.broadcast %cst_32 : f32 to vector<128x16xf32>
    %62 = arith.maximumf %60, %61 : vector<128x16xf32>
    %63 = arith.truncf %62 : vector<128x16xf32> to vector<128x16xbf16>
    %c0_33 = arith.constant 0 : index
    %c0_34 = arith.constant 0 : index
    %c0_35 = arith.constant 0 : index
    %64 = vector.load %arg2[%c0_33, %c0_34, %c0_35] : memref<4x128x16xbf16, #tpu.memory_space<vmem>>, vector<1x128x16xbf16>
    %65 = vector.shape_cast %64 : vector<1x128x16xbf16> to vector<128x16xbf16>
    %66 = vector.shape_cast %63 : vector<128x16xbf16> to vector<1x128x16xbf16>
    tpu.vector_store %arg2[%c0_33, %c0_34, %c0_35], %66 {strides = array<i32>} : memref<4x128x16xbf16, #tpu.memory_space<vmem>>, vector<1x128x16xbf16>,
    %67 = vector.broadcast %26 : vector<1x16xf32> to vector<128x16xf32>
    %68 = arith.subf %9, %67 : vector<128x16xf32>
    %69 = vector.broadcast %56 : vector<1x16xf32> to vector<128x16xf32>
    %70 = arith.mulf %68, %69 : vector<128x16xf32>
    %cst_36 = arith.constant 0.000000e+00 : f32
    %71 = vector.broadcast %cst_36 : f32 to vector<128x16xf32>
    %72 = arith.maximumf %70, %71 : vector<128x16xf32>
    %73 = arith.truncf %72 : vector<128x16xf32> to vector<128x16xbf16>
    %c1_37 = arith.constant 1 : index
    %c0_38 = arith.constant 0 : index
    %c0_39 = arith.constant 0 : index
    %74 = vector.load %arg2[%c1_37, %c0_38, %c0_39] : memref<4x128x16xbf16, #tpu.memory_space<vmem>>, vector<1x128x16xbf16>
    %75 = vector.shape_cast %74 : vector<1x128x16xbf16> to vector<128x16xbf16>
    %76 = vector.shape_cast %73 : vector<128x16xbf16> to vector<1x128x16xbf16>
    tpu.vector_store %arg2[%c1_37, %c0_38, %c0_39], %76 {strides = array<i32>} : memref<4x128x16xbf16, #tpu.memory_space<vmem>>, vector<1x128x16xbf16>,
    %77 = vector.broadcast %26 : vector<1x16xf32> to vector<128x16xf32>
    %78 = arith.subf %14, %77 : vector<128x16xf32>
    %79 = vector.broadcast %56 : vector<1x16xf32> to vector<128x16xf32>
    %80 = arith.mulf %78, %79 : vector<128x16xf32>
    %cst_40 = arith.constant 0.000000e+00 : f32
    %81 = vector.broadcast %cst_40 : f32 to vector<128x16xf32>
    %82 = arith.maximumf %80, %81 : vector<128x16xf32>
    %83 = arith.truncf %82 : vector<128x16xf32> to vector<128x16xbf16>
    %c2_41 = arith.constant 2 : index
    %c0_42 = arith.constant 0 : index
    %c0_43 = arith.constant 0 : index
    %84 = vector.load %arg2[%c2_41, %c0_42, %c0_43] : memref<4x128x16xbf16, #tpu.memory_space<vmem>>, vector<1x128x16xbf16>
    %85 = vector.shape_cast %84 : vector<1x128x16xbf16> to vector<128x16xbf16>
    %86 = vector.shape_cast %83 : vector<128x16xbf16> to vector<1x128x16xbf16>
    tpu.vector_store %arg2[%c2_41, %c0_42, %c0_43], %86 {strides = array<i32>} : memref<4x128x16xbf16, #tpu.memory_space<vmem>>, vector<1x128x16xbf16>,
    %87 = vector.broadcast %26 : vector<1x16xf32> to vector<128x16xf32>
    %88 = arith.subf %19, %87 : vector<128x16xf32>
    %89 = vector.broadcast %56 : vector<1x16xf32> to vector<128x16xf32>
    %90 = arith.mulf %88, %89 : vector<128x16xf32>
    %cst_44 = arith.constant 0.000000e+00 : f32
    %91 = vector.broadcast %cst_44 : f32 to vector<128x16xf32>
    %92 = arith.maximumf %90, %91 : vector<128x16xf32>
    %93 = arith.truncf %92 : vector<128x16xf32> to vector<128x16xbf16>
    %c3_45 = arith.constant 3 : index
    %c0_46 = arith.constant 0 : index
    %c0_47 = arith.constant 0 : index
    %94 = vector.load %arg2[%c3_45, %c0_46, %c0_47] : memref<4x128x16xbf16, #tpu.memory_space<vmem>>, vector<1x128x16xbf16>
    %95 = vector.shape_cast %94 : vector<1x128x16xbf16> to vector<128x16xbf16>
    %96 = vector.shape_cast %93 : vector<128x16xbf16> to vector<1x128x16xbf16>
    tpu.vector_store %arg2[%c3_45, %c0_46, %c0_47], %96 {strides = array<i32>} : memref<4x128x16xbf16, #tpu.memory_space<vmem>>, vector<1x128x16xbf16>,
    return
  }
}

module attributes {stable_mosaic.version = 11 : i64} {
  func.func @_subpix_kernel(%arg0: memref<4x512x64xbf16, #tpu.memory_space<vmem>>, %arg1: memref<4x64x128xbf16, #tpu.memory_space<vmem>>, %arg2: memref<4x512x128xbf16, #tpu.memory_space<vmem>>) attributes {dimension_semantics = [], scalar_prefetch = 0 : i64, scratch_operands = 0 : i64, tpu.core_type = #tpu.core_type<tc>} {
    %c0 = arith.constant 0 : index
    %c0_0 = arith.constant 0 : index
    %c0_1 = arith.constant 0 : index
    %0 = vector.load %arg0[%c0, %c0_0, %c0_1] : memref<4x512x64xbf16, #tpu.memory_space<vmem>>, vector<1x512x64xbf16>
    %1 = vector.shape_cast %0 : vector<1x512x64xbf16> to vector<512x64xbf16>
    %c0_2 = arith.constant 0 : index
    %c0_3 = arith.constant 0 : index
    %c0_4 = arith.constant 0 : index
    %2 = vector.load %arg1[%c0_2, %c0_3, %c0_4] : memref<4x64x128xbf16, #tpu.memory_space<vmem>>, vector<1x64x128xbf16>
    %3 = vector.shape_cast %2 : vector<1x64x128xbf16> to vector<64x128xbf16>
    %cst = arith.constant dense<0.000000e+00> : vector<512x128xf32>
    %4 = tpu.matmul %1, %3, %cst {dimension_numbers = #tpu.dot_dimension_numbers<[1], [0], [0], [1], [0, 0, 1, 1], [], []>} : vector<512x64xbf16>, vector<64x128xbf16>, vector<512x128xf32> -> vector<512x128xf32>
    %5 = math.tanh %4 : vector<512x128xf32>
    %6 = arith.truncf %5 : vector<512x128xf32> to vector<512x128xbf16>
    %c0_5 = arith.constant 0 : index
    %c0_6 = arith.constant 0 : index
    %c0_7 = arith.constant 0 : index
    %7 = vector.load %arg2[%c0_5, %c0_6, %c0_7] : memref<4x512x128xbf16, #tpu.memory_space<vmem>>, vector<1x512x128xbf16>
    %8 = vector.shape_cast %7 : vector<1x512x128xbf16> to vector<512x128xbf16>
    %9 = vector.shape_cast %6 : vector<512x128xbf16> to vector<1x512x128xbf16>
    tpu.vector_store %arg2[%c0_5, %c0_6, %c0_7], %9 {strides = array<i32>} : memref<4x512x128xbf16, #tpu.memory_space<vmem>>, vector<1x512x128xbf16>,
    %c1 = arith.constant 1 : index
    %c0_8 = arith.constant 0 : index
    %c0_9 = arith.constant 0 : index
    %10 = vector.load %arg0[%c1, %c0_8, %c0_9] : memref<4x512x64xbf16, #tpu.memory_space<vmem>>, vector<1x512x64xbf16>
    %11 = vector.shape_cast %10 : vector<1x512x64xbf16> to vector<512x64xbf16>
    %c1_10 = arith.constant 1 : index
    %c0_11 = arith.constant 0 : index
    %c0_12 = arith.constant 0 : index
    %12 = vector.load %arg1[%c1_10, %c0_11, %c0_12] : memref<4x64x128xbf16, #tpu.memory_space<vmem>>, vector<1x64x128xbf16>
    %13 = vector.shape_cast %12 : vector<1x64x128xbf16> to vector<64x128xbf16>
    %cst_13 = arith.constant dense<0.000000e+00> : vector<512x128xf32>
    %14 = tpu.matmul %11, %13, %cst_13 {dimension_numbers = #tpu.dot_dimension_numbers<[1], [0], [0], [1], [0, 0, 1, 1], [], []>} : vector<512x64xbf16>, vector<64x128xbf16>, vector<512x128xf32> -> vector<512x128xf32>
    %15 = math.tanh %14 : vector<512x128xf32>
    %16 = arith.truncf %15 : vector<512x128xf32> to vector<512x128xbf16>
    %c1_14 = arith.constant 1 : index
    %c0_15 = arith.constant 0 : index
    %c0_16 = arith.constant 0 : index
    %17 = vector.load %arg2[%c1_14, %c0_15, %c0_16] : memref<4x512x128xbf16, #tpu.memory_space<vmem>>, vector<1x512x128xbf16>
    %18 = vector.shape_cast %17 : vector<1x512x128xbf16> to vector<512x128xbf16>
    %19 = vector.shape_cast %16 : vector<512x128xbf16> to vector<1x512x128xbf16>
    tpu.vector_store %arg2[%c1_14, %c0_15, %c0_16], %19 {strides = array<i32>} : memref<4x512x128xbf16, #tpu.memory_space<vmem>>, vector<1x512x128xbf16>,
    %c2 = arith.constant 2 : index
    %c0_17 = arith.constant 0 : index
    %c0_18 = arith.constant 0 : index
    %20 = vector.load %arg0[%c2, %c0_17, %c0_18] : memref<4x512x64xbf16, #tpu.memory_space<vmem>>, vector<1x512x64xbf16>
    %21 = vector.shape_cast %20 : vector<1x512x64xbf16> to vector<512x64xbf16>
    %c2_19 = arith.constant 2 : index
    %c0_20 = arith.constant 0 : index
    %c0_21 = arith.constant 0 : index
    %22 = vector.load %arg1[%c2_19, %c0_20, %c0_21] : memref<4x64x128xbf16, #tpu.memory_space<vmem>>, vector<1x64x128xbf16>
    %23 = vector.shape_cast %22 : vector<1x64x128xbf16> to vector<64x128xbf16>
    %cst_22 = arith.constant dense<0.000000e+00> : vector<512x128xf32>
    %24 = tpu.matmul %21, %23, %cst_22 {dimension_numbers = #tpu.dot_dimension_numbers<[1], [0], [0], [1], [0, 0, 1, 1], [], []>} : vector<512x64xbf16>, vector<64x128xbf16>, vector<512x128xf32> -> vector<512x128xf32>
    %25 = math.tanh %24 : vector<512x128xf32>
    %26 = arith.truncf %25 : vector<512x128xf32> to vector<512x128xbf16>
    %c2_23 = arith.constant 2 : index
    %c0_24 = arith.constant 0 : index
    %c0_25 = arith.constant 0 : index
    %27 = vector.load %arg2[%c2_23, %c0_24, %c0_25] : memref<4x512x128xbf16, #tpu.memory_space<vmem>>, vector<1x512x128xbf16>
    %28 = vector.shape_cast %27 : vector<1x512x128xbf16> to vector<512x128xbf16>
    %29 = vector.shape_cast %26 : vector<512x128xbf16> to vector<1x512x128xbf16>
    tpu.vector_store %arg2[%c2_23, %c0_24, %c0_25], %29 {strides = array<i32>} : memref<4x512x128xbf16, #tpu.memory_space<vmem>>, vector<1x512x128xbf16>,
    %c3 = arith.constant 3 : index
    %c0_26 = arith.constant 0 : index
    %c0_27 = arith.constant 0 : index
    %30 = vector.load %arg0[%c3, %c0_26, %c0_27] : memref<4x512x64xbf16, #tpu.memory_space<vmem>>, vector<1x512x64xbf16>
    %31 = vector.shape_cast %30 : vector<1x512x64xbf16> to vector<512x64xbf16>
    %c3_28 = arith.constant 3 : index
    %c0_29 = arith.constant 0 : index
    %c0_30 = arith.constant 0 : index
    %32 = vector.load %arg1[%c3_28, %c0_29, %c0_30] : memref<4x64x128xbf16, #tpu.memory_space<vmem>>, vector<1x64x128xbf16>
    %33 = vector.shape_cast %32 : vector<1x64x128xbf16> to vector<64x128xbf16>
    %cst_31 = arith.constant dense<0.000000e+00> : vector<512x128xf32>
    %34 = tpu.matmul %31, %33, %cst_31 {dimension_numbers = #tpu.dot_dimension_numbers<[1], [0], [0], [1], [0, 0, 1, 1], [], []>} : vector<512x64xbf16>, vector<64x128xbf16>, vector<512x128xf32> -> vector<512x128xf32>
    %35 = math.tanh %34 : vector<512x128xf32>
    %36 = arith.truncf %35 : vector<512x128xf32> to vector<512x128xbf16>
    %c3_32 = arith.constant 3 : index
    %c0_33 = arith.constant 0 : index
    %c0_34 = arith.constant 0 : index
    %37 = vector.load %arg2[%c3_32, %c0_33, %c0_34] : memref<4x512x128xbf16, #tpu.memory_space<vmem>>, vector<1x512x128xbf16>
    %38 = vector.shape_cast %37 : vector<1x512x128xbf16> to vector<512x128xbf16>
    %39 = vector.shape_cast %36 : vector<512x128xbf16> to vector<1x512x128xbf16>
    tpu.vector_store %arg2[%c3_32, %c0_33, %c0_34], %39 {strides = array<i32>} : memref<4x512x128xbf16, #tpu.memory_space<vmem>>, vector<1x512x128xbf16>,
    return
  }
}

</mosaic_0001>

<bundles_post_ra>
// kernel: presgan_forward.4
= control target key start
LH: loop header
LB: loop body
LE: loop exit
PB: predicated region body
PF: predicated region fallthrough
CT: control target
= control target key end

     0   :  { %7 = vsyncpa [#allocation3], 0  ;;  %s796_s12 = smov [#allocation2]   ;;  %s797_s14 = smov 512   ;;  %s1103_s0 = inlined_call_operand.vmem [shape: bf16[2,32], index: 0, kind: input, shape index: {}]   ;;  %s1104_s1 = inlined_call_operand.hbm [shape: bf16[32,1024], index: 1, kind: input, shape index: {}]   ;;  %s1105_s2 = inlined_call_operand.vmem [shape: bf16[16,2,64], index: 2, kind: output, shape index: {}]  }
   0x1   :  { %s14_s11 = sshll.u32 %s1104_s1, 4  ;;  %s16_s13 = sshll.u32 %s796_s12, 4  ;;  %s15_s11 = int_to_ptr.hbm [resolvable:$true] %s14_s11  ;;  %s17_s13 = int_to_ptr.vmem [resolvable:$true] %s16_s13 }
   0x2   :  { %s798_s15 = smov 32  }
   0x3   :  { %22 = dma.hbm_to_vmem [thread:$0]  %s15_s11, 2048, %s17_s13, [#allocation3], %s797_s14, %s797_s14, %s798_s15  }
   0x4   :  { %794 = dma.done.wait [#allocation3], 2048  }
   0x5   :  { %795 = vsyncadd [#allocation3], 4294965248  ;;  %vm125_vm0 = vcmask 261120   ;;  %v695_v0 = vld [vmem:[#allocation2 + $0x40] sm:$0xf]  ;;  %vm280_vm1 = vcmask 517120  }
   0x6   :  { %v760_v1 = vld [vmem:[#allocation2 + $0x5c] sm:$0xf0]  ;;  %v756_v2 = vld [vmem:[#allocation2 + $0x44] sm:$0xf]  ;;  %v703_v5 = vld [vmem:[#allocation2 + $0x48] sm:$0xf] }
   0x7   :  { %v696_v3 = vor.u32 %v760_v1, %v695_v0  ;;  %v697_v4 = vld [vmem:[#allocation2 + $0x60] sm:$0xf0]  ;;  %v761_v6 = vld [vmem:[#allocation2 + $0x64] sm:$0xf0]  ;;  %v757_v9 = vld [vmem:[#allocation2 + $0x4c] sm:$0xf] }
   0x8   :  { %v700_v7 = vor.u32 %v756_v2, %v697_v4  ;;  %v704_v8 = vor.u32 %v761_v6, %v703_v5  ;;  %v705_v10 = vld [vmem:[#allocation2 + $0x68] sm:$0xf0]  ;;  %v663_v11 = vld [vmem:[#allocation2] sm:$0xf]  ;;  %v748_v14 = vld [vmem:[#allocation2 + $0x4] sm:$0xf] }
   0x9   :  { %135 = vmatpush.bf16.msra.mxu0 %v696_v3  ;;  %v708_v12 = vor.u32 %v757_v9, %v705_v10  ;;  %v752_v13 = vld [vmem:[#allocation2 + $0x1c] sm:$0xf0]  ;;  %v665_v15 = vld [vmem:[#allocation2 + $0x20] sm:$0xf0]  ;;  %v671_v18 = vld [vmem:[#allocation2 + $0x8] sm:$0xf] }
   0xa   :  { %148 = vmatpush.bf16.msra.mxu1 %v700_v7  ;;  %161 = vmatpush.bf16.msra.mxu2 %v704_v8  ;;  %v664_v16 = vor.u32 %v752_v13, %v663_v11  ;;  %v668_v17 = vor.u32 %v748_v14, %v665_v15  ;;  %v753_v19 = vld [vmem:[#allocation2 + $0x24] sm:$0xf0]  ;;  %v749_v20 = vld [vmem:[#allocation2 + $0xc] sm:$0xf]  ;;  %v28_v23 = vld [vmem:[%s1103_s0] sm:$0x1] }
   0xb   :  { %174 = vmatpush.bf16.msra.mxu3 %v708_v12  ;;  %v672_v21 = vor.u32 %v753_v19, %v671_v18  ;;  %v673_v22 = vld [vmem:[#allocation2 + $0x28] sm:$0xf0]  ;;  %v719_v24 = vld [vmem:[#allocation2 + $0x58] sm:$0xf]  ;;  %v759_v27 = vld [vmem:[#allocation2 + $0x5c] sm:$0xf] }
   0xc   :  { %v676_v25 = vor.u32 %v749_v20, %v673_v22  ;;  %v763_v26 = vld [vmem:[#allocation2 + $0x74] sm:$0xf0]  ;;  %v721_v28 = vld [vmem:[#allocation2 + $0x78] sm:$0xf0]  ;;  %v711_v35 = vld [vmem:[#allocation2 + $0x50] sm:$0xf] }
   0xd   :  { %136 = vmatpush.bf16.msra.mxu0 %v664_v16  ;;  %v720_v29 = vor.u32 %v763_v26, %v719_v24  ;;  %v724_v30 = vor.u32 %v759_v27, %v721_v28  ;;  %v687_v31 = vld [vmem:[#allocation2 + $0x18] sm:$0xf]  ;;  %v751_v33 = vld [vmem:[#allocation2 + $0x1c] sm:$0xf]  ;;  %v762_v36 = vld [vmem:[#allocation2 + $0x6c] sm:$0xf0] }
   0xe   :  { %v755_v32 = vld [vmem:[#allocation2 + $0x34] sm:$0xf0]  ;;  %149 = vmatpush.bf16.msra.mxu1 %v668_v17  ;;  %162 = vmatpush.bf16.msra.mxu2 %v672_v21  ;;  %v689_v34 = vld [vmem:[#allocation2 + $0x38] sm:$0xf0]  ;;  %v712_v38 = vor.u32 %v762_v36, %v711_v35  ;;  %v679_v39 = vld [vmem:[#allocation2 + $0x10] sm:$0xf] }
   0xf   :  { %175 = vmatpush.bf16.msra.mxu3 %v676_v25  ;;  %v688_v37 = vor.u32 %v755_v32, %v687_v31  ;;  %v754_v40 = vld [vmem:[#allocation2 + $0x2c] sm:$0xf0]  ;;  %v758_v41 = vld [vmem:[#allocation2 + $0x54] sm:$0xf]  ;;  %v692_v42 = vor.u32 %v751_v33, %v689_v34  ;;  %s799_s0 = smov 64   ;;  %vm305_vm2 = vcmask 1041920  }
  0x10   :  { %725 = vmatmul.msk.bf16.vlgmr.msra.gmra.mxu0 %vm125_vm0, %v28_v23  ;;  %v713_v43 = vld [vmem:[#allocation2 + $0x70] sm:$0xf0]  ;;  %v680_v47 = vor.u32 %v754_v40, %v679_v39  ;;  %vm502_vm6 = vcmask 516096   ;;  %vm513_vm7 = vcmask 1040384  }
  0x11   :  { %v750_v44 = vld [vmem:[#allocation2 + $0x14] sm:$0xf]  ;;  %726 = vmatmul.msk.bf16.vlgmr.msra.gmra.mxu1 %vm125_vm0, %v28_v23  ;;  %727 = vmatmul.msk.bf16.vlgmr.msra.gmra.mxu2 %vm125_vm0, %v28_v23  ;;  %v716_v46 = vor.u32 %v758_v41, %v713_v43 }
  0x12   :  { %213 = vmatpush.bf16.msrb.mxu2 %v720_v29  ;;  %v681_v45 = vld [vmem:[#allocation2 + $0x30] sm:$0xf0]  ;;  %728 = vmatmul.msk.bf16.vlgmr.msra.gmra.mxu3 %vm125_vm0, %v28_v23 }
  0x13   :  { %226 = vmatpush.bf16.msrb.mxu3 %v724_v30  ;;  %187 = vmatpush.bf16.msrb.mxu0 %v712_v38  ;;  %v684_v48 = vor.u32 %v750_v44, %v681_v45 }
  0x14   :  { %200 = vmatpush.bf16.msrb.mxu1 %v716_v46 }
  0x16   :  { %214 = vmatpush.bf16.msrb.mxu2 %v688_v37 }
  0x17   :  { %227 = vmatpush.bf16.msrb.mxu3 %v692_v42  ;;  %188 = vmatpush.bf16.msrb.mxu0 %v680_v47 }
  0x18   :  { %201 = vmatpush.bf16.msrb.mxu1 %v684_v48 }
  0x20   :  { %729 = vmatmul.msk.bf16.vlgmr.msrb.gmra.mxu0 %vm125_vm0, %v28_v23 }
  0x21   :  { %731 = vmatmul.msk.bf16.vlgmr.msrb.gmra.mxu2 %vm125_vm0, %v28_v23  ;;  %730 = vmatmul.msk.bf16.vlgmr.msrb.gmra.mxu1 %vm125_vm0, %v28_v23 }
  0x22   :  { %732 = vmatmul.msk.bf16.vlgmr.msrb.gmra.mxu3 %vm125_vm0, %v28_v23 }
  0x8d   :  { %v829_v49 = vpop.f32.mrf.mxu0 }
  0x8e   :  { %v831_v50 = vpop.f32.mrf.mxu1  ;;  %234 = vrot.lane.b32.xlu0 %v829_v49, %s799_s0 }
  0x94   :  { %v835_v51 = vpop.f32.mrf.mxu2 }
  0x95   :  { %v140_v52 = vpop.f32.mrf.mxu0  ;;  %v837_v53 = vpop.f32.mrf.mxu3  ;;  %246 = vrot.lane.b32.xlu1 %v835_v51, %s799_s0 }
  0x96   :  { %v153_v54 = vpop.f32.mrf.mxu1  ;;  %240 = vrot.lane.b32.xlu0 %v831_v50, %s799_s0 }
  0x9c   :  { %v166_v55 = vpop.f32.mrf.mxu2 }
  0x9d   :  { %v179_v56 = vpop.f32.mrf.mxu3  ;;  %252 = vrot.lane.b32.xlu1 %v837_v53, %s799_s0  ;;  %v845_v57 = vpop.f32.mrf.mxu0 }
  0x9e   :  { %v847_v58 = vpop.f32.mrf.mxu1  ;;  %258 = vrot.lane.b32.xlu2 %v845_v57, %s799_s0 }
  0xa4   :  { %v851_v59 = vpop.f32.mrf.mxu2 }
  0xa5   :  { %v853_v60 = vpop.f32.mrf.mxu3  ;;  %270 = vrot.lane.b32.xlu0 %v851_v59, %s799_s0  ;;  %v192_v61 = vpop.f32.mrf.mxu0 }
  0xa6   :  { %276 = vrot.lane.b32.xlu1 %v853_v60, %s799_s0  ;;  %v205_v62 = vpop.f32.mrf.mxu1  ;;  %264 = vrot.lane.b32.xlu2 %v847_v58, %s799_s0 }
  0xac   :  { %v218_v63 = vpop.f32.mrf.mxu2 }
  0xad   :  { %v231_v0 = vpop.f32.mrf.mxu3 }
  0xf8   :  { %v259_v8 = vpop.permute.xlu2 %258 }
 0x100   :  { %v235_v1 = vpop.permute.xlu0 %234  ;;  %v265_v15 = vpop.permute.xlu2 %264 }
 0x101   :  { %v237_v2 = vadd.f32 %v235_v1, %v829_v49 }
 0x103   :  { %v238_v4 = vadd.f32 %v237_v2, %v831_v50 }
 0x107   :  { %v247_v3 = vpop.permute.xlu1 %246 }
 0x108   :  { %v241_v5 = vpop.permute.xlu0 %240 }
 0x109   :  { %v243_v6 = vadd.f32 %v241_v5, %v238_v4 }
 0x10b   :  { %v244_v7 = vadd.f32 %v243_v6, %v835_v51 }
 0x10d   :  { %v249_v9 = vadd.f32 %v247_v3, %v244_v7 }
 0x10f   :  { %v253_v10 = vpop.permute.xlu1 %252  ;;  %v250_v11 = vadd.f32 %v249_v9, %v837_v53 }
 0x111   :  { %v255_v12 = vadd.f32 %v253_v10, %v250_v11 }
 0x113   :  { %v256_v13 = vadd.f32 %v255_v12, %v845_v57 }
 0x115   :  { %v261_v14 = vadd.f32 %v259_v8, %v256_v13 }
 0x117   :  { %v262_v16 = vadd.f32 %v261_v14, %v847_v58  ;;  %v271_v18 = vpop.permute.xlu0 %270 }
 0x118   :  { %v277_v21 = vpop.permute.xlu1 %276 }
 0x119   :  { %v267_v17 = vadd.f32 %v265_v15, %v262_v16 }
 0x11b   :  { %v268_v19 = vadd.f32 %v267_v17, %v851_v59 }
 0x11d   :  { %v273_v20 = vadd.f32 %v271_v18, %v268_v19 }
 0x11f   :  { %v274_v22 = vadd.f32 %v273_v20, %v853_v60 }
 0x121   :  { %v279_v23 = vadd.f32 %v277_v21, %v274_v22 }
 0x123   :  { %v281_v24 = vsel %vm280_vm1, %v279_v23, 0.0 }
 0x124   :  { %v282_v25 = vrot.slane %v281_v24, 4 }
 0x126   :  { %v283_v26 = vadd.f32 %v282_v25, %v281_v24 }
 0x128   :  { %v284_v27 = vrot.slane %v283_v26, 2 }
 0x12a   :  { %v285_v28 = vadd.f32 %v284_v27, %v283_v26 }
 0x12c   :  { %v286_v29 = vrot.slane %v285_v28, 1 }
 0x12e   :  { %v287_v30 = vadd.f32 %v286_v29, %v285_v28 }
 0x130   :  { %v870_v31 = vmul.f32 0.03125, %v287_v30 }
 0x132   :  { %300 = vrot.lane.b32.xlu2 %v870_v31, %s799_s0  ;;  %v876_v32 = vsub.f32 %v837_v53, %v870_v31  ;;  %v880_v33 = vsub.f32 %v845_v57, %v870_v31  ;;  %v884_v34 = vsub.f32 %v847_v58, %v870_v31  ;;  %v888_v35 = vsub.f32 %v851_v59, %v870_v31 }
 0x133   :  { %v892_v36 = vsub.f32 %v853_v60, %v870_v31 }
 0x134   :  { %v367_v37 = vmul.f32 %v876_v32, %v876_v32  ;;  %v391_v38 = vmul.f32 %v880_v33, %v880_v33  ;;  %v415_v39 = vmul.f32 %v884_v34, %v884_v34  ;;  %v439_v40 = vmul.f32 %v888_v35, %v888_v35 }
 0x135   :  { %v463_v41 = vmul.f32 %v892_v36, %v892_v36 }
 0x136   :  { %v905_v42 = vsel %vm280_vm1, %v367_v37, 0.0  ;;  %v908_v43 = vsel %vm280_vm1, %v391_v38, 0.0  ;;  %v911_v44 = vsel %vm280_vm1, %v415_v39, 0.0  ;;  %v914_v45 = vsel %vm280_vm1, %v439_v40, 0.0 }
 0x137   :  { %v917_v46 = vsel %vm280_vm1, %v463_v41, 0.0 }
 0x18c   :  { %v301_v47 = vpop.permute.xlu2 %300 }
 0x18d   :  { %v920_v48 = vsub.f32 %v835_v51, %v301_v47  ;;  %v923_v52 = vsub.f32 %v831_v50, %v301_v47  ;;  %v926_v54 = vsub.f32 %v829_v49, %v301_v47  ;;  %v929_v55 = vsub.f32 %v847_v58, %v301_v47 }
 0x18e   :  { %v932_v56 = vsub.f32 %v845_v57, %v301_v47  ;;  %v935_v61 = vsub.f32 %v837_v53, %v301_v47  ;;  %v938_v62 = vsub.f32 %v853_v60, %v301_v47  ;;  %v941_v63 = vsub.f32 %v851_v59, %v301_v47 }
 0x18f   :  { %v353_v0 = vmul.f32 %v920_v48, %v920_v48  ;;  %v329_v1 = vmul.f32 %v923_v52, %v923_v52  ;;  %v304_v58 = vmul.f32 %v926_v54, %v926_v54  ;;  %v425_v57 = vmul.f32 %v929_v55, %v929_v55 }
 0x190   :  { %v401_v53 = vmul.f32 %v932_v56, %v932_v56  ;;  %v377_v60 = vmul.f32 %v935_v61, %v935_v61  ;;  %v473_v59 = vmul.f32 %v938_v62, %v938_v62  ;;  %v449_v2 = vmul.f32 %v941_v63, %v941_v63 }
 0x191   :  { %v354_v3 = vsel %vm305_vm2, %v353_v0, 0.0  ;;  %v330_v4 = vsel %vm305_vm2, %v329_v1, 0.0  ;;  %v306_v5 = vsel %vm305_vm2, %v304_v58, 0.0  ;;  %v426_v6 = vsel %vm305_vm2, %v425_v57, 0.0 }
 0x192   :  { %v355_v7 = vrot.slane %v354_v3, 4  ;;  %v331_v8 = vrot.slane %v330_v4, 4  ;;  %v307_v9 = vrot.slane %v306_v5, 4  ;;  %v427_v10 = vrot.slane %v426_v6, 4 }
 0x193   :  { %v402_v11 = vsel %vm305_vm2, %v401_v53, 0.0  ;;  %v378_v12 = vsel %vm305_vm2, %v377_v60, 0.0  ;;  %v474_v13 = vsel %vm305_vm2, %v473_v59, 0.0  ;;  %v450_v23 = vsel %vm305_vm2, %v449_v2, 0.0 }
 0x194   :  { %v356_v14 = vadd.f32 %v355_v7, %v354_v3  ;;  %v332_v15 = vadd.f32 %v331_v8, %v330_v4  ;;  %v308_v16 = vadd.f32 %v307_v9, %v306_v5  ;;  %v428_v17 = vadd.f32 %v427_v10, %v426_v6 }
 0x195   :  { %v403_v18 = vrot.slane %v402_v11, 4  ;;  %v379_v19 = vrot.slane %v378_v12, 4  ;;  %v475_v27 = vrot.slane %v474_v13, 4  ;;  %v451_v39 = vrot.slane %v450_v23, 4 }
 0x196   :  { %v357_v20 = vrot.slane %v356_v14, 2  ;;  %v333_v21 = vrot.slane %v332_v15, 2  ;;  %v309_v22 = vrot.slane %v308_v16, 2  ;;  %v429_v24 = vrot.slane %v428_v17, 2 }
 0x197   :  { %v404_v25 = vadd.f32 %v403_v18, %v402_v11  ;;  %v380_v26 = vadd.f32 %v379_v19, %v378_v12  ;;  %v476_v1 = vadd.f32 %v475_v27, %v474_v13  ;;  %v452_v2 = vadd.f32 %v451_v39, %v450_v23 }
 0x198   :  { %v358_v28 = vadd.f32 %v357_v20, %v356_v14  ;;  %v334_v29 = vadd.f32 %v333_v21, %v332_v15  ;;  %v310_v30 = vadd.f32 %v309_v22, %v308_v16  ;;  %v430_v0 = vadd.f32 %v429_v24, %v428_v17 }
 0x199   :  { %v405_v37 = vrot.slane %v404_v25, 2  ;;  %v381_v38 = vrot.slane %v380_v26, 2  ;;  %v477_v5 = vrot.slane %v476_v1, 2  ;;  %v453_v7 = vrot.slane %v452_v2, 2 }
 0x19a   :  { %v359_v40 = vrot.slane %v358_v28, 1  ;;  %v335_v41 = vrot.slane %v334_v29, 1  ;;  %v311_v47 = vrot.slane %v310_v30, 1  ;;  %v431_v3 = vrot.slane %v430_v0, 1 }
 0x19b   :  { %v406_v60 = vadd.f32 %v405_v37, %v404_v25  ;;  %v382_v59 = vadd.f32 %v381_v38, %v380_v26  ;;  %v478_v10 = vadd.f32 %v477_v5, %v476_v1  ;;  %v454_v12 = vadd.f32 %v453_v7, %v452_v2 }
 0x19c   :  { %v360_v58 = vadd.f32 %v359_v40, %v358_v28  ;;  %v336_v57 = vadd.f32 %v335_v41, %v334_v29  ;;  %v312_v53 = vadd.f32 %v311_v47, %v310_v30  ;;  %v432_v8 = vadd.f32 %v431_v3, %v430_v0 }
 0x19d   :  { %v407_v4 = vrot.slane %v406_v60, 1  ;;  %v383_v6 = vrot.slane %v382_v59, 1  ;;  %v479_v13 = vrot.slane %v478_v10, 1  ;;  %v455_v14 = vrot.slane %v454_v12, 1 }
 0x19e   :  { %362 = vrot.lane.b32.xlu2 %v360_v58, %s799_s0  ;;  %338 = vrot.lane.b32.xlu1 %v336_v57, %s799_s0  ;;  %v977_v17 = vsub.f32 %v829_v49, %v870_v31  ;;  %v981_v18 = vsub.f32 %v831_v50, %v870_v31  ;;  %v989_v21 = vsub.f32 %v835_v51, %v870_v31  ;;  %v369_v30 = vrot.slane %v905_v42, 4 }
 0x19f   :  { %314 = vrot.lane.b32.xlu0 %v312_v53, %s799_s0  ;;  %v408_v9 = vadd.f32 %v407_v4, %v406_v60  ;;  %v384_v11 = vadd.f32 %v383_v6, %v382_v59  ;;  %v480_v15 = vadd.f32 %v479_v13, %v478_v10  ;;  %v456_v16 = vadd.f32 %v455_v14, %v454_v12 }
 0x1a0   :  { %v290_v19 = vmul.f32 %v977_v17, %v977_v17  ;;  %v319_v20 = vmul.f32 %v981_v18, %v981_v18  ;;  %v343_v49 = vmul.f32 %v989_v21, %v989_v21  ;;  %v370_v38 = vadd.f32 %v369_v30, %v905_v42 }
 0x1a1   :  { %v393_v41 = vrot.slane %v908_v43, 4  ;;  %v417_v1 = vrot.slane %v911_v44, 4  ;;  %v441_v4 = vrot.slane %v914_v45, 4  ;;  %v465_v12 = vrot.slane %v917_v46, 4 }
 0x1a2   :  { %v291_v22 = vsel %vm280_vm1, %v290_v19, 0.0  ;;  %v320_v23 = vsel %vm280_vm1, %v319_v20, 0.0  ;;  %v344_v25 = vsel %vm280_vm1, %v343_v49, 0.0  ;;  %v371_v0 = vrot.slane %v370_v38, 2 }
 0x1a3   :  { %v292_v24 = vrot.slane %v291_v22, 4  ;;  %v321_v50 = vrot.slane %v320_v23, 4  ;;  %v345_v28 = vrot.slane %v344_v25, 4  ;;  %v394_v53 = vadd.f32 %v393_v41, %v908_v43 }
 0x1a4   :  { %v372_v2 = vadd.f32 %v371_v0, %v370_v38  ;;  %v418_v3 = vadd.f32 %v417_v1, %v911_v44  ;;  %v466_v20 = vadd.f32 %v465_v12, %v917_v46 }
 0x1a5   :  { %v293_v26 = vadd.f32 %v292_v24, %v291_v22  ;;  %v322_v27 = vadd.f32 %v321_v50, %v320_v23  ;;  %v346_v51 = vadd.f32 %v345_v28, %v344_v25  ;;  %v395_v7 = vrot.slane %v394_v53, 2 }
 0x1a6   :  { %434 = vrot.lane.b32.xlu2 %v432_v8, %s799_s0  ;;  %410 = vrot.lane.b32.xlu1 %v408_v9, %s799_s0  ;;  %v419_v10 = vrot.slane %v418_v3, 2  ;;  %v373_v14 = vrot.slane %v372_v2, 1 }
 0x1a7   :  { %386 = vrot.lane.b32.xlu0 %v384_v11, %s799_s0  ;;  %v294_v29 = vrot.slane %v293_v26, 2  ;;  %v323_v37 = vrot.slane %v322_v27, 2  ;;  %v347_v40 = vrot.slane %v346_v51, 2  ;;  %v442_v11 = vadd.f32 %v441_v4, %v914_v45 }
 0x1a8   :  { %v374_v23 = vadd.f32 %v373_v14, %v372_v2  ;;  %v420_v24 = vadd.f32 %v419_v10, %v418_v3 }
 0x1a9   :  { %v295_v31 = vadd.f32 %v294_v29, %v293_v26  ;;  %v324_v39 = vadd.f32 %v323_v37, %v322_v27  ;;  %v348_v57 = vadd.f32 %v347_v40, %v346_v51  ;;  %v443_v44 = vrot.slane %v442_v11, 2 }
 0x1aa   :  { %v467_v26 = vrot.slane %v466_v20, 2  ;;  %v421_v28 = vrot.slane %v420_v24, 1 }
 0x1ab   :  { %v296_v47 = vrot.slane %v295_v31, 1  ;;  %v325_v58 = vrot.slane %v324_v39, 1  ;;  %v349_v6 = vrot.slane %v348_v57, 1  ;;  %v444_v29 = vadd.f32 %v443_v44, %v442_v11 }
 0x1ad   :  { %v297_v60 = vadd.f32 %v296_v47, %v295_v31  ;;  %v326_v5 = vadd.f32 %v325_v58, %v324_v39  ;;  %v350_v43 = vadd.f32 %v349_v6, %v348_v57  ;;  %v422_v31 = vadd.f32 %v421_v28, %v420_v24 }
 0x1ae   :  { %482 = vrot.lane.b32.xlu1 %v480_v15, %s799_s0  ;;  %v396_v15 = vadd.f32 %v395_v7, %v394_v53  ;;  %v445_v38 = vrot.slane %v444_v29, 1  ;;  %v468_v39 = vadd.f32 %v467_v26, %v466_v20 }
 0x1af   :  { %458 = vrot.lane.b32.xlu0 %v456_v16, %s799_s0 }
 0x1b0   :  { %v397_v49 = vrot.slane %v396_v15, 1  ;;  %v446_v47 = vadd.f32 %v445_v38, %v444_v29  ;;  %v469_v0 = vrot.slane %v468_v39, 1 }
 0x1b2   :  { %v398_v45 = vadd.f32 %v397_v49, %v396_v15  ;;  %v470_v53 = vadd.f32 %v469_v0, %v468_v39 }
 0x1f8   :  { %v363_v19 = vpop.permute.xlu2 %362 }
 0x200   :  { %v435_v41 = vpop.permute.xlu2 %434 }
 0x210   :  { %v339_v9 = vpop.permute.xlu1 %338 }
 0x211   :  { %v315_v59 = vpop.permute.xlu0 %314 }
 0x212   :  { %v317_v42 = vadd.f32 %v315_v59, %v297_v60 }
 0x214   :  { %v327_v8 = vadd.f32 %v326_v5, %v317_v42 }
 0x216   :  { %v341_v13 = vadd.f32 %v339_v9, %v327_v8 }
 0x218   :  { %v351_v16 = vadd.f32 %v350_v43, %v341_v13  ;;  %v411_v37 = vpop.permute.xlu1 %410 }
 0x219   :  { %v387_v25 = vpop.permute.xlu0 %386 }
 0x21a   :  { %v365_v22 = vadd.f32 %v363_v19, %v351_v16 }
 0x21c   :  { %v375_v50 = vadd.f32 %v374_v23, %v365_v22 }
 0x21e   :  { %v389_v27 = vadd.f32 %v387_v25, %v375_v50 }
 0x220   :  { %v399_v30 = vadd.f32 %v398_v45, %v389_v27  ;;  %v483_v59 = vpop.permute.xlu1 %482 }
 0x221   :  { %v459_v58 = vpop.permute.xlu0 %458 }
 0x222   :  { %v413_v51 = vadd.f32 %v411_v37, %v399_v30 }
 0x224   :  { %v423_v40 = vadd.f32 %v422_v31, %v413_v51 }
 0x226   :  { %v437_v46 = vadd.f32 %v435_v41, %v423_v40 }
 0x228   :  { %v447_v1 = vadd.f32 %v446_v47, %v437_v46 }
 0x22a   :  { %v461_v57 = vadd.f32 %v459_v58, %v447_v1 }
 0x22c   :  { %v471_v60 = vadd.f32 %v470_v53, %v461_v57 }
 0x22e   :  { %v485_v2 = vadd.f32 %v483_v59, %v471_v60 }
 0x230   :  { %v486_v3 = vmul.f32 0.03125, %v485_v2 }
 0x232   :  { %v487_v4 = vadd.f32 1e-05, %v486_v3 }
 0x234   :  { %768 = vrsqrt.f32 %v487_v4  ;;  %vm494_vm4 = vweird.f32 %v487_v4 }
 0x23a   :  { %v769_v42 = vpop.eup %768 }
 0x23b   :  { %v489_v5 = vmul.f32 %v769_v42, %v487_v4  ;;  %vm495_vm3 = vweird.f32 %v769_v42 }
 0x23c   :  { %vm496_vm5 = vmor %vm494_vm4, %vm495_vm3 }
 0x23d   :  { %v490_v6 = vmul.f32 %v769_v42, %v489_v5 }
 0x23f   :  { %v491_v7 = vmul.f32 0.5, %v490_v6 }
 0x241   :  { %v492_v8 = vsub.f32 1.5, %v491_v7 }
 0x243   :  { %v493_v9 = vmul.f32 %v769_v42, %v492_v8 }
 0x245   :  { %v497_v10 = vsel %vm496_vm5, %v769_v42, %v493_v9 }
 0x246   :  { %v498_v11 = vperm.slane %v497_v10, 0 }
 0x248   :  { %v499_v12 = vmul.f32 %v498_v11, %v977_v17  ;;  %v523_v13 = vmul.f32 %v498_v11, %v981_v18  ;;  %v542_v43 = vmul.f32 %v498_v11, %v989_v21  ;;  %v561_v14 = vmul.f32 %v498_v11, %v876_v32  ;;  %505 = vrot.lane.b32.xlu2 %v498_v11, %s799_s0 }
 0x249   :  { %v580_v15 = vmul.f32 %v498_v11, %v880_v33  ;;  %v599_v16 = vmul.f32 %v498_v11, %v884_v34  ;;  %v618_v19 = vmul.f32 %v498_v11, %v888_v35  ;;  %v637_v44 = vmul.f32 %v498_v11, %v892_v36 }
 0x24a   :  { %v500_v20 = vmax.f32 %v499_v12, 0.0  ;;  %v524_v22 = vmax.f32 %v523_v13, 0.0  ;;  %v543_v23 = vmax.f32 %v542_v43, 0.0  ;;  %v562_v17 = vmax.f32 %v561_v14, 0.0 }
 0x24b   :  { %v581_v18 = vmax.f32 %v580_v15, 0.0  ;;  %v600_v49 = vmax.f32 %v599_v16, 0.0  ;;  %v619_v50 = vmax.f32 %v618_v19, 0.0  ;;  %v638_v26 = vmax.f32 %v637_v44, 0.0 }
 0x24c   :  { %v501_v21 = vpack.c.bf16 %v500_v20, %v500_v20  ;;  %v525_v24 = vpack.c.bf16 %v524_v22, %v524_v22  ;;  %v544_v32 = vpack.c.bf16 %v543_v23, %v543_v23  ;;  %v563_v25 = vpack.c.bf16 %v562_v17, %v562_v17 }
 0x24d   :  { %v582_v33 = vpack.c.bf16 %v581_v18, %v581_v18  ;;  %v601_v34 = vpack.c.bf16 %v600_v49, %v600_v49  ;;  %v620_v35 = vpack.c.bf16 %v619_v50, %v619_v50  ;;  %v639_v36 = vpack.c.bf16 %v638_v26, %v638_v26 }
 0x24e   :  { %503 = vst.msk [vmem:[%s1105_s2] sm:$0x1] %vm502_vm6, %v501_v21 }
 0x24f   :  { %734 = vst.msk [vmem:[%s1105_s2 + $0x2] sm:$0x1] %vm502_vm6, %v525_v24 }
 0x250   :  { %736 = vst.msk [vmem:[%s1105_s2 + $0x4] sm:$0x1] %vm502_vm6, %v544_v32 }
 0x251   :  { %738 = vst.msk [vmem:[%s1105_s2 + $0x6] sm:$0x1] %vm502_vm6, %v563_v25 }
 0x252   :  { %740 = vst.msk [vmem:[%s1105_s2 + $0x8] sm:$0x1] %vm502_vm6, %v582_v33 }
 0x253   :  { %742 = vst.msk [vmem:[%s1105_s2 + $0xa] sm:$0x1] %vm502_vm6, %v601_v34 }
 0x254   :  { %744 = vst.msk [vmem:[%s1105_s2 + $0xc] sm:$0x1] %vm502_vm6, %v620_v35 }
 0x255   :  { %746 = vst.msk [vmem:[%s1105_s2 + $0xe] sm:$0x1] %vm502_vm6, %v639_v36 }
 0x2a2   :  { %v506_v27 = vpop.permute.xlu2 %505 }
 0x2a3   :  { %v547_v45 = vmul.f32 %v506_v27, %v920_v48  ;;  %v528_v28 = vmul.f32 %v506_v27, %v923_v52  ;;  %v508_v29 = vmul.f32 %v506_v27, %v926_v54  ;;  %v604_v30 = vmul.f32 %v506_v27, %v929_v55 }
 0x2a4   :  { %v585_v37 = vmul.f32 %v506_v27, %v932_v56  ;;  %v566_v51 = vmul.f32 %v506_v27, %v935_v61  ;;  %v642_v55 = vmul.f32 %v506_v27, %v938_v62  ;;  %v623_v59 = vmul.f32 %v506_v27, %v941_v63 }
 0x2a5   :  { %v548_v31 = vmax.f32 %v547_v45, 0.0  ;;  %v529_v38 = vmax.f32 %v528_v28, 0.0  ;;  %v509_v39 = vmax.f32 %v508_v29, 0.0  ;;  %v605_v40 = vmax.f32 %v604_v30, 0.0 }
 0x2a6   :  { %v586_v0 = vmax.f32 %v585_v37, 0.0  ;;  %v567_v48 = vmax.f32 %v566_v51, 0.0  ;;  %v643_v4 = vmax.f32 %v642_v55, 0.0  ;;  %v624_v42 = vmax.f32 %v623_v59, 0.0 }
 0x2a7   :  { %v549_v41 = vpack.c.bf16 %v548_v31, %v548_v31  ;;  %v530_v46 = vpack.c.bf16 %v529_v38, %v529_v38  ;;  %v510_v47 = vpack.c.bf16 %v509_v39, %v509_v39  ;;  %v606_v54 = vpack.c.bf16 %v605_v40, %v605_v40 }
 0x2a8   :  { %v587_v53 = vpack.c.bf16 %v586_v0, %v586_v0  ;;  %v568_v60 = vpack.c.bf16 %v567_v48, %v567_v48  ;;  %v644_v7 = vpack.c.bf16 %v643_v4, %v643_v4  ;;  %v625_v9 = vpack.c.bf16 %v624_v42, %v624_v42 }
 0x2a9   :  { %v551_v1 = vrot.slane %v549_v41, 3  ;;  %v532_v52 = vrot.slane %v530_v46, 3  ;;  %v512_v58 = vrot.slane %v510_v47, 3  ;;  %v608_v2 = vrot.slane %v606_v54, 3 }
 0x2aa   :  { %v589_v3 = vrot.slane %v587_v53, 3  ;;  %v570_v62 = vrot.slane %v568_v60, 3  ;;  %v646_v63 = vrot.slane %v644_v7, 3  ;;  %v627_v10 = vrot.slane %v625_v9, 3 }
 0x2ab   :  { %v554_v56 = vsel %vm513_vm7, %v549_v41, %v551_v1  ;;  %v535_v61 = vsel %vm513_vm7, %v530_v46, %v532_v52  ;;  %v516_v57 = vsel %vm513_vm7, %v510_v47, %v512_v58  ;;  %v611_v5 = vsel %vm513_vm7, %v606_v54, %v608_v2 }
 0x2ac   :  { %556 = vrot.lane.b32.xlu2 %v554_v56, %s799_s0  ;;  %537 = vrot.lane.b32.xlu1 %v535_v61, %s799_s0  ;;  %v592_v6 = vsel %vm513_vm7, %v587_v53, %v589_v3  ;;  %v573_v8 = vsel %vm513_vm7, %v568_v60, %v570_v62  ;;  %v649_v11 = vsel %vm513_vm7, %v644_v7, %v646_v63 }
 0x2ad   :  { %518 = vrot.lane.b32.xlu0 %v516_v57, %s799_s0  ;;  %v630_v12 = vsel %vm513_vm7, %v625_v9, %v627_v10 }
 0x2b4   :  { %613 = vrot.lane.b32.xlu2 %v611_v5, %s799_s0  ;;  %594 = vrot.lane.b32.xlu1 %v592_v6, %s799_s0 }
 0x2b5   :  { %575 = vrot.lane.b32.xlu0 %v573_v8, %s799_s0 }
 0x2bc   :  { %651 = vrot.lane.b32.xlu1 %v649_v11, %s799_s0 }
 0x2bd   :  { %632 = vrot.lane.b32.xlu0 %v630_v12, %s799_s0 }
 0x306   :  { %v557_v13 = vpop.permute.xlu2 %556 }
 0x307   :  { %737 = vst.msk [vmem:[%s1105_s2 + $0x5] sm:$0x1] %vm502_vm6, %v557_v13 }
 0x30e   :  { %v614_v43 = vpop.permute.xlu2 %613 }
 0x30f   :  { %743 = vst.msk [vmem:[%s1105_s2 + $0xb] sm:$0x1] %vm502_vm6, %v614_v43 }
 0x31e   :  { %v538_v14 = vpop.permute.xlu1 %537 }
 0x31f   :  { %735 = vst.msk [vmem:[%s1105_s2 + $0x3] sm:$0x1] %vm502_vm6, %v538_v14  ;;  %v519_v15 = vpop.permute.xlu0 %518 }
 0x320   :  { %733 = vst.msk [vmem:[%s1105_s2 + $0x1] sm:$0x1] %vm502_vm6, %v519_v15 }
 0x326   :  { %v595_v16 = vpop.permute.xlu1 %594 }
 0x327   :  { %741 = vst.msk [vmem:[%s1105_s2 + $0x9] sm:$0x1] %vm502_vm6, %v595_v16  ;;  %v576_v19 = vpop.permute.xlu0 %575 }
 0x328   :  { %739 = vst.msk [vmem:[%s1105_s2 + $0x7] sm:$0x1] %vm502_vm6, %v576_v19 }
 0x32e   :  { %v652_v44 = vpop.permute.xlu1 %651 }
 0x32f   :  { %747 = vst.msk [vmem:[%s1105_s2 + $0xf] sm:$0x1] %vm502_vm6, %v652_v44  ;;  %v633_v20 = vpop.permute.xlu0 %632 }
 0x330   :  { %745 = vst.msk [vmem:[%s1105_s2 + $0xd] sm:$0x1] %vm502_vm6, %v633_v20 }
 0x331   :  { %660 = vsyncpa [#allocation3], 1 }

// kernel: presgan_forward.5
= control target key start
LH: loop header
LB: loop body
LE: loop exit
PB: predicated region body
PF: predicated region fallthrough
CT: control target
= control target key end

     0   :  { %vm789_vm0 = vcmask 261120   ;;  %vm916_vm4 = vcmask 257024   ;;  %s1989_s1 = inlined_call_operand.vmem [shape: bf16[4,256,32], index: 1, kind: input, shape index: {}]   ;;  %s1990_s0 = inlined_call_operand.vmem [shape: bf16[4,32,256], index: 0, kind: input, shape index: {}]   ;;  %s1991_s2 = inlined_call_operand.vmem [shape: bf16[4,32,32], index: 2, kind: output, shape index: {}]  }
   0x1   :  { %v1427_v0 = vld [vmem:[%s1989_s1 + $0x38] sm:$0xff]  ;;  %v1426_v4 = vld [vmem:[%s1989_s1 + $0x30] sm:$0xff]  ;;  %v1425_v8 = vld [vmem:[%s1989_s1 + $0x28] sm:$0xff] }
   0x2   :  { %v1435_v1 = vld [vmem:[%s1989_s1 + $0x78] sm:$0xff]  ;;  %163 = vmatpush.bf16.msra.mxu0 %v1427_v0  ;;  %v1434_v5 = vld [vmem:[%s1989_s1 + $0x70] sm:$0xff]  ;;  %v1433_v9 = vld [vmem:[%s1989_s1 + $0x68] sm:$0xff] }
   0x3   :  { %v1447_v2 = vld [vmem:[%s1989_s1 + $0xb8] sm:$0xff]  ;;  %182 = vmatpush.bf16.msra.mxu1 %v1435_v1  ;;  %v1446_v6 = vld [vmem:[%s1989_s1 + $0xb0] sm:$0xff]  ;;  %v1445_v10 = vld [vmem:[%s1989_s1 + $0xa8] sm:$0xff] }
   0x4   :  { %v1455_v3 = vld [vmem:[%s1989_s1 + $0xf8] sm:$0xff]  ;;  %355 = vmatpush.bf16.msra.mxu2 %v1447_v2  ;;  %v1454_v7 = vld [vmem:[%s1989_s1 + $0xf0] sm:$0xff]  ;;  %v1453_v11 = vld [vmem:[%s1989_s1 + $0xe8] sm:$0xff] }
   0x5   :  { %374 = vmatpush.bf16.msra.mxu3 %v1455_v3  ;;  %v1424_v12 = vld [vmem:[%s1989_s1 + $0x20] sm:$0xff]  ;;  %v1423_v16 = vld [vmem:[%s1989_s1 + $0x18] sm:$0xff]  ;;  %v1422_v20 = vld [vmem:[%s1989_s1 + $0x10] sm:$0xff] }
   0x6   :  { %164 = vmatpush.bf16.msra.mxu0 %v1426_v4  ;;  %v1432_v13 = vld [vmem:[%s1989_s1 + $0x60] sm:$0xff]  ;;  %v1431_v17 = vld [vmem:[%s1989_s1 + $0x58] sm:$0xff]  ;;  %v1430_v21 = vld [vmem:[%s1989_s1 + $0x50] sm:$0xff] }
   0x7   :  { %183 = vmatpush.bf16.msra.mxu1 %v1434_v5  ;;  %v1444_v14 = vld [vmem:[%s1989_s1 + $0xa0] sm:$0xff]  ;;  %v1443_v18 = vld [vmem:[%s1989_s1 + $0x98] sm:$0xff]  ;;  %v1442_v22 = vld [vmem:[%s1989_s1 + $0x90] sm:$0xff] }
   0x8   :  { %356 = vmatpush.bf16.msra.mxu2 %v1446_v6  ;;  %v1452_v15 = vld [vmem:[%s1989_s1 + $0xe0] sm:$0xff]  ;;  %v1451_v19 = vld [vmem:[%s1989_s1 + $0xd8] sm:$0xff]  ;;  %v1450_v23 = vld [vmem:[%s1989_s1 + $0xd0] sm:$0xff] }
   0x9   :  { %375 = vmatpush.bf16.msra.mxu3 %v1454_v7  ;;  %v1421_v24 = vld [vmem:[%s1989_s1 + $0x8] sm:$0xff]  ;;  %v1420_v28 = vld [vmem:[%s1989_s1] sm:$0xff]  ;;  %v1487_v40 = vld [vmem:[%s1989_s1 + $0x1b8] sm:$0xff] }
   0xa   :  { %165 = vmatpush.bf16.msra.mxu0 %v1425_v8  ;;  %v1429_v25 = vld [vmem:[%s1989_s1 + $0x48] sm:$0xff]  ;;  %v1428_v29 = vld [vmem:[%s1989_s1 + $0x40] sm:$0xff]  ;;  %v1495_v41 = vld [vmem:[%s1989_s1 + $0x1f8] sm:$0xff] }
   0xb   :  { %184 = vmatpush.bf16.msra.mxu1 %v1433_v9  ;;  %v1441_v26 = vld [vmem:[%s1989_s1 + $0x88] sm:$0xff]  ;;  %v1440_v30 = vld [vmem:[%s1989_s1 + $0x80] sm:$0xff]  ;;  %v1467_v46 = vld [vmem:[%s1989_s1 + $0x138] sm:$0xff] }
   0xc   :  { %357 = vmatpush.bf16.msra.mxu2 %v1445_v10  ;;  %v1449_v27 = vld [vmem:[%s1989_s1 + $0xc8] sm:$0xff]  ;;  %v1448_v31 = vld [vmem:[%s1989_s1 + $0xc0] sm:$0xff]  ;;  %v1475_v47 = vld [vmem:[%s1989_s1 + $0x178] sm:$0xff] }
   0xd   :  { %376 = vmatpush.bf16.msra.mxu3 %v1453_v11  ;;  %v978_v32 = vld [vmem:[%s1990_s0] sm:$0xf]  ;;  %v1417_v33 = vld [vmem:[%s1990_s0 + $0x4] sm:$0xf0]  ;;  %v1416_v34 = vld [vmem:[%s1990_s0 + $0x4] sm:$0xf] }
   0xe   :  { %166 = vmatpush.bf16.msra.mxu0 %v1424_v12  ;;  %v980_v35 = vld [vmem:[%s1990_s0 + $0x8] sm:$0xf0]  ;;  %v1094_v36 = vld [vmem:[%s1990_s0 + $0x20] sm:$0xf]  ;;  %v1437_v37 = vld [vmem:[%s1990_s0 + $0x24] sm:$0xf0]  ;;  %v979_v42 = vor.u32 %v1417_v33, %v978_v32 }
   0xf   :  { %185 = vmatpush.bf16.msra.mxu1 %v1432_v13  ;;  %v1436_v38 = vld [vmem:[%s1990_s0 + $0x24] sm:$0xf]  ;;  %v1096_v39 = vld [vmem:[%s1990_s0 + $0x28] sm:$0xf0]  ;;  %v983_v43 = vor.u32 %v1416_v34, %v980_v35  ;;  %v1095_v44 = vor.u32 %v1437_v37, %v1094_v36  ;;  %v1486_v48 = vld [vmem:[%s1989_s1 + $0x1b0] sm:$0xff] }
  0x10   :  { %358 = vmatpush.bf16.msra.mxu2 %v1444_v14  ;;  %v1099_v45 = vor.u32 %v1436_v38, %v1096_v39  ;;  %v1494_v49 = vld [vmem:[%s1989_s1 + $0x1f0] sm:$0xff]  ;;  %v1485_v52 = vld [vmem:[%s1989_s1 + $0x1a8] sm:$0xff]  ;;  %v1484_v56 = vld [vmem:[%s1989_s1 + $0x1a0] sm:$0xff] }
  0x11   :  { %377 = vmatpush.bf16.msra.mxu3 %v1452_v15  ;;  %v1466_v50 = vld [vmem:[%s1989_s1 + $0x130] sm:$0xff]  ;;  %v1493_v53 = vld [vmem:[%s1989_s1 + $0x1e8] sm:$0xff]  ;;  %v1492_v57 = vld [vmem:[%s1989_s1 + $0x1e0] sm:$0xff] }
  0x12   :  { %167 = vmatpush.bf16.msra.mxu0 %v1423_v16  ;;  %v1474_v51 = vld [vmem:[%s1989_s1 + $0x170] sm:$0xff]  ;;  %v1465_v54 = vld [vmem:[%s1989_s1 + $0x128] sm:$0xff]  ;;  %v1464_v58 = vld [vmem:[%s1989_s1 + $0x120] sm:$0xff] }
  0x13   :  { %186 = vmatpush.bf16.msra.mxu1 %v1431_v17  ;;  %v1473_v55 = vld [vmem:[%s1989_s1 + $0x168] sm:$0xff]  ;;  %v1472_v59 = vld [vmem:[%s1989_s1 + $0x160] sm:$0xff]  ;;  %v986_v60 = vld [vmem:[%s1990_s0 + $0x10] sm:$0xf] }
  0x14   :  { %359 = vmatpush.bf16.msra.mxu2 %v1443_v18  ;;  %v1419_v61 = vld [vmem:[%s1990_s0 + $0x14] sm:$0xf0]  ;;  %v1418_v62 = vld [vmem:[%s1990_s0 + $0x14] sm:$0xf]  ;;  %v988_v63 = vld [vmem:[%s1990_s0 + $0x18] sm:$0xf0] }
  0x15   :  { %378 = vmatpush.bf16.msra.mxu3 %v1451_v19  ;;  %v1102_v0 = vld [vmem:[%s1990_s0 + $0x30] sm:$0xf]  ;;  %v1439_v1 = vld [vmem:[%s1990_s0 + $0x34] sm:$0xf0]  ;;  %v1438_v2 = vld [vmem:[%s1990_s0 + $0x34] sm:$0xf]  ;;  %v987_v6 = vor.u32 %v1419_v61, %v986_v60  ;;  %v991_v7 = vor.u32 %v1418_v62, %v988_v63 }
  0x16   :  { %168 = vmatpush.bf16.msra.mxu0 %v1422_v20  ;;  %v1104_v3 = vld [vmem:[%s1990_s0 + $0x38] sm:$0xf0]  ;;  %v1103_v8 = vor.u32 %v1439_v1, %v1102_v0  ;;  %v1482_v12 = vld [vmem:[%s1989_s1 + $0x190] sm:$0xff]  ;;  %v1481_v16 = vld [vmem:[%s1989_s1 + $0x188] sm:$0xff] }
  0x17   :  { %187 = vmatpush.bf16.msra.mxu1 %v1430_v21  ;;  %v1483_v4 = vld [vmem:[%s1989_s1 + $0x198] sm:$0xff]  ;;  %v1107_v9 = vor.u32 %v1438_v2, %v1104_v3  ;;  %v1490_v13 = vld [vmem:[%s1989_s1 + $0x1d0] sm:$0xff]  ;;  %v1489_v17 = vld [vmem:[%s1989_s1 + $0x1c8] sm:$0xff] }
  0x18   :  { %360 = vmatpush.bf16.msra.mxu2 %v1442_v22  ;;  %v1491_v5 = vld [vmem:[%s1989_s1 + $0x1d8] sm:$0xff]  ;;  %v1462_v14 = vld [vmem:[%s1989_s1 + $0x110] sm:$0xff]  ;;  %v1461_v18 = vld [vmem:[%s1989_s1 + $0x108] sm:$0xff] }
  0x19   :  { %379 = vmatpush.bf16.msra.mxu3 %v1450_v23  ;;  %v1463_v10 = vld [vmem:[%s1989_s1 + $0x118] sm:$0xff]  ;;  %v1470_v15 = vld [vmem:[%s1989_s1 + $0x150] sm:$0xff]  ;;  %v1469_v19 = vld [vmem:[%s1989_s1 + $0x148] sm:$0xff] }
  0x1a   :  { %169 = vmatpush.bf16.msra.mxu0 %v1421_v24  ;;  %v1471_v11 = vld [vmem:[%s1989_s1 + $0x158] sm:$0xff]  ;;  %v1480_v20 = vld [vmem:[%s1989_s1 + $0x180] sm:$0xff]  ;;  %v1218_v36 = vld [vmem:[%s1990_s0 + $0x50] sm:$0xf] }
  0x1b   :  { %188 = vmatpush.bf16.msra.mxu1 %v1429_v25  ;;  %v1488_v21 = vld [vmem:[%s1989_s1 + $0x1c0] sm:$0xff]  ;;  %v1457_v25 = vld [vmem:[%s1990_s0 + $0x44] sm:$0xf0]  ;;  %v1459_v37 = vld [vmem:[%s1990_s0 + $0x54] sm:$0xf0] }
  0x1c   :  { %361 = vmatpush.bf16.msra.mxu2 %v1441_v26  ;;  %v1460_v22 = vld [vmem:[%s1989_s1 + $0x100] sm:$0xff]  ;;  %v1458_v38 = vld [vmem:[%s1990_s0 + $0x54] sm:$0xf]  ;;  %v1220_v39 = vld [vmem:[%s1990_s0 + $0x58] sm:$0xf0] }
  0x1d   :  { %380 = vmatpush.bf16.msra.mxu3 %v1449_v27  ;;  %v1468_v23 = vld [vmem:[%s1989_s1 + $0x140] sm:$0xff]  ;;  %v1212_v27 = vld [vmem:[%s1990_s0 + $0x48] sm:$0xf0] }
  0x1e   :  { %170 = vmatpush.bf16.msra.mxu0 %v1420_v28  ;;  %v1210_v24 = vld [vmem:[%s1990_s0 + $0x40] sm:$0xf]  ;;  %v1456_v26 = vld [vmem:[%s1990_s0 + $0x44] sm:$0xf] }
  0x1f   :  { %189 = vmatpush.bf16.msra.mxu1 %v1428_v29  ;;  %v1326_v28 = vld [vmem:[%s1990_s0 + $0x60] sm:$0xf]  ;;  %v1477_v29 = vld [vmem:[%s1990_s0 + $0x64] sm:$0xf0]  ;;  %v1211_v32 = vor.u32 %v1457_v25, %v1210_v24  ;;  %v1215_v33 = vor.u32 %v1456_v26, %v1212_v27 }
  0x20   :  { %362 = vmatpush.bf16.msra.mxu2 %v1440_v30  ;;  %v1476_v30 = vld [vmem:[%s1990_s0 + $0x64] sm:$0xf]  ;;  %v1327_v34 = vor.u32 %v1477_v29, %v1326_v28 }
  0x21   :  { %381 = vmatpush.bf16.msra.mxu3 %v1448_v31  ;;  %171 = vmatmul.bf16.vlgmr.msra.gmra.mxu0 %v979_v42  ;;  %v1328_v31 = vld [vmem:[%s1990_s0 + $0x68] sm:$0xf0]  ;;  %v1478_v42 = vld [vmem:[%s1990_s0 + $0x74] sm:$0xf] }
  0x22   :  { %190 = vmatmul.bf16.vlgmr.msra.gmra.mxu1 %v983_v43  ;;  %547 = vmatpush.bf16.msrb.mxu0 %v1467_v46  ;;  %v1331_v35 = vor.u32 %v1476_v30, %v1328_v31  ;;  %v1336_v43 = vld [vmem:[%s1990_s0 + $0x78] sm:$0xf0] }
  0x23   :  { %363 = vmatmul.bf16.vlgmr.msra.gmra.mxu2 %v1095_v44  ;;  %566 = vmatpush.bf16.msrb.mxu1 %v1475_v47  ;;  %v1219_v44 = vor.u32 %v1459_v37, %v1218_v36  ;;  %v1339_v47 = vor.u32 %v1478_v42, %v1336_v43 }
  0x24   :  { %739 = vmatpush.bf16.msrb.mxu2 %v1487_v40  ;;  %382 = vmatmul.bf16.vlgmr.msra.gmra.mxu3 %v1099_v45  ;;  %v1334_v40 = vld [vmem:[%s1990_s0 + $0x70] sm:$0xf]  ;;  %v1223_v45 = vor.u32 %v1458_v38, %v1220_v39 }
  0x25   :  { %758 = vmatpush.bf16.msrb.mxu3 %v1495_v41  ;;  %v1479_v41 = vld [vmem:[%s1990_s0 + $0x74] sm:$0xf0] }
  0x26   :  { %548 = vmatpush.bf16.msrb.mxu0 %v1466_v50  ;;  %v1335_v46 = vor.u32 %v1479_v41, %v1334_v40 }
  0x27   :  { %567 = vmatpush.bf16.msrb.mxu1 %v1474_v51 }
  0x28   :  { %740 = vmatpush.bf16.msrb.mxu2 %v1486_v48 }
  0x29   :  { %759 = vmatpush.bf16.msrb.mxu3 %v1494_v49 }
  0x2a   :  { %549 = vmatpush.bf16.msrb.mxu0 %v1465_v54 }
  0x2b   :  { %568 = vmatpush.bf16.msrb.mxu1 %v1473_v55 }
  0x2c   :  { %741 = vmatpush.bf16.msrb.mxu2 %v1485_v52 }
  0x2d   :  { %760 = vmatpush.bf16.msrb.mxu3 %v1493_v53 }
  0x2e   :  { %550 = vmatpush.bf16.msrb.mxu0 %v1464_v58 }
  0x2f   :  { %569 = vmatpush.bf16.msrb.mxu1 %v1472_v59 }
  0x30   :  { %742 = vmatpush.bf16.msrb.mxu2 %v1484_v56 }
  0x31   :  { %761 = vmatpush.bf16.msrb.mxu3 %v1492_v57  ;;  %176 = vmatmul.bf16.gmra.mxu0 %v987_v6 }
  0x32   :  { %195 = vmatmul.bf16.gmra.mxu1 %v991_v7  ;;  %551 = vmatpush.bf16.msrb.mxu0 %v1463_v10 }
  0x33   :  { %368 = vmatmul.bf16.gmra.mxu2 %v1103_v8  ;;  %570 = vmatpush.bf16.msrb.mxu1 %v1471_v11 }
  0x34   :  { %743 = vmatpush.bf16.msrb.mxu2 %v1483_v4  ;;  %387 = vmatmul.bf16.gmra.mxu3 %v1107_v9 }
  0x35   :  { %762 = vmatpush.bf16.msrb.mxu3 %v1491_v5 }
  0x36   :  { %552 = vmatpush.bf16.msrb.mxu0 %v1462_v14 }
  0x37   :  { %571 = vmatpush.bf16.msrb.mxu1 %v1470_v15 }
  0x38   :  { %744 = vmatpush.bf16.msrb.mxu2 %v1482_v12 }
  0x39   :  { %763 = vmatpush.bf16.msrb.mxu3 %v1490_v13 }
  0x3a   :  { %553 = vmatpush.bf16.msrb.mxu0 %v1461_v18 }
  0x3b   :  { %572 = vmatpush.bf16.msrb.mxu1 %v1469_v19 }
  0x3c   :  { %745 = vmatpush.bf16.msrb.mxu2 %v1481_v16 }
  0x3d   :  { %764 = vmatpush.bf16.msrb.mxu3 %v1489_v17 }
  0x3e   :  { %554 = vmatpush.bf16.msrb.mxu0 %v1460_v22 }
  0x3f   :  { %573 = vmatpush.bf16.msrb.mxu1 %v1468_v23 }
  0x40   :  { %746 = vmatpush.bf16.msrb.mxu2 %v1480_v20 }
  0x41   :  { %765 = vmatpush.bf16.msrb.mxu3 %v1488_v21  ;;  %555 = vmatmul.bf16.vlgmr.msrb.gmra.mxu0 %v1211_v32 }
  0x42   :  { %574 = vmatmul.bf16.vlgmr.msrb.gmra.mxu1 %v1215_v33 }
  0x43   :  { %747 = vmatmul.bf16.vlgmr.msrb.gmra.mxu2 %v1327_v34 }
  0x44   :  { %766 = vmatmul.bf16.vlgmr.msrb.gmra.mxu3 %v1331_v35 }
  0x51   :  { %560 = vmatmul.bf16.gmra.mxu0 %v1219_v44 }
  0x52   :  { %579 = vmatmul.bf16.gmra.mxu1 %v1223_v45 }
  0x53   :  { %752 = vmatmul.bf16.gmra.mxu2 %v1335_v46 }
  0x54   :  { %771 = vmatmul.bf16.gmra.mxu3 %v1339_v47 }
  0x9e   :  { %v172_v48 = vpop.f32.mrf.mxu0 }
  0x9f   :  { %v191_v49 = vpop.f32.mrf.mxu1 }
  0xa0   :  { %v192_v15 = vadd.f32 %v191_v49, %v172_v48 }
  0xa6   :  { %v364_v50 = vpop.f32.mrf.mxu2  ;;  %v174_v52 = vpop.f32.mrf.mxu0 }
  0xa7   :  { %v383_v51 = vpop.f32.mrf.mxu3  ;;  %v193_v53 = vpop.f32.mrf.mxu1 }
  0xa8   :  { %v384_v11 = vadd.f32 %v383_v51, %v364_v50  ;;  %v194_v12 = vadd.f32 %v193_v53, %v174_v52 }
  0xaa   :  { %v777_v21 = vadd.f32 %v384_v11, %v192_v15 }
  0xae   :  { %v366_v54 = vpop.f32.mrf.mxu2  ;;  %v177_v56 = vpop.f32.mrf.mxu0 }
  0xaf   :  { %v385_v55 = vpop.f32.mrf.mxu3  ;;  %v196_v57 = vpop.f32.mrf.mxu1 }
  0xb0   :  { %v386_v10 = vadd.f32 %v385_v55, %v366_v54  ;;  %v197_v16 = vadd.f32 %v196_v57, %v177_v56 }
  0xb2   :  { %v778_v17 = vadd.f32 %v386_v10, %v194_v12 }
  0xb6   :  { %v369_v58 = vpop.f32.mrf.mxu2  ;;  %v179_v60 = vpop.f32.mrf.mxu0 }
  0xb7   :  { %v388_v59 = vpop.f32.mrf.mxu3  ;;  %v198_v61 = vpop.f32.mrf.mxu1 }
  0xb8   :  { %v389_v13 = vadd.f32 %v388_v59, %v369_v58  ;;  %v199_v34 = vadd.f32 %v198_v61, %v179_v60 }
  0xba   :  { %v779_v24 = vadd.f32 %v389_v13, %v197_v16 }
  0xbe   :  { %v371_v62 = vpop.f32.mrf.mxu2  ;;  %v556_v0 = vpop.f32.mrf.mxu0 }
  0xbf   :  { %v390_v63 = vpop.f32.mrf.mxu3  ;;  %v575_v1 = vpop.f32.mrf.mxu1 }
  0xc0   :  { %v1803_v18 = vadd.f32 %v575_v1, %v556_v0  ;;  %v391_v30 = vadd.f32 %v390_v63, %v371_v62 }
  0xc2   :  { %v781_v31 = vadd.f32 %v777_v21, %v1803_v18  ;;  %v780_v38 = vadd.f32 %v391_v30, %v199_v34 }
  0xc6   :  { %v748_v2 = vpop.f32.mrf.mxu2  ;;  %v558_v4 = vpop.f32.mrf.mxu0 }
  0xc7   :  { %v767_v3 = vpop.f32.mrf.mxu3  ;;  %v577_v5 = vpop.f32.mrf.mxu1 }
  0xc8   :  { %v1801_v14 = vadd.f32 %v577_v5, %v558_v4  ;;  %v1809_v25 = vadd.f32 %v767_v3, %v748_v2 }
  0xca   :  { %v782_v26 = vadd.f32 %v778_v17, %v1801_v14  ;;  %v785_v35 = vadd.f32 %v781_v31, %v1809_v25 }
  0xcc   :  { %v790_v42 = vsel %vm789_vm0, %v785_v35, 0.0 }
  0xce   :  { %v750_v6 = vpop.f32.mrf.mxu2  ;;  %v561_v8 = vpop.f32.mrf.mxu0 }
  0xcf   :  { %v769_v7 = vpop.f32.mrf.mxu3  ;;  %v580_v9 = vpop.f32.mrf.mxu1 }
  0xd0   :  { %v1805_v19 = vadd.f32 %v769_v7, %v750_v6  ;;  %v1807_v20 = vadd.f32 %v580_v9, %v561_v8 }
  0xd2   :  { %v786_v32 = vadd.f32 %v782_v26, %v1805_v19  ;;  %v783_v33 = vadd.f32 %v779_v24, %v1807_v20 }
  0xd4   :  { %v791_v39 = vsel %vm789_vm0, %v786_v32, 0.0 }
  0xd5   :  { %v792_v46 = vadd.f32 %v791_v39, %v790_v42 }
  0xd6   :  { %v753_v22 = vpop.f32.mrf.mxu2  ;;  %v563_v28 = vpop.f32.mrf.mxu0 }
  0xd7   :  { %v772_v23 = vpop.f32.mrf.mxu3  ;;  %v582_v29 = vpop.f32.mrf.mxu1 }
  0xd8   :  { %v1812_v27 = vadd.f32 %v772_v23, %v753_v22  ;;  %v583_v37 = vadd.f32 %v582_v29, %v563_v28 }
  0xda   :  { %v787_v36 = vadd.f32 %v783_v33, %v1812_v27  ;;  %v784_v44 = vadd.f32 %v780_v38, %v583_v37 }
  0xdc   :  { %v793_v43 = vsel %vm789_vm0, %v787_v36, 0.0 }
  0xdd   :  { %v794_v48 = vadd.f32 %v793_v43, %v792_v46 }
  0xde   :  { %v755_v40 = vpop.f32.mrf.mxu2 }
  0xdf   :  { %v774_v41 = vpop.f32.mrf.mxu3 }
  0xe0   :  { %v775_v45 = vadd.f32 %v774_v41, %v755_v40 }
  0xe2   :  { %v788_v47 = vadd.f32 %v784_v44, %v775_v45 }
  0xe4   :  { %v795_v49 = vsel %vm789_vm0, %v788_v47, 0.0 }
  0xe5   :  { %v796_v50 = vadd.f32 %v795_v49, %v794_v48 }
  0xe7   :  { %v797_v51 = vrot.slane %v796_v50, 4 }
  0xe9   :  { %v798_v52 = vadd.f32 %v797_v51, %v796_v50 }
  0xeb   :  { %v799_v53 = vrot.slane %v798_v52, 2 }
  0xed   :  { %v800_v54 = vadd.f32 %v799_v53, %v798_v52 }
  0xef   :  { %v801_v55 = vrot.slane %v800_v54, 1 }
  0xf1   :  { %v802_v56 = vadd.f32 %v801_v55, %v800_v54 }
  0xf3   :  { %v803_v57 = vmul.f32 0.0078125, %v802_v56 }
  0xf5   :  { %v1823_v58 = vsub.f32 %v192_v15, %v803_v57  ;;  %v1825_v59 = vsub.f32 %v194_v12, %v803_v57  ;;  %v1827_v60 = vsub.f32 %v197_v16, %v803_v57  ;;  %v1829_v61 = vsub.f32 %v199_v34, %v803_v57 }
  0xf6   :  { %v1831_v62 = vsub.f32 %v384_v11, %v803_v57  ;;  %v1833_v63 = vsub.f32 %v386_v10, %v803_v57  ;;  %v1835_v0 = vsub.f32 %v389_v13, %v803_v57  ;;  %v1837_v1 = vsub.f32 %v391_v30, %v803_v57 }
  0xf7   :  { %v808_v2 = vmul.f32 %v1823_v58, %v1823_v58  ;;  %v809_v3 = vmul.f32 %v1825_v59, %v1825_v59  ;;  %v810_v4 = vmul.f32 %v1827_v60, %v1827_v60  ;;  %v811_v5 = vmul.f32 %v1829_v61, %v1829_v61 }
  0xf8   :  { %v830_v6 = vmul.f32 %v1831_v62, %v1831_v62  ;;  %v831_v7 = vmul.f32 %v1833_v63, %v1833_v63  ;;  %v832_v8 = vmul.f32 %v1835_v0, %v1835_v0  ;;  %v833_v9 = vmul.f32 %v1837_v1, %v1837_v1 }
  0xf9   :  { %v812_v10 = vsel %vm789_vm0, %v808_v2, 0.0  ;;  %v813_v11 = vsel %vm789_vm0, %v809_v3, 0.0  ;;  %v815_v12 = vsel %vm789_vm0, %v810_v4, 0.0  ;;  %v817_v13 = vsel %vm789_vm0, %v811_v5, 0.0 }
  0xfa   :  { %v814_v15 = vadd.f32 %v813_v11, %v812_v10  ;;  %v834_v16 = vsel %vm789_vm0, %v830_v6, 0.0  ;;  %v835_v17 = vsel %vm789_vm0, %v831_v7, 0.0  ;;  %v837_v21 = vsel %vm789_vm0, %v832_v8, 0.0 }
  0xfb   :  { %v836_v22 = vadd.f32 %v835_v17, %v834_v16  ;;  %v839_v23 = vsel %vm789_vm0, %v833_v9, 0.0  ;;  %v1864_v24 = vsub.f32 %v1803_v18, %v803_v57  ;;  %v1867_v26 = vsub.f32 %v1801_v14, %v803_v57 }
  0xfc   :  { %v816_v28 = vadd.f32 %v815_v12, %v814_v15  ;;  %v1870_v29 = vsub.f32 %v1807_v20, %v803_v57  ;;  %v1872_v30 = vsub.f32 %v583_v37, %v803_v57  ;;  %v1875_v31 = vsub.f32 %v1809_v25, %v803_v57 }
  0xfd   :  { %v838_v32 = vadd.f32 %v837_v21, %v836_v22  ;;  %v852_v33 = vmul.f32 %v1864_v24, %v1864_v24  ;;  %v853_v18 = vmul.f32 %v1867_v26, %v1867_v26  ;;  %v1882_v34 = vsub.f32 %v1805_v19, %v803_v57 }
  0xfe   :  { %v818_v14 = vadd.f32 %v817_v13, %v816_v28  ;;  %v854_v20 = vmul.f32 %v1870_v29, %v1870_v29  ;;  %v855_v35 = vmul.f32 %v1872_v30, %v1872_v30  ;;  %v1889_v25 = vsub.f32 %v1812_v27, %v803_v57 }
  0xff   :  { %v840_v36 = vadd.f32 %v839_v23, %v838_v32  ;;  %v856_v37 = vsel %vm789_vm0, %v852_v33, 0.0  ;;  %v857_v38 = vsel %vm789_vm0, %v853_v18, 0.0  ;;  %v1893_v39 = vsub.f32 %v775_v45, %v803_v57 }
 0x100   :  { %v819_v40 = vrot.slane %v818_v14, 4  ;;  %v858_v19 = vadd.f32 %v857_v38, %v856_v37  ;;  %v859_v41 = vsel %vm789_vm0, %v854_v20, 0.0  ;;  %v874_v43 = vmul.f32 %v1875_v31, %v1875_v31 }
 0x101   :  { %v841_v42 = vrot.slane %v840_v36, 4  ;;  %v875_v44 = vmul.f32 %v1882_v34, %v1882_v34  ;;  %v876_v27 = vmul.f32 %v1889_v25, %v1889_v25  ;;  %v861_v48 = vsel %vm789_vm0, %v855_v35, 0.0 }
 0x102   :  { %v820_v46 = vadd.f32 %v819_v40, %v818_v14  ;;  %v860_v47 = vadd.f32 %v859_v41, %v858_v19  ;;  %v877_v49 = vmul.f32 %v1893_v39, %v1893_v39  ;;  %v878_v50 = vsel %vm789_vm0, %v874_v43, 0.0 }
 0x103   :  { %v842_v45 = vadd.f32 %v841_v42, %v840_v36  ;;  %v879_v51 = vsel %vm789_vm0, %v875_v44, 0.0  ;;  %v881_v56 = vsel %vm789_vm0, %v876_v27, 0.0 }
 0x104   :  { %v821_v52 = vrot.slane %v820_v46, 2  ;;  %v862_v53 = vadd.f32 %v861_v48, %v860_v47  ;;  %v880_v54 = vadd.f32 %v879_v51, %v878_v50  ;;  %v883_v5 = vsel %vm789_vm0, %v877_v49, 0.0 }
 0x105   :  { %v843_v55 = vrot.slane %v842_v45, 2 }
 0x106   :  { %v822_v57 = vadd.f32 %v821_v52, %v820_v46  ;;  %v863_v2 = vrot.slane %v862_v53, 4  ;;  %v882_v3 = vadd.f32 %v881_v56, %v880_v54 }
 0x107   :  { %v844_v4 = vadd.f32 %v843_v55, %v842_v45 }
 0x108   :  { %v823_v6 = vrot.slane %v822_v57, 1  ;;  %v864_v7 = vadd.f32 %v863_v2, %v862_v53  ;;  %v884_v8 = vadd.f32 %v883_v5, %v882_v3 }
 0x109   :  { %v845_v9 = vrot.slane %v844_v4, 1 }
 0x10a   :  { %v824_v10 = vadd.f32 %v823_v6, %v822_v57  ;;  %v865_v11 = vrot.slane %v864_v7, 2  ;;  %v885_v12 = vrot.slane %v884_v8, 4 }
 0x10b   :  { %v846_v13 = vadd.f32 %v845_v9, %v844_v4 }
 0x10c   :  { %v866_v15 = vadd.f32 %v865_v11, %v864_v7  ;;  %v886_v16 = vadd.f32 %v885_v12, %v884_v8 }
 0x10d   :  { %v847_v17 = vadd.f32 %v846_v13, %v824_v10 }
 0x10e   :  { %v867_v21 = vrot.slane %v866_v15, 1  ;;  %v887_v22 = vrot.slane %v886_v16, 2 }
 0x110   :  { %v868_v23 = vadd.f32 %v867_v21, %v866_v15  ;;  %v888_v28 = vadd.f32 %v887_v22, %v886_v16 }
 0x112   :  { %v869_v32 = vadd.f32 %v868_v23, %v847_v17  ;;  %v889_v33 = vrot.slane %v888_v28, 1 }
 0x114   :  { %v890_v18 = vadd.f32 %v889_v33, %v888_v28 }
 0x116   :  { %v891_v14 = vadd.f32 %v890_v18, %v869_v32 }
 0x118   :  { %v892_v20 = vmul.f32 0.0078125, %v891_v14 }
 0x11a   :  { %v893_v35 = vadd.f32 1e-05, %v892_v20 }
 0x11c   :  { %1496 = vrsqrt.f32 %v893_v35  ;;  %vm900_vm2 = vweird.f32 %v893_v35 }
 0x122   :  { %v1497_v36 = vpop.eup %1496 }
 0x123   :  { %v895_v37 = vmul.f32 %v1497_v36, %v893_v35  ;;  %vm901_vm1 = vweird.f32 %v1497_v36 }
 0x124   :  { %vm902_vm3 = vmor %vm900_vm2, %vm901_vm1 }
 0x125   :  { %v896_v38 = vmul.f32 %v1497_v36, %v895_v37 }
 0x127   :  { %v897_v40 = vmul.f32 0.5, %v896_v38 }
 0x129   :  { %v898_v19 = vsub.f32 1.5, %v897_v40 }
 0x12b   :  { %v899_v41 = vmul.f32 %v1497_v36, %v898_v19 }
 0x12d   :  { %v903_v42 = vsel %vm902_vm3, %v1497_v36, %v899_v41 }
 0x12e   :  { %v904_v43 = vmul.f32 %v903_v42, %v1823_v58  ;;  %v905_v44 = vmul.f32 %v903_v42, %v1825_v59  ;;  %v906_v27 = vmul.f32 %v903_v42, %v1827_v60  ;;  %v907_v46 = vmul.f32 %v903_v42, %v1829_v61 }
 0x12f   :  { %v921_v47 = vmul.f32 %v903_v42, %v1831_v62  ;;  %v922_v48 = vmul.f32 %v903_v42, %v1833_v63  ;;  %v923_v45 = vmul.f32 %v903_v42, %v1835_v0  ;;  %v924_v49 = vmul.f32 %v903_v42, %v1837_v1 }
 0x130   :  { %v908_v50 = vmax.f32 %v904_v43, 0.0  ;;  %v909_v51 = vmax.f32 %v905_v44, 0.0  ;;  %v910_v52 = vmax.f32 %v906_v27, 0.0  ;;  %v911_v53 = vmax.f32 %v907_v46, 0.0 }
 0x131   :  { %v925_v58 = vmax.f32 %v921_v47, 0.0  ;;  %v926_v54 = vmax.f32 %v922_v48, 0.0  ;;  %v927_v59 = vmax.f32 %v923_v45, 0.0  ;;  %v928_v57 = vmax.f32 %v924_v49, 0.0 }
 0x132   :  { %v912_v55 = vpack.c.bf16 %v908_v50, %v908_v50  ;;  %v913_v60 = vpack.c.bf16 %v909_v51, %v909_v51  ;;  %v914_v56 = vpack.c.bf16 %v910_v52, %v910_v52  ;;  %v915_v61 = vpack.c.bf16 %v911_v53, %v911_v53 }
 0x133   :  { %v929_v62 = vpack.c.bf16 %v925_v58, %v925_v58  ;;  %v938_v63 = vmul.f32 %v903_v42, %v1864_v24  ;;  %v939_v0 = vmul.f32 %v903_v42, %v1867_v26  ;;  %v940_v1 = vmul.f32 %v903_v42, %v1870_v29 }
 0x134   :  { %917 = vst.msk [vmem:[%s1991_s2] sm:$0xf] %vm916_vm4, %v912_v55  ;;  %v941_v2 = vmul.f32 %v903_v42, %v1872_v30  ;;  %v930_v3 = vpack.c.bf16 %v926_v54, %v926_v54  ;;  %v931_v4 = vpack.c.bf16 %v927_v59, %v927_v59  ;;  %v955_v5 = vmul.f32 %v903_v42, %v1875_v31 }
 0x135   :  { %918 = vst.msk [vmem:[%s1991_s2 + $0x4] sm:$0xf] %vm916_vm4, %v913_v60  ;;  %v956_v6 = vmul.f32 %v903_v42, %v1882_v34  ;;  %v942_v24 = vmax.f32 %v938_v63, 0.0  ;;  %v943_v26 = vmax.f32 %v939_v0, 0.0  ;;  %v944_v29 = vmax.f32 %v940_v1, 0.0 }
 0x136   :  { %919 = vst.msk [vmem:[%s1991_s2 + $0x8] sm:$0xf] %vm916_vm4, %v914_v56  ;;  %v957_v30 = vmul.f32 %v903_v42, %v1889_v25  ;;  %v932_v7 = vpack.c.bf16 %v928_v57, %v928_v57  ;;  %v945_v8 = vmax.f32 %v941_v2, 0.0  ;;  %v958_v31 = vmul.f32 %v903_v42, %v1893_v39 }
 0x137   :  { %920 = vst.msk [vmem:[%s1991_s2 + $0xc] sm:$0xf] %vm916_vm4, %v915_v61  ;;  %v946_v34 = vpack.c.bf16 %v942_v24, %v942_v24  ;;  %v959_v9 = vmax.f32 %v955_v5, 0.0  ;;  %v947_v25 = vpack.c.bf16 %v943_v26, %v943_v26  ;;  %v960_v10 = vmax.f32 %v956_v6, 0.0 }
 0x138   :  { %1404 = vst.msk [vmem:[%s1991_s2 + $0x10] sm:$0xf] %vm916_vm4, %v929_v62  ;;  %v948_v39 = vpack.c.bf16 %v944_v29, %v944_v29  ;;  %v961_v11 = vmax.f32 %v957_v30, 0.0  ;;  %v949_v12 = vpack.c.bf16 %v945_v8, %v945_v8  ;;  %v962_v13 = vmax.f32 %v958_v31, 0.0 }
 0x139   :  { %1405 = vst.msk [vmem:[%s1991_s2 + $0x14] sm:$0xf] %vm916_vm4, %v930_v3  ;;  %v963_v15 = vpack.c.bf16 %v959_v9, %v959_v9  ;;  %v964_v16 = vpack.c.bf16 %v960_v10, %v960_v10 }
 0x13a   :  { %1406 = vst.msk [vmem:[%s1991_s2 + $0x18] sm:$0xf] %vm916_vm4, %v931_v4  ;;  %v965_v17 = vpack.c.bf16 %v961_v11, %v961_v11  ;;  %v966_v21 = vpack.c.bf16 %v962_v13, %v962_v13 }
 0x13b   :  { %1407 = vst.msk [vmem:[%s1991_s2 + $0x1c] sm:$0xf] %vm916_vm4, %v932_v7 }
 0x13c   :  { %1408 = vst.msk [vmem:[%s1991_s2 + $0x20] sm:$0xf] %vm916_vm4, %v946_v34 }
 0x13d   :  { %1409 = vst.msk [vmem:[%s1991_s2 + $0x24] sm:$0xf] %vm916_vm4, %v947_v25 }
 0x13e   :  { %1410 = vst.msk [vmem:[%s1991_s2 + $0x28] sm:$0xf] %vm916_vm4, %v948_v39 }
 0x13f   :  { %1411 = vst.msk [vmem:[%s1991_s2 + $0x2c] sm:$0xf] %vm916_vm4, %v949_v12 }
 0x140   :  { %1412 = vst.msk [vmem:[%s1991_s2 + $0x30] sm:$0xf] %vm916_vm4, %v963_v15 }
 0x141   :  { %1413 = vst.msk [vmem:[%s1991_s2 + $0x34] sm:$0xf] %vm916_vm4, %v964_v16 }
 0x142   :  { %1414 = vst.msk [vmem:[%s1991_s2 + $0x38] sm:$0xf] %vm916_vm4, %v965_v17 }
 0x143   :  { %1415 = vst.msk [vmem:[%s1991_s2 + $0x3c] sm:$0xf] %vm916_vm4, %v966_v21 }

// kernel: presgan_forward.6
= control target key start
LH: loop header
LB: loop body
LE: loop exit
PB: predicated region body
PF: predicated region fallthrough
CT: control target
= control target key end

     0   :  { %vm773_vm0 = vcmask 130048   ;;  %vm1152_vm4 = vcmask 125952   ;;  %s3094_s1 = inlined_call_operand.vmem [shape: bf16[4,128,16], index: 1, kind: input, shape index: {}]   ;;  %s3095_s0 = inlined_call_operand.vmem [shape: bf16[4,128,128], index: 0, kind: input, shape index: {}]   ;;  %s3096_s2 = inlined_call_operand.vmem [shape: bf16[4,128,16], index: 2, kind: output, shape index: {}]  }
   0x1   :  { %v1783_v0 = vld [vmem:[%s3094_s1 + $0x38] sm:$0xff]  ;;  %v1782_v4 = vld [vmem:[%s3094_s1 + $0x30] sm:$0xff]  ;;  %v1781_v8 = vld [vmem:[%s3094_s1 + $0x28] sm:$0xff] }
   0x2   :  { %v1799_v1 = vld [vmem:[%s3094_s1 + $0x78] sm:$0xff]  ;;  %139 = vmatpush.bf16.msra.mxu0 %v1783_v0  ;;  %v1798_v5 = vld [vmem:[%s3094_s1 + $0x70] sm:$0xff]  ;;  %v1797_v9 = vld [vmem:[%s3094_s1 + $0x68] sm:$0xff] }
   0x3   :  { %v1815_v2 = vld [vmem:[%s3094_s1 + $0xb8] sm:$0xff]  ;;  %318 = vmatpush.bf16.msra.mxu1 %v1799_v1  ;;  %v1814_v6 = vld [vmem:[%s3094_s1 + $0xb0] sm:$0xff]  ;;  %v1813_v10 = vld [vmem:[%s3094_s1 + $0xa8] sm:$0xff] }
   0x4   :  { %v1831_v3 = vld [vmem:[%s3094_s1 + $0xf8] sm:$0xff]  ;;  %497 = vmatpush.bf16.msra.mxu2 %v1815_v2  ;;  %v1830_v7 = vld [vmem:[%s3094_s1 + $0xf0] sm:$0xff]  ;;  %v1829_v11 = vld [vmem:[%s3094_s1 + $0xe8] sm:$0xff] }
   0x5   :  { %676 = vmatpush.bf16.msra.mxu3 %v1831_v3  ;;  %v1780_v12 = vld [vmem:[%s3094_s1 + $0x20] sm:$0xff]  ;;  %v1779_v16 = vld [vmem:[%s3094_s1 + $0x18] sm:$0xff]  ;;  %v1778_v20 = vld [vmem:[%s3094_s1 + $0x10] sm:$0xff] }
   0x6   :  { %140 = vmatpush.bf16.msra.mxu0 %v1782_v4  ;;  %v1796_v13 = vld [vmem:[%s3094_s1 + $0x60] sm:$0xff]  ;;  %v1795_v17 = vld [vmem:[%s3094_s1 + $0x58] sm:$0xff]  ;;  %v1794_v21 = vld [vmem:[%s3094_s1 + $0x50] sm:$0xff] }
   0x7   :  { %319 = vmatpush.bf16.msra.mxu1 %v1798_v5  ;;  %v1812_v14 = vld [vmem:[%s3094_s1 + $0xa0] sm:$0xff]  ;;  %v1811_v18 = vld [vmem:[%s3094_s1 + $0x98] sm:$0xff]  ;;  %v1810_v22 = vld [vmem:[%s3094_s1 + $0x90] sm:$0xff] }
   0x8   :  { %498 = vmatpush.bf16.msra.mxu2 %v1814_v6  ;;  %v1828_v15 = vld [vmem:[%s3094_s1 + $0xe0] sm:$0xff]  ;;  %v1827_v19 = vld [vmem:[%s3094_s1 + $0xd8] sm:$0xff]  ;;  %v1826_v23 = vld [vmem:[%s3094_s1 + $0xd0] sm:$0xff] }
   0x9   :  { %677 = vmatpush.bf16.msra.mxu3 %v1830_v7  ;;  %v1777_v24 = vld [vmem:[%s3094_s1 + $0x8] sm:$0xff]  ;;  %v1776_v28 = vld [vmem:[%s3094_s1] sm:$0xff]  ;;  %v1770_v40 = vld [vmem:[%s3095_s0 + $0x10] sm:$0xff] }
   0xa   :  { %141 = vmatpush.bf16.msra.mxu0 %v1781_v8  ;;  %v1793_v25 = vld [vmem:[%s3094_s1 + $0x48] sm:$0xff]  ;;  %v1792_v29 = vld [vmem:[%s3094_s1 + $0x40] sm:$0xff]  ;;  %v1786_v41 = vld [vmem:[%s3095_s0 + $0x50] sm:$0xff] }
   0xb   :  { %320 = vmatpush.bf16.msra.mxu1 %v1797_v9  ;;  %v1809_v26 = vld [vmem:[%s3094_s1 + $0x88] sm:$0xff]  ;;  %v1808_v30 = vld [vmem:[%s3094_s1 + $0x80] sm:$0xff]  ;;  %v1802_v42 = vld [vmem:[%s3095_s0 + $0x90] sm:$0xff] }
   0xc   :  { %499 = vmatpush.bf16.msra.mxu2 %v1813_v10  ;;  %v1825_v27 = vld [vmem:[%s3094_s1 + $0xc8] sm:$0xff]  ;;  %v1824_v31 = vld [vmem:[%s3094_s1 + $0xc0] sm:$0xff]  ;;  %v1818_v43 = vld [vmem:[%s3095_s0 + $0xd0] sm:$0xff] }
   0xd   :  { %678 = vmatpush.bf16.msra.mxu3 %v1829_v11  ;;  %v1768_v32 = vld [vmem:[%s3095_s0] sm:$0xff]  ;;  %v1769_v36 = vld [vmem:[%s3095_s0 + $0x8] sm:$0xff]  ;;  %v1771_v44 = vld [vmem:[%s3095_s0 + $0x18] sm:$0xff] }
   0xe   :  { %142 = vmatpush.bf16.msra.mxu0 %v1780_v12  ;;  %v1784_v33 = vld [vmem:[%s3095_s0 + $0x40] sm:$0xff]  ;;  %v1785_v37 = vld [vmem:[%s3095_s0 + $0x48] sm:$0xff]  ;;  %v1787_v45 = vld [vmem:[%s3095_s0 + $0x58] sm:$0xff] }
   0xf   :  { %321 = vmatpush.bf16.msra.mxu1 %v1796_v13  ;;  %v1800_v34 = vld [vmem:[%s3095_s0 + $0x80] sm:$0xff]  ;;  %v1801_v38 = vld [vmem:[%s3095_s0 + $0x88] sm:$0xff]  ;;  %v1803_v46 = vld [vmem:[%s3095_s0 + $0x98] sm:$0xff] }
  0x10   :  { %500 = vmatpush.bf16.msra.mxu2 %v1812_v14  ;;  %v1816_v35 = vld [vmem:[%s3095_s0 + $0xc0] sm:$0xff]  ;;  %v1817_v39 = vld [vmem:[%s3095_s0 + $0xc8] sm:$0xff]  ;;  %v1819_v47 = vld [vmem:[%s3095_s0 + $0xd8] sm:$0xff] }
  0x11   :  { %679 = vmatpush.bf16.msra.mxu3 %v1828_v15  ;;  %v1772_v48 = vld [vmem:[%s3095_s0 + $0x20] sm:$0xff]  ;;  %v1773_v52 = vld [vmem:[%s3095_s0 + $0x28] sm:$0xff]  ;;  %v1774_v56 = vld [vmem:[%s3095_s0 + $0x30] sm:$0xff] }
  0x12   :  { %143 = vmatpush.bf16.msra.mxu0 %v1779_v16  ;;  %v1788_v49 = vld [vmem:[%s3095_s0 + $0x60] sm:$0xff]  ;;  %v1789_v53 = vld [vmem:[%s3095_s0 + $0x68] sm:$0xff]  ;;  %v1790_v57 = vld [vmem:[%s3095_s0 + $0x70] sm:$0xff] }
  0x13   :  { %322 = vmatpush.bf16.msra.mxu1 %v1795_v17  ;;  %v1804_v50 = vld [vmem:[%s3095_s0 + $0xa0] sm:$0xff]  ;;  %v1805_v54 = vld [vmem:[%s3095_s0 + $0xa8] sm:$0xff]  ;;  %v1806_v58 = vld [vmem:[%s3095_s0 + $0xb0] sm:$0xff] }
  0x14   :  { %501 = vmatpush.bf16.msra.mxu2 %v1811_v18  ;;  %v1820_v51 = vld [vmem:[%s3095_s0 + $0xe0] sm:$0xff]  ;;  %v1821_v55 = vld [vmem:[%s3095_s0 + $0xe8] sm:$0xff]  ;;  %v1822_v59 = vld [vmem:[%s3095_s0 + $0xf0] sm:$0xff] }
  0x15   :  { %680 = vmatpush.bf16.msra.mxu3 %v1827_v19  ;;  %v1775_v60 = vld [vmem:[%s3095_s0 + $0x38] sm:$0xff] }
  0x16   :  { %144 = vmatpush.bf16.msra.mxu0 %v1778_v20  ;;  %v1791_v61 = vld [vmem:[%s3095_s0 + $0x78] sm:$0xff] }
  0x17   :  { %323 = vmatpush.bf16.msra.mxu1 %v1794_v21  ;;  %v1807_v62 = vld [vmem:[%s3095_s0 + $0xb8] sm:$0xff] }
  0x18   :  { %502 = vmatpush.bf16.msra.mxu2 %v1810_v22  ;;  %v1823_v63 = vld [vmem:[%s3095_s0 + $0xf8] sm:$0xff] }
  0x19   :  { %681 = vmatpush.bf16.msra.mxu3 %v1826_v23 }
  0x1a   :  { %145 = vmatpush.bf16.msra.mxu0 %v1777_v24 }
  0x1b   :  { %324 = vmatpush.bf16.msra.mxu1 %v1793_v25 }
  0x1c   :  { %503 = vmatpush.bf16.msra.mxu2 %v1809_v26 }
  0x1d   :  { %682 = vmatpush.bf16.msra.mxu3 %v1825_v27 }
  0x1e   :  { %146 = vmatpush.bf16.msra.mxu0 %v1776_v28 }
  0x1f   :  { %325 = vmatpush.bf16.msra.mxu1 %v1792_v29 }
  0x20   :  { %504 = vmatpush.bf16.msra.mxu2 %v1808_v30 }
  0x21   :  { %683 = vmatpush.bf16.msra.mxu3 %v1824_v31  ;;  %147 = vmatmul.bf16.vlgmr.msra.gmra.mxu0 %v1768_v32 }
  0x22   :  { %326 = vmatmul.bf16.vlgmr.msra.gmra.mxu1 %v1784_v33 }
  0x23   :  { %505 = vmatmul.bf16.vlgmr.msra.gmra.mxu2 %v1800_v34 }
  0x24   :  { %684 = vmatmul.bf16.vlgmr.msra.gmra.mxu3 %v1816_v35 }
  0x31   :  { %152 = vmatmul.bf16.gmra.mxu0 %v1769_v36 }
  0x32   :  { %331 = vmatmul.bf16.gmra.mxu1 %v1785_v37 }
  0x33   :  { %510 = vmatmul.bf16.gmra.mxu2 %v1801_v38 }
  0x34   :  { %689 = vmatmul.bf16.gmra.mxu3 %v1817_v39 }
  0x41   :  { %157 = vmatmul.bf16.gmra.mxu0 %v1770_v40 }
  0x42   :  { %336 = vmatmul.bf16.gmra.mxu1 %v1786_v41 }
  0x43   :  { %515 = vmatmul.bf16.gmra.mxu2 %v1802_v42 }
  0x44   :  { %694 = vmatmul.bf16.gmra.mxu3 %v1818_v43 }
  0x51   :  { %162 = vmatmul.bf16.gmra.mxu0 %v1771_v44 }
  0x52   :  { %341 = vmatmul.bf16.gmra.mxu1 %v1787_v45 }
  0x53   :  { %520 = vmatmul.bf16.gmra.mxu2 %v1803_v46 }
  0x54   :  { %699 = vmatmul.bf16.gmra.mxu3 %v1819_v47 }
  0x61   :  { %167 = vmatmul.bf16.gmra.mxu0 %v1772_v48 }
  0x62   :  { %346 = vmatmul.bf16.gmra.mxu1 %v1788_v49 }
  0x63   :  { %525 = vmatmul.bf16.gmra.mxu2 %v1804_v50 }
  0x64   :  { %704 = vmatmul.bf16.gmra.mxu3 %v1820_v51 }
  0x71   :  { %172 = vmatmul.bf16.gmra.mxu0 %v1773_v52 }
  0x72   :  { %351 = vmatmul.bf16.gmra.mxu1 %v1789_v53 }
  0x73   :  { %530 = vmatmul.bf16.gmra.mxu2 %v1805_v54 }
  0x74   :  { %709 = vmatmul.bf16.gmra.mxu3 %v1821_v55 }
  0x81   :  { %177 = vmatmul.bf16.gmra.mxu0 %v1774_v56 }
  0x82   :  { %356 = vmatmul.bf16.gmra.mxu1 %v1790_v57 }
  0x83   :  { %535 = vmatmul.bf16.gmra.mxu2 %v1806_v58 }
  0x84   :  { %714 = vmatmul.bf16.gmra.mxu3 %v1822_v59 }
  0x91   :  { %182 = vmatmul.bf16.gmra.mxu0 %v1775_v60 }
  0x92   :  { %361 = vmatmul.bf16.gmra.mxu1 %v1791_v61 }
  0x93   :  { %540 = vmatmul.bf16.gmra.mxu2 %v1807_v62 }
  0x94   :  { %719 = vmatmul.bf16.gmra.mxu3 %v1823_v63 }
  0x9e   :  { %v2041_v0 = vpop.f32.mrf.mxu0 }
  0x9f   :  { %v2043_v1 = vpop.f32.mrf.mxu1 }
  0xa0   :  { %v725_v46 = vadd.f32 %v2043_v1, %v2041_v0 }
  0xa6   :  { %v2045_v2 = vpop.f32.mrf.mxu2  ;;  %v2049_v4 = vpop.f32.mrf.mxu0 }
  0xa7   :  { %v2047_v3 = vpop.f32.mrf.mxu3  ;;  %v2051_v5 = vpop.f32.mrf.mxu1  ;;  %v741_v50 = vadd.f32 %v725_v46, %v2045_v2 }
  0xa8   :  { %3143 = vst [vmem:[#allocation2_spill] sm:$0xff] %v2047_v3  ;;  %v726_v47 = vadd.f32 %v2051_v5, %v2049_v4 }
  0xa9   :  { %v757_v60 = vadd.f32 %v741_v50, %v2047_v3 }
  0xae   :  { %v2053_v6 = vpop.f32.mrf.mxu2  ;;  %v2057_v8 = vpop.f32.mrf.mxu0 }
  0xaf   :  { %v2055_v7 = vpop.f32.mrf.mxu3  ;;  %v2059_v9 = vpop.f32.mrf.mxu1  ;;  %v742_v49 = vadd.f32 %v726_v47, %v2053_v6 }
  0xb0   :  { %3144 = vst [vmem:[#allocation3_spill] sm:$0xff] %v2055_v7  ;;  %v727_v48 = vadd.f32 %v2059_v9, %v2057_v8 }
  0xb1   :  { %v758_v58 = vadd.f32 %v742_v49, %v2055_v7 }
  0xb3   :  { %v775_v47 = vsel %vm773_vm0, %v758_v58, 0.0 }
  0xb6   :  { %v2061_v10 = vpop.f32.mrf.mxu2  ;;  %v2065_v12 = vpop.f32.mrf.mxu0 }
  0xb7   :  { %v2063_v11 = vpop.f32.mrf.mxu3  ;;  %v2067_v13 = vpop.f32.mrf.mxu1  ;;  %v743_v53 = vadd.f32 %v727_v48, %v2061_v10 }
  0xb8   :  { %3145 = vst [vmem:[#allocation4_spill] sm:$0xff] %v2063_v11  ;;  %v728_v54 = vadd.f32 %v2067_v13, %v2065_v12 }
  0xb9   :  { %v759_v61 = vadd.f32 %v743_v53, %v2063_v11 }
  0xbb   :  { %v777_v11 = vsel %vm773_vm0, %v759_v61, 0.0 }
  0xbe   :  { %v2069_v14 = vpop.f32.mrf.mxu2  ;;  %v2073_v16 = vpop.f32.mrf.mxu0 }
  0xbf   :  { %3146 = vst [vmem:[#allocation5_spill] sm:$0xff] %v2069_v14  ;;  %v2071_v15 = vpop.f32.mrf.mxu3  ;;  %v2075_v17 = vpop.f32.mrf.mxu1  ;;  %v744_v59 = vadd.f32 %v728_v54, %v2069_v14  ;;  %v774_v54 = vsel %vm773_vm0, %v757_v60, 0.0 }
  0xc0   :  { %3147 = vst [vmem:[#allocation6_spill] sm:$0xff] %v2071_v15  ;;  %v729_v55 = vadd.f32 %v2075_v17, %v2073_v16  ;;  %v776_v60 = vadd.f32 %v775_v47, %v774_v54 }
  0xc1   :  { %v760_v48 = vadd.f32 %v744_v59, %v2071_v15 }
  0xc2   :  { %v778_v14 = vadd.f32 %v777_v11, %v776_v60 }
  0xc3   :  { %v779_v15 = vsel %vm773_vm0, %v760_v48, 0.0 }
  0xc4   :  { %v780_v47 = vadd.f32 %v779_v15, %v778_v14 }
  0xc6   :  { %v2077_v18 = vpop.f32.mrf.mxu2  ;;  %v2081_v20 = vpop.f32.mrf.mxu0 }
  0xc7   :  { %3148 = vst [vmem:[#allocation7_spill] sm:$0xff] %v2077_v18  ;;  %v2079_v19 = vpop.f32.mrf.mxu3  ;;  %v2083_v21 = vpop.f32.mrf.mxu1  ;;  %v745_v62 = vadd.f32 %v729_v55, %v2077_v18 }
  0xc8   :  { %3149 = vst [vmem:[#allocation8_spill] sm:$0xff] %v2079_v19  ;;  %v730_v63 = vadd.f32 %v2083_v21, %v2081_v20 }
  0xc9   :  { %v761_v7 = vadd.f32 %v745_v62, %v2079_v19 }
  0xcb   :  { %v781_v62 = vsel %vm773_vm0, %v761_v7, 0.0 }
  0xcc   :  { %v782_v11 = vadd.f32 %v781_v62, %v780_v47 }
  0xce   :  { %v2085_v22 = vpop.f32.mrf.mxu2  ;;  %v2089_v24 = vpop.f32.mrf.mxu0 }
  0xcf   :  { %3150 = vst [vmem:[#allocation9_spill] sm:$0xff] %v2085_v22  ;;  %v2087_v23 = vpop.f32.mrf.mxu3  ;;  %v2091_v25 = vpop.f32.mrf.mxu1  ;;  %v746_v49 = vadd.f32 %v730_v63, %v2085_v22 }
  0xd0   :  { %v731_v46 = vadd.f32 %v2091_v25, %v2089_v24 }
  0xd1   :  { %v762_v22 = vadd.f32 %v746_v49, %v2087_v23 }
  0xd3   :  { %v783_v48 = vsel %vm773_vm0, %v762_v22, 0.0 }
  0xd6   :  { %v2093_v26 = vpop.f32.mrf.mxu2  ;;  %v2097_v28 = vpop.f32.mrf.mxu0 }
  0xd7   :  { %3151 = vst [vmem:[#allocation10_spill] sm:$0xff] %v2093_v26  ;;  %v2095_v27 = vpop.f32.mrf.mxu3  ;;  %v2099_v29 = vpop.f32.mrf.mxu1  ;;  %v747_v3 = vadd.f32 %v731_v46, %v2093_v26 }
  0xd8   :  { %3152 = vst [vmem:[#allocation11_spill] sm:$0xff] %v2095_v27  ;;  %v732_v58 = vadd.f32 %v2099_v29, %v2097_v28 }
  0xd9   :  { %v763_v46 = vadd.f32 %v747_v3, %v2095_v27 }
  0xdb   :  { %v785_v3 = vsel %vm773_vm0, %v763_v46, 0.0 }
  0xde   :  { %v2101_v30 = vpop.f32.mrf.mxu2  ;;  %v2105_v32 = vpop.f32.mrf.mxu0 }
  0xdf   :  { %v2103_v31 = vpop.f32.mrf.mxu3  ;;  %v2107_v33 = vpop.f32.mrf.mxu1  ;;  %v748_v18 = vadd.f32 %v732_v58, %v2101_v30 }
  0xe0   :  { %3153 = vst [vmem:[#allocation12_spill] sm:$0xff] %v2103_v31  ;;  %v733_v50 = vadd.f32 %v2107_v33, %v2105_v32 }
  0xe1   :  { %v764_v49 = vadd.f32 %v748_v18, %v2103_v31  ;;  %v784_v18 = vadd.f32 %v783_v48, %v782_v11 }
  0xe3   :  { %v786_v46 = vadd.f32 %v785_v3, %v784_v18 }
  0xe6   :  { %v2109_v34 = vpop.f32.mrf.mxu2  ;;  %v2113_v36 = vpop.f32.mrf.mxu0 }
  0xe7   :  { %v2111_v35 = vpop.f32.mrf.mxu3  ;;  %v2115_v37 = vpop.f32.mrf.mxu1  ;;  %v749_v61 = vadd.f32 %v733_v50, %v2109_v34 }
  0xe8   :  { %3154 = vst [vmem:[#allocation13_spill] sm:$0xff] %v2111_v35  ;;  %v734_v19 = vadd.f32 %v2115_v37, %v2113_v36 }
  0xe9   :  { %v765_v50 = vadd.f32 %v749_v61, %v2111_v35  ;;  %v787_v61 = vsel %vm773_vm0, %v764_v49, 0.0 }
  0xea   :  { %v788_v27 = vadd.f32 %v787_v61, %v786_v46 }
  0xee   :  { %v2117_v38 = vpop.f32.mrf.mxu2  ;;  %v2121_v40 = vpop.f32.mrf.mxu0 }
  0xef   :  { %v2119_v39 = vpop.f32.mrf.mxu3  ;;  %v2123_v41 = vpop.f32.mrf.mxu1  ;;  %v750_v54 = vadd.f32 %v734_v19, %v2117_v38 }
  0xf0   :  { %3155 = vst [vmem:[#allocation14_spill] sm:$0xff] %v2119_v39  ;;  %v735_v26 = vadd.f32 %v2123_v41, %v2121_v40 }
  0xf1   :  { %v766_v62 = vadd.f32 %v750_v54, %v2119_v39 }
  0xf3   :  { %v791_v49 = vsel %vm773_vm0, %v766_v62, 0.0 }
  0xf6   :  { %v2125_v42 = vpop.f32.mrf.mxu2  ;;  %v2129_v44 = vpop.f32.mrf.mxu0 }
  0xf7   :  { %v2127_v43 = vpop.f32.mrf.mxu3  ;;  %v2131_v45 = vpop.f32.mrf.mxu1  ;;  %v751_v60 = vadd.f32 %v735_v26, %v2125_v42  ;;  %v789_v26 = vsel %vm773_vm0, %v765_v50, 0.0 }
  0xf8   :  { %3156 = vst [vmem:[#allocation15_spill] sm:$0xff] %v2127_v43  ;;  %v736_v14 = vadd.f32 %v2131_v45, %v2129_v44  ;;  %v790_v3 = vadd.f32 %v789_v26, %v788_v27 }
  0xf9   :  { %v767_v35 = vadd.f32 %v751_v60, %v2127_v43 }
  0xfa   :  { %v792_v39 = vadd.f32 %v791_v49, %v790_v3 }
  0xfb   :  { %v793_v60 = vsel %vm773_vm0, %v767_v35, 0.0 }
  0xfc   :  { %v794_v46 = vadd.f32 %v793_v60, %v792_v39 }
  0xfe   :  { %v2141_v51 = vpop.f32.mrf.mxu2  ;;  %v2150_v56 = vpop.f32.mrf.mxu0 }
  0xff   :  { %v2143_v52 = vpop.f32.mrf.mxu3  ;;  %v2152_v57 = vpop.f32.mrf.mxu1  ;;  %v752_v47 = vadd.f32 %v736_v14, %v2141_v51 }
 0x100   :  { %3157 = vst [vmem:[#allocation16_spill] sm:$0xff] %v2143_v52  ;;  %v737_v15 = vadd.f32 %v2152_v57, %v2150_v56 }
 0x101   :  { %v768_v54 = vadd.f32 %v752_v47, %v2143_v52 }
 0x103   :  { %v795_v61 = vsel %vm773_vm0, %v768_v54, 0.0 }
 0x104   :  { %v796_v52 = vadd.f32 %v795_v61, %v794_v46 }
 0x106   :  { %v2169_v53 = vpop.f32.mrf.mxu2  ;;  %v2178_v59 = vpop.f32.mrf.mxu0 }
 0x107   :  { %v2171_v55 = vpop.f32.mrf.mxu3  ;;  %v2180_v63 = vpop.f32.mrf.mxu1  ;;  %v753_v31 = vadd.f32 %v737_v15, %v2169_v53 }
 0x108   :  { %3158 = vst [vmem:[#allocation17_spill] sm:$0xff] %v2171_v55  ;;  %v738_v48 = vadd.f32 %v2180_v63, %v2178_v59 }
 0x109   :  { %v769_v15 = vadd.f32 %v753_v31, %v2171_v55 }
 0x10b   :  { %v797_v27 = vsel %vm773_vm0, %v769_v15, 0.0 }
 0x10e   :  { %v2196_v58 = vpop.f32.mrf.mxu2  ;;  %v2206_v22 = vpop.f32.mrf.mxu0 }
 0x10f   :  { %v2198_v7 = vpop.f32.mrf.mxu3  ;;  %v2208_v19 = vpop.f32.mrf.mxu1  ;;  %v754_v14 = vadd.f32 %v738_v48, %v2196_v58 }
 0x110   :  { %3159 = vst [vmem:[#allocation18_spill] sm:$0xff] %v2198_v7  ;;  %v739_v11 = vadd.f32 %v2208_v19, %v2206_v22 }
 0x111   :  { %v770_v62 = vadd.f32 %v754_v14, %v2198_v7 }
 0x113   :  { %v799_v35 = vsel %vm773_vm0, %v770_v62, 0.0 }
 0x116   :  { %v2223_v18 = vpop.f32.mrf.mxu2  ;;  %v2232_v47 = vpop.f32.mrf.mxu0 }
 0x117   :  { %v2225_v50 = vpop.f32.mrf.mxu3  ;;  %v755_v43 = vadd.f32 %v739_v11, %v2223_v18  ;;  %v2234_v48 = vpop.f32.mrf.mxu1  ;;  %v798_v11 = vadd.f32 %v797_v27, %v796_v52 }
 0x118   :  { %3160 = vst [vmem:[#allocation19_spill] sm:$0xff] %v2225_v50  ;;  %v740_v31 = vadd.f32 %v2234_v48, %v2232_v47 }
 0x119   :  { %v771_v26 = vadd.f32 %v755_v43, %v2225_v50  ;;  %v800_v14 = vadd.f32 %v799_v35, %v798_v11 }
 0x11b   :  { %v801_v54 = vsel %vm773_vm0, %v771_v26, 0.0 }
 0x11c   :  { %v802_v15 = vadd.f32 %v801_v54, %v800_v14 }
 0x11e   :  { %v2241_v49 = vpop.f32.mrf.mxu2 }
 0x11f   :  { %v756_v39 = vadd.f32 %v740_v31, %v2241_v49  ;;  %v2245_v3 = vpop.f32.mrf.mxu3 }
 0x121   :  { %v772_v60 = vadd.f32 %v756_v39, %v2245_v3 }
 0x123   :  { %v803_v43 = vsel %vm773_vm0, %v772_v60, 0.0 }
 0x124   :  { %v804_v61 = vadd.f32 %v803_v43, %v802_v15 }
 0x126   :  { %v805_v62 = vrot.slane %v804_v61, 4 }
 0x128   :  { %v806_v46 = vadd.f32 %v805_v62, %v804_v61 }
 0x12a   :  { %v807_v50 = vrot.slane %v806_v46, 2 }
 0x12c   :  { %v808_v7 = vadd.f32 %v807_v50, %v806_v46 }
 0x12e   :  { %v809_v52 = vrot.slane %v808_v7, 1 }
 0x130   :  { %v810_v27 = vadd.f32 %v809_v52, %v808_v7 }
 0x132   :  { %v2249_v55 = vmul.f32 0.001953125, %v810_v27 }
 0x134   :  { %v2253_v26 = vsub.f32 %v2041_v0, %v2249_v55  ;;  %v2257_v35 = vsub.f32 %v2049_v4, %v2249_v55  ;;  %v2261_v31 = vsub.f32 %v2057_v8, %v2249_v55  ;;  %v2265_v11 = vsub.f32 %v2065_v12, %v2249_v55 }
 0x135   :  { %v2273_v0 = vsub.f32 %v2073_v16, %v2249_v55  ;;  %v2279_v8 = vsub.f32 %v2081_v20, %v2249_v55  ;;  %v2287_v60 = vsub.f32 %v2089_v24, %v2249_v55  ;;  %v2294_v20 = vsub.f32 %v2097_v28, %v2249_v55 }
 0x136   :  { %v828_v7 = vmul.f32 %v2253_v26, %v2253_v26  ;;  %v829_v50 = vmul.f32 %v2257_v35, %v2257_v35  ;;  %v830_v4 = vmul.f32 %v2261_v31, %v2261_v31  ;;  %v831_v12 = vmul.f32 %v2265_v11, %v2265_v11 }
 0x137   :  { %v832_v16 = vmul.f32 %v2273_v0, %v2273_v0  ;;  %v833_v61 = vmul.f32 %v2279_v8, %v2279_v8  ;;  %v2301_v24 = vsub.f32 %v2043_v1, %v2249_v55  ;;  %v2305_v52 = vsub.f32 %v2105_v32, %v2249_v55 }
 0x138   :  { %v844_v54 = vsel %vm773_vm0, %v828_v7, 0.0  ;;  %v845_v39 = vsel %vm773_vm0, %v829_v50, 0.0  ;;  %v847_v15 = vsel %vm773_vm0, %v830_v4, 0.0  ;;  %v849_v62 = vsel %vm773_vm0, %v831_v12, 0.0 }
 0x139   :  { %v846_v14 = vadd.f32 %v845_v39, %v844_v54  ;;  %v834_v27 = vmul.f32 %v2287_v60, %v2287_v60  ;;  %v851_v28 = vsel %vm773_vm0, %v832_v16, 0.0  ;;  %v2312_v7 = vsub.f32 %v2051_v5, %v2249_v55 }
 0x13a   :  { %v2316_v4 = vsub.f32 %v2113_v36, %v2249_v55  ;;  %v835_v1 = vmul.f32 %v2294_v20, %v2294_v20  ;;  %v853_v32 = vsel %vm773_vm0, %v833_v61, 0.0  ;;  %v2323_v12 = vsub.f32 %v2059_v9, %v2249_v55 }
 0x13b   :  { %v848_v43 = vadd.f32 %v847_v15, %v846_v14  ;;  %v2327_v54 = vsub.f32 %v2121_v40, %v2249_v55  ;;  %v898_v39 = vmul.f32 %v2301_v24, %v2301_v24  ;;  %v836_v36 = vmul.f32 %v2305_v52, %v2305_v52 }
 0x13c   :  { %3161 = vst [vmem:[#allocation20_spill] sm:$0xff] %v2323_v12  ;;  %v855_v14 = vsel %vm773_vm0, %v834_v27, 0.0  ;;  %v2336_v16 = vsub.f32 %v2067_v13, %v2249_v55  ;;  %v899_v9 = vmul.f32 %v2312_v7, %v2312_v7  ;;  %v2342_v40 = vsub.f32 %v2129_v44, %v2249_v55 }
 0x13d   :  { %v850_v46 = vadd.f32 %v849_v62, %v848_v43  ;;  %v837_v43 = vmul.f32 %v2316_v4, %v2316_v4  ;;  %v857_v61 = vsel %vm773_vm0, %v835_v1, 0.0  ;;  %v2349_v62 = vsub.f32 %v2075_v17, %v2249_v55 }
 0x13e   :  { %3162 = vst [vmem:[#allocation21_spill] sm:$0xff] %v2336_v16  ;;  %v900_v13 = vmul.f32 %v2323_v12, %v2323_v12  ;;  %v838_v44 = vmul.f32 %v2327_v54, %v2327_v54  ;;  %v2363_v1 = vsub.f32 %v2083_v21, %v2249_v55  ;;  %v901_v17 = vmul.f32 %v2336_v16, %v2336_v16 }
 0x13f   :  { %v852_v50 = vadd.f32 %v851_v28, %v850_v46  ;;  %v2355_v46 = vsub.f32 %v2150_v56, %v2249_v55  ;;  %v914_v28 = vsel %vm773_vm0, %v898_v39, 0.0  ;;  %v839_v56 = vmul.f32 %v2342_v40, %v2342_v40 }
 0x140   :  { %v2373_v39 = vsub.f32 %v2091_v25, %v2249_v55  ;;  %v902_v21 = vmul.f32 %v2349_v62, %v2349_v62  ;;  %v863_v12 = vsel %vm773_vm0, %v838_v44, 0.0  ;;  %v903_v25 = vmul.f32 %v2363_v1, %v2363_v1 }
 0x141   :  { %v854_v5 = vadd.f32 %v853_v32, %v852_v50  ;;  %v859_v50 = vsel %vm773_vm0, %v836_v36, 0.0  ;;  %v915_v32 = vsel %vm773_vm0, %v899_v9, 0.0  ;;  %v917_v36 = vsel %vm773_vm0, %v900_v13, 0.0 }
 0x142   :  { %v865_v13 = vsel %vm773_vm0, %v839_v56, 0.0  ;;  %v904_v44 = vmul.f32 %v2373_v39, %v2373_v39  ;;  %v2410_v56 = vsub.f32 %v2053_v6, %v2249_v55 }
 0x143   :  { %v856_v15 = vadd.f32 %v855_v14, %v854_v5  ;;  %v916_v14 = vadd.f32 %v915_v32, %v914_v28  ;;  %v2391_v32 = vsub.f32 %v2107_v33, %v2249_v55 }
 0x144   :  { %3164 = vst [vmem:[#allocation23_spill] sm:$0xff] %v2410_v56  ;;  %v925_v6 = vsel %vm773_vm0, %v904_v44, 0.0 }
 0x145   :  { %v858_v27 = vadd.f32 %v857_v61, %v856_v15  ;;  %v861_v15 = vsel %vm773_vm0, %v837_v43, 0.0  ;;  %v840_v61 = vmul.f32 %v2355_v46, %v2355_v46  ;;  %v918_v16 = vadd.f32 %v917_v36, %v916_v14 }
 0x146   :  { %v919_v43 = vsel %vm773_vm0, %v901_v17, 0.0  ;;  %v2399_v17 = vsub.f32 %v2045_v2, %v2249_v55  ;;  %v2418_v2 = vsub.f32 %v2206_v22, %v2249_v55  ;;  %v2435_v22 = vsub.f32 %v2123_v41, %v2249_v55 }
 0x147   :  { %v860_v5 = vadd.f32 %v859_v50, %v858_v27  ;;  %v2383_v27 = vsub.f32 %v2099_v29, %v2249_v55  ;;  %v920_v50 = vadd.f32 %v919_v43, %v918_v16  ;;  %v867_v14 = vsel %vm773_vm0, %v840_v61, 0.0 }
 0x148   :  { %3163 = vst [vmem:[#allocation22_spill] sm:$0xff] %v2399_v17  ;;  %v923_v16 = vsel %vm773_vm0, %v903_v25, 0.0  ;;  %v2424_v61 = vsub.f32 %v2232_v47, %v2249_v55  ;;  %v968_v43 = vmul.f32 %v2399_v17, %v2399_v17  ;;  %v842_v44 = vmul.f32 %v2418_v2, %v2418_v2 }
 0x149   :  { %v862_v9 = vadd.f32 %v861_v15, %v860_v5  ;;  %v921_v5 = vsel %vm773_vm0, %v902_v21, 0.0  ;;  %v905_v33 = vmul.f32 %v2383_v27, %v2383_v27  ;;  %v2414_v21 = vsub.f32 %v2178_v59, %v2249_v55 }
 0x14a   :  { %v922_v15 = vadd.f32 %v921_v5, %v920_v50  ;;  %v2431_v59 = vsub.f32 %v2061_v10, %v2249_v55  ;;  %v3166_v50 = vld [vmem:[#allocation5_spill] sm:$0xff]  ;;  %v969_v10 = vmul.f32 %v2410_v56, %v2410_v56  ;;  %v2479_v17 = vsub.f32 %v2152_v57, %v2249_v55 }
 0x14b   :  { %v864_v28 = vadd.f32 %v863_v12, %v862_v9  ;;  %v2403_v12 = vsub.f32 %v2115_v37, %v2249_v55  ;;  %v906_v9 = vmul.f32 %v2391_v32, %v2391_v32  ;;  %v841_v41 = vmul.f32 %v2414_v21, %v2414_v21 }
 0x14c   :  { %v924_v37 = vadd.f32 %v923_v16, %v922_v15  ;;  %3165 = vst [vmem:[#allocation24_spill] sm:$0xff] %v2431_v59  ;;  %v3168_v15 = vld [vmem:[#allocation7_spill] sm:$0xff]  ;;  %v970_v16 = vmul.f32 %v2431_v59, %v2431_v59  ;;  %v985_v59 = vsel %vm773_vm0, %v969_v10, 0.0  ;;  %v2498_v57 = vsub.f32 %v2234_v48, %v2249_v55 }
 0x14d   :  { %v866_v29 = vadd.f32 %v865_v13, %v864_v28  ;;  %v907_v47 = vmul.f32 %v2403_v12, %v2403_v12  ;;  %v927_v28 = vsel %vm773_vm0, %v905_v33, 0.0  ;;  %v2444_v13 = vsub.f32 %v3166_v50, %v2249_v55 }
 0x14e   :  { %v926_v25 = vadd.f32 %v925_v6, %v924_v37  ;;  %v2457_v33 = vsub.f32 %v3168_v15, %v2249_v55  ;;  %v2463_v37 = vsub.f32 %v2131_v45, %v2249_v55  ;;  %v908_v6 = vmul.f32 %v2435_v22, %v2435_v22  ;;  %3175 = vst [vmem:[#allocation26_spill] sm:$0xff] %v2498_v57 }
 0x14f   :  { %v2420_v36 = vadd.f32 %v867_v14, %v866_v29  ;;  %3167 = vst [vmem:[#allocation5_spill] sm:$0xff] %v2444_v13  ;;  %v843_v29 = vmul.f32 %v2424_v61, %v2424_v61  ;;  %v929_v14 = vsel %vm773_vm0, %v906_v9, 0.0  ;;  %v931_v50 = vsel %vm773_vm0, %v907_v47, 0.0  ;;  %v3170_v9 = vld [vmem:[#allocation9_spill] sm:$0xff]  ;;  %v3172_v47 = vld [vmem:[#allocation10_spill] sm:$0xff] }
 0x150   :  { %v928_v5 = vadd.f32 %v927_v28, %v926_v25  ;;  %3169 = vst [vmem:[#allocation7_spill] sm:$0xff] %v2457_v33  ;;  %v984_v28 = vsel %vm773_vm0, %v968_v43, 0.0  ;;  %v2471_v56 = vsub.f32 %v3170_v9, %v2249_v55  ;;  %v971_v15 = vmul.f32 %v2444_v13, %v2444_v13 }
 0x151   :  { %v869_v45 = vsel %vm773_vm0, %v841_v41, 0.0  ;;  %v2483_v43 = vsub.f32 %v2180_v63, %v2249_v55  ;;  %v2487_v9 = vsub.f32 %v3172_v47, %v2249_v55  ;;  %v972_v13 = vmul.f32 %v2457_v33, %v2457_v33 }
 0x152   :  { %v930_v25 = vadd.f32 %v929_v14, %v928_v5  ;;  %3171 = vst [vmem:[#allocation9_spill] sm:$0xff] %v2471_v56  ;;  %v986_v14 = vadd.f32 %v985_v59, %v984_v28  ;;  %v987_v10 = vsel %vm773_vm0, %v970_v16, 0.0  ;;  %v2494_v41 = vsub.f32 %v2208_v19, %v2249_v55 }
 0x153   :  { %3173 = vst [vmem:[#allocation10_spill] sm:$0xff] %v2487_v9  ;;  %v909_v63 = vmul.f32 %v2463_v37, %v2463_v37  ;;  %v2505_v28 = vsub.f32 %v2101_v30, %v2249_v55  ;;  %v973_v16 = vmul.f32 %v2471_v56, %v2471_v56  ;;  %v989_v19 = vsel %vm773_vm0, %v971_v15, 0.0 }
 0x154   :  { %v932_v5 = vadd.f32 %v931_v50, %v930_v25  ;;  %3174 = vst [vmem:[#allocation25_spill] sm:$0xff] %v2494_v41  ;;  %v988_v59 = vadd.f32 %v987_v10, %v986_v14  ;;  %v933_v25 = vsel %vm773_vm0, %v908_v6, 0.0  ;;  %v871_v50 = vsel %vm773_vm0, %v842_v44, 0.0 }
 0x155   :  { %v910_v48 = vmul.f32 %v2479_v17, %v2479_v17  ;;  %v2514_v14 = vsel %vm773_vm0, %v843_v29, 0.0  ;;  %v2518_v6 = vsub.f32 %v2109_v34, %v2249_v55  ;;  %v974_v30 = vmul.f32 %v2487_v9, %v2487_v9 }
 0x156   :  { %v934_v47 = vadd.f32 %v933_v25, %v932_v5  ;;  %v990_v33 = vadd.f32 %v989_v19, %v988_v59  ;;  %v991_v10 = vsel %vm773_vm0, %v972_v13, 0.0  ;;  %v911_v44 = vmul.f32 %v2483_v43, %v2483_v43 }
 0x157   :  { %v912_v15 = vmul.f32 %v2494_v41, %v2494_v41  ;;  %v2529_v5 = vmul.f32 %v2498_v57, %v2498_v57  ;;  %v935_v59 = vsel %vm773_vm0, %v909_v63, 0.0  ;;  %v2534_v34 = vsub.f32 %v2117_v38, %v2249_v55  ;;  %v3177_v41 = vld [vmem:[#allocation2_spill] sm:$0xff] }
 0x158   :  { %v992_v29 = vadd.f32 %v991_v10, %v990_v33  ;;  %v975_v13 = vmul.f32 %v2505_v28, %v2505_v28  ;;  %v993_v25 = vsel %vm773_vm0, %v973_v16, 0.0  ;;  %v936_v19 = vadd.f32 %v935_v59, %v934_v47  ;;  %v3179_v10 = vld [vmem:[#allocation3_spill] sm:$0xff] }
 0x159   :  { %3176 = vst [vmem:[#allocation27_spill] sm:$0xff] %v2534_v34  ;;  %v937_v9 = vsel %vm773_vm0, %v910_v48, 0.0  ;;  %v2542_v57 = vsub.f32 %v3177_v41, %v2249_v55  ;;  %v2546_v33 = vsub.f32 %v2125_v42, %v2249_v55  ;;  %v976_v38 = vmul.f32 %v2518_v6, %v2518_v6 }
 0x15a   :  { %v994_v56 = vadd.f32 %v993_v25, %v992_v29  ;;  %v995_v63 = vsel %vm773_vm0, %v974_v30, 0.0  ;;  %v2553_v16 = vsub.f32 %v3179_v10, %v2249_v55  ;;  %v939_v48 = vsel %vm773_vm0, %v911_v44, 0.0  ;;  %v3182_v25 = vld [vmem:[#allocation4_spill] sm:$0xff] }
 0x15b   :  { %3178 = vst [vmem:[#allocation2_spill] sm:$0xff] %v2542_v57  ;;  %v941_v47 = vsel %vm773_vm0, %v912_v15, 0.0  ;;  %v2559_v41 = vsub.f32 %v2141_v51, %v2249_v55  ;;  %v2563_v42 = vsub.f32 %v2169_v53, %v2249_v55  ;;  %v977_v30 = vmul.f32 %v2534_v34, %v2534_v34 }
 0x15c   :  { %3180 = vst [vmem:[#allocation3_spill] sm:$0xff] %v2553_v16  ;;  %v996_v29 = vadd.f32 %v995_v63, %v994_v56  ;;  %v997_v59 = vsel %vm773_vm0, %v975_v13, 0.0  ;;  %v2570_v10 = vsub.f32 %v3182_v25, %v2249_v55  ;;  %v938_v44 = vadd.f32 %v937_v9, %v936_v19  ;;  %v3184_v13 = vld [vmem:[#allocation6_spill] sm:$0xff] }
 0x15d   :  { %3181 = vst [vmem:[#allocation28_spill] sm:$0xff] %v2559_v41  ;;  %v2574_v15 = vsub.f32 %v2196_v58, %v2249_v55  ;;  %v1038_v56 = vmul.f32 %v2542_v57, %v2542_v57  ;;  %v978_v53 = vmul.f32 %v2546_v33, %v2546_v33  ;;  %v999_v63 = vsel %vm773_vm0, %v976_v38, 0.0 }
 0x15e   :  { %3183 = vst [vmem:[#allocation4_spill] sm:$0xff] %v2570_v10  ;;  %v998_v51 = vadd.f32 %v997_v59, %v996_v29  ;;  %v2583_v34 = vsub.f32 %v3184_v13, %v2249_v55  ;;  %v1039_v9 = vmul.f32 %v2553_v16, %v2553_v16  ;;  %v870_v19 = vadd.f32 %v869_v45, %v2420_v36  ;;  %v3186_v13 = vld [vmem:[#allocation8_spill] sm:$0xff] }
 0x15f   :  { %v2590_v58 = vsub.f32 %v2223_v18, %v2249_v55  ;;  %v2594_v29 = vsub.f32 %v2241_v49, %v2249_v55  ;;  %v979_v38 = vmul.f32 %v2559_v41, %v2559_v41  ;;  %v1001_v25 = vsel %vm773_vm0, %v977_v30, 0.0 }
 0x160   :  { %3185 = vst [vmem:[#allocation6_spill] sm:$0xff] %v2583_v34  ;;  %v1000_v59 = vadd.f32 %v999_v63, %v998_v51  ;;  %v2601_v57 = vsub.f32 %v3186_v13, %v2249_v55  ;;  %v1040_v36 = vmul.f32 %v2570_v10, %v2570_v10  ;;  %v940_v45 = vadd.f32 %v939_v48, %v938_v44 }
 0x161   :  { %v980_v18 = vmul.f32 %v2563_v42, %v2563_v42  ;;  %v1054_v49 = vsel %vm773_vm0, %v1038_v56, 0.0  ;;  %v1003_v51 = vsel %vm773_vm0, %v978_v53, 0.0  ;;  %v2611_v63 = vsub.f32 %v2087_v23, %v2249_v55  ;;  %v3188_v56 = vld [vmem:[#allocation11_spill] sm:$0xff] }
 0x162   :  { %v1002_v16 = vadd.f32 %v1001_v25, %v1000_v59  ;;  %v1041_v30 = vmul.f32 %v2583_v34, %v2583_v34  ;;  %v1055_v13 = vsel %vm773_vm0, %v1039_v9, 0.0  ;;  %v872_v41 = vadd.f32 %v871_v50, %v870_v19 }
 0x163   :  { %3187 = vst [vmem:[#allocation8_spill] sm:$0xff] %v2611_v63  ;;  %v981_v48 = vmul.f32 %v2574_v15, %v2574_v15  ;;  %v1056_v10 = vadd.f32 %v1055_v13, %v1054_v49  ;;  %v1005_v59 = vsel %vm773_vm0, %v979_v38, 0.0  ;;  %v2621_v53 = vsub.f32 %v3188_v56, %v2249_v55  ;;  %v3190_v49 = vld [vmem:[#allocation12_spill] sm:$0xff] }
 0x164   :  { %v1004_v44 = vadd.f32 %v1003_v51, %v1002_v16  ;;  %v1042_v23 = vmul.f32 %v2601_v57, %v2601_v57  ;;  %v1057_v25 = vsel %vm773_vm0, %v1040_v36, 0.0  ;;  %v942_v34 = vadd.f32 %v941_v47, %v940_v45 }
 0x165   :  { %3189 = vst [vmem:[#allocation11_spill] sm:$0xff] %v2621_v53  ;;  %v982_v50 = vmul.f32 %v2590_v58, %v2590_v58  ;;  %v1058_v19 = vadd.f32 %v1057_v25, %v1056_v10  ;;  %v1007_v16 = vsel %vm773_vm0, %v980_v18, 0.0  ;;  %v2631_v38 = vsub.f32 %v3190_v49, %v2249_v55  ;;  %v3192_v18 = vld [vmem:[#allocation13_spill] sm:$0xff] }
 0x166   :  { %v1006_v9 = vadd.f32 %v1005_v59, %v1004_v44  ;;  %v1043_v51 = vmul.f32 %v2611_v63, %v2611_v63  ;;  %v1059_v13 = vsel %vm773_vm0, %v1041_v30, 0.0  ;;  %v874_v56 = vadd.f32 %v2514_v14, %v872_v41 }
 0x167   :  { %3191 = vst [vmem:[#allocation12_spill] sm:$0xff] %v2631_v38  ;;  %v943_v47 = vsel %vm773_vm0, %v2529_v5, 0.0  ;;  %v1060_v45 = vadd.f32 %v1059_v13, %v1058_v19  ;;  %v1009_v10 = vsel %vm773_vm0, %v981_v48, 0.0  ;;  %v2642_v44 = vsub.f32 %v3192_v18, %v2249_v55 }
 0x168   :  { %v1008_v36 = vadd.f32 %v1007_v16, %v1006_v9  ;;  %v1044_v59 = vmul.f32 %v2621_v53, %v2621_v53  ;;  %v1061_v25 = vsel %vm773_vm0, %v1042_v23, 0.0  ;;  %v944_v49 = vadd.f32 %v943_v47, %v942_v34  ;;  %v3194_v9 = vld [vmem:[#allocation14_spill] sm:$0xff]  ;;  %v3196_v34 = vld [vmem:[#allocation15_spill] sm:$0xff] }
 0x169   :  { %3193 = vst [vmem:[#allocation13_spill] sm:$0xff] %v2642_v44  ;;  %v983_v14 = vmul.f32 %v2594_v29, %v2594_v29  ;;  %v1062_v30 = vadd.f32 %v1061_v25, %v1060_v45  ;;  %v1011_v5 = vsel %vm773_vm0, %v982_v50, 0.0  ;;  %v2652_v48 = vsub.f32 %v3194_v9, %v2249_v55  ;;  %v3198_v9 = vld [vmem:[#allocation16_spill] sm:$0xff] }
 0x16a   :  { %v1010_v41 = vadd.f32 %v1009_v10, %v1008_v36  ;;  %v1045_v19 = vmul.f32 %v2631_v38, %v2631_v38  ;;  %v1063_v16 = vsel %vm773_vm0, %v1043_v51, 0.0  ;;  %v2659_v23 = vsub.f32 %v3196_v34, %v2249_v55 }
 0x16b   :  { %3195 = vst [vmem:[#allocation14_spill] sm:$0xff] %v2652_v48  ;;  %v1064_v18 = vadd.f32 %v1063_v16, %v1062_v30  ;;  %v1046_v47 = vmul.f32 %v2642_v44, %v2642_v44  ;;  %v1065_v50 = vsel %vm773_vm0, %v1044_v59, 0.0  ;;  %v875_v36 = vrot.slane %v874_v56, 4  ;;  %v3200_v16 = vld [vmem:[#allocation17_spill] sm:$0xff]  ;;  %v3202_v44 = vld [vmem:[#allocation18_spill] sm:$0xff] }
 0x16c   :  { %v1012_v13 = vadd.f32 %v1011_v5, %v1010_v41  ;;  %3197 = vst [vmem:[#allocation15_spill] sm:$0xff] %v2659_v23  ;;  %v945_v45 = vrot.slane %v944_v49, 4  ;;  %v1013_v25 = vsel %vm773_vm0, %v983_v14, 0.0  ;;  %v2667_v38 = vsub.f32 %v3198_v9, %v2249_v55 }
 0x16d   :  { %v1066_v10 = vadd.f32 %v1065_v50, %v1064_v18  ;;  %v1047_v51 = vmul.f32 %v2652_v48, %v2652_v48  ;;  %v1067_v41 = vsel %vm773_vm0, %v1045_v19, 0.0  ;;  %v2674_v34 = vsub.f32 %v3200_v16, %v2249_v55 }
 0x16e   :  { %3199 = vst [vmem:[#allocation16_spill] sm:$0xff] %v2667_v38  ;;  %v1014_v30 = vadd.f32 %v1013_v25, %v1012_v13  ;;  %v1048_v59 = vmul.f32 %v2659_v23, %v2659_v23  ;;  %v1069_v14 = vsel %vm773_vm0, %v1046_v47, 0.0  ;;  %v876_v18 = vadd.f32 %v875_v36, %v874_v56 }
 0x16f   :  { %v1068_v5 = vadd.f32 %v1067_v41, %v1066_v10  ;;  %3201 = vst [vmem:[#allocation17_spill] sm:$0xff] %v2674_v34  ;;  %v946_v50 = vadd.f32 %v945_v45, %v944_v49  ;;  %v2681_v53 = vsub.f32 %v3202_v44, %v2249_v55  ;;  %v1049_v19 = vmul.f32 %v2667_v38, %v2667_v38  ;;  %v3204_v41 = vld [vmem:[#allocation19_spill] sm:$0xff] }
 0x170   :  { %v1071_v13 = vsel %vm773_vm0, %v1047_v51, 0.0  ;;  %v1015_v10 = vrot.slane %v1014_v30, 4  ;;  %v2688_v16 = vsub.f32 %v3204_v41, %v2249_v55  ;;  %v1050_v56 = vmul.f32 %v2674_v34, %v2674_v34 }
 0x171   :  { %v1070_v9 = vadd.f32 %v1069_v14, %v1068_v5  ;;  %3203 = vst [vmem:[#allocation18_spill] sm:$0xff] %v2681_v53  ;;  %v1073_v49 = vsel %vm773_vm0, %v1048_v59, 0.0  ;;  %v877_v47 = vrot.slane %v876_v18, 2  ;;  %v947_v36 = vrot.slane %v946_v50, 2 }
 0x172   :  { %3205 = vst [vmem:[#allocation19_spill] sm:$0xff] %v2688_v16  ;;  %v2695_v45 = vsub.f32 %v2245_v3, %v2249_v55  ;;  %v1051_v51 = vmul.f32 %v2681_v53, %v2681_v53  ;;  %v1075_v5 = vsel %vm773_vm0, %v1049_v19, 0.0  ;;  %v1016_v14 = vadd.f32 %v1015_v10, %v1014_v30 }
 0x173   :  { %v1072_v25 = vadd.f32 %v1071_v13, %v1070_v9  ;;  %v1052_v13 = vmul.f32 %v2688_v16, %v2688_v16  ;;  %v1077_v41 = vsel %vm773_vm0, %v1050_v56, 0.0  ;;  %v878_v59 = vadd.f32 %v877_v47, %v876_v18 }
 0x174   :  { %3206 = vst [vmem:[#allocation29_spill] sm:$0xff] %v2695_v45  ;;  %v948_v34 = vadd.f32 %v947_v36, %v946_v50  ;;  %v1079_v55 = vsel %vm773_vm0, %v1051_v51, 0.0  ;;  %v1017_v3 = vrot.slane %v1016_v14, 2 }
 0x175   :  { %v1074_v44 = vadd.f32 %v1073_v49, %v1072_v25  ;;  %v1053_v25 = vmul.f32 %v2695_v45, %v2695_v45  ;;  %v1081_v53 = vsel %vm773_vm0, %v1052_v13, 0.0  ;;  %v879_v19 = vrot.slane %v878_v59, 1 }
 0x176   :  { %v949_v30 = vrot.slane %v948_v34, 1 }
 0x177   :  { %v1076_v9 = vadd.f32 %v1075_v5, %v1074_v44  ;;  %v1083_v44 = vsel %vm773_vm0, %v1053_v25, 0.0  ;;  %v1018_v5 = vadd.f32 %v1017_v3, %v1016_v14  ;;  %v880_v56 = vadd.f32 %v879_v19, %v878_v59 }
 0x178   :  { %v950_v18 = vadd.f32 %v949_v30, %v948_v34 }
 0x179   :  { %v1078_v38 = vadd.f32 %v1077_v41, %v1076_v9  ;;  %v1019_v47 = vrot.slane %v1018_v5, 1 }
 0x17a   :  { %v951_v9 = vadd.f32 %v950_v18, %v880_v56 }
 0x17b   :  { %v1080_v49 = vadd.f32 %v1079_v55, %v1078_v38  ;;  %v1020_v45 = vadd.f32 %v1019_v47, %v1018_v5 }
 0x17d   :  { %v1082_v10 = vadd.f32 %v1081_v53, %v1080_v49  ;;  %v1021_v23 = vadd.f32 %v1020_v45, %v951_v9 }
 0x17f   :  { %v1084_v16 = vadd.f32 %v1083_v44, %v1082_v10 }
 0x181   :  { %v1085_v50 = vrot.slane %v1084_v16, 4 }
 0x183   :  { %v1086_v36 = vadd.f32 %v1085_v50, %v1084_v16 }
 0x185   :  { %v1087_v41 = vrot.slane %v1086_v36, 2 }
 0x187   :  { %v1088_v51 = vadd.f32 %v1087_v41, %v1086_v36 }
 0x189   :  { %v1089_v38 = vrot.slane %v1088_v51, 1 }
 0x18b   :  { %v1090_v55 = vadd.f32 %v1089_v38, %v1088_v51 }
 0x18d   :  { %v1091_v13 = vadd.f32 %v1090_v55, %v1021_v23 }
 0x18f   :  { %v1092_v48 = vmul.f32 0.001953125, %v1091_v13 }
 0x191   :  { %v1093_v63 = vadd.f32 1e-05, %v1092_v48 }
 0x193   :  { %1832 = vrsqrt.f32 %v1093_v63  ;;  %vm1100_vm2 = vweird.f32 %v1093_v63 }
 0x199   :  { %v1833_v53 = vpop.eup %1832 }
 0x19a   :  { %v1095_v25 = vmul.f32 %v1833_v53, %v1093_v63  ;;  %vm1101_vm1 = vweird.f32 %v1833_v53 }
 0x19b   :  { %vm1102_vm3 = vmor %vm1100_vm2, %vm1101_vm1 }
 0x19c   :  { %v1096_v14 = vmul.f32 %v1833_v53, %v1095_v25 }
 0x19e   :  { %v1097_v3 = vmul.f32 0.5, %v1096_v14 }
 0x1a0   :  { %v1098_v59 = vsub.f32 1.5, %v1097_v3 }
 0x1a2   :  { %v1099_v34 = vmul.f32 %v1833_v53, %v1098_v59 }
 0x1a4   :  { %v2708_v16 = vsel %vm1102_vm3, %v1833_v53, %v1099_v34 }
 0x1a5   :  { %v1104_v45 = vmul.f32 %v2708_v16, %v2253_v26  ;;  %v1105_v23 = vmul.f32 %v2708_v16, %v2257_v35  ;;  %v1106_v48 = vmul.f32 %v2708_v16, %v2261_v31  ;;  %v1107_v49 = vmul.f32 %v2708_v16, %v2265_v11 }
 0x1a6   :  { %v1108_v19 = vmul.f32 %v2708_v16, %v2273_v0  ;;  %v1115_v63 = vmul.f32 %v2708_v16, %v2342_v40  ;;  %v1109_v30 = vmul.f32 %v2708_v16, %v2279_v8  ;;  %v1116_v26 = vmul.f32 %v2708_v16, %v2355_v46 }
 0x1a7   :  { %v1110_v35 = vmul.f32 %v2708_v16, %v2287_v60  ;;  %v1120_v10 = vmax.f32 %v1104_v45, 0.0  ;;  %v1121_v31 = vmax.f32 %v1105_v23, 0.0  ;;  %v1122_v44 = vmax.f32 %v1106_v48, 0.0  ;;  %v3207_v23 = vld [vmem:[#allocation20_spill] sm:$0xff] }
 0x1a8   :  { %v1111_v11 = vmul.f32 %v2708_v16, %v2294_v20  ;;  %v1123_v5 = vmax.f32 %v1107_v49, 0.0  ;;  %v1112_v0 = vmul.f32 %v2708_v16, %v2305_v52  ;;  %v1124_v40 = vmax.f32 %v1108_v19, 0.0  ;;  %v3208_v19 = vld [vmem:[#allocation21_spill] sm:$0xff] }
 0x1a9   :  { %v1113_v8 = vmul.f32 %v2708_v16, %v2316_v4  ;;  %v1114_v46 = vmul.f32 %v2708_v16, %v2327_v54  ;;  %v1125_v56 = vmax.f32 %v1109_v30, 0.0  ;;  %v1126_v60 = vmax.f32 %v1110_v35, 0.0 }
 0x1aa   :  { %v1136_v18 = vpack.c.bf16 %v1120_v10, %v1120_v10  ;;  %v1137_v50 = vpack.c.bf16 %v1121_v31, %v1121_v31  ;;  %v1138_v47 = vpack.c.bf16 %v1122_v44, %v1122_v44  ;;  %v1127_v36 = vmax.f32 %v1111_v11, 0.0 }
 0x1ab   :  { %v1139_v9 = vpack.c.bf16 %v1123_v5, %v1123_v5  ;;  %v1128_v20 = vmax.f32 %v1112_v0, 0.0  ;;  %v1140_v41 = vpack.c.bf16 %v1124_v40, %v1124_v40  ;;  %v1117_v52 = vmul.f32 %v2708_v16, %v2414_v21 }
 0x1ac   :  { %1153 = vst.msk [vmem:[%s3096_s2] sm:$0xf] %vm1152_vm4, %v1136_v18  ;;  %v1129_v4 = vmax.f32 %v1113_v8, 0.0  ;;  %v1141_v54 = vpack.c.bf16 %v1125_v56, %v1125_v56  ;;  %v1118_v51 = vmul.f32 %v2708_v16, %v2418_v2  ;;  %v1130_v38 = vmax.f32 %v1114_v46, 0.0 }
 0x1ad   :  { %1154 = vst.msk [vmem:[%s3096_s2 + $0x4] sm:$0xf] %vm1152_vm4, %v1137_v50  ;;  %v1142_v55 = vpack.c.bf16 %v1126_v60, %v1126_v60  ;;  %v1119_v21 = vmul.f32 %v2708_v16, %v2424_v61  ;;  %v1131_v13 = vmax.f32 %v1115_v63, 0.0  ;;  %v1143_v53 = vpack.c.bf16 %v1127_v36, %v1127_v36 }
 0x1ae   :  { %1155 = vst.msk [vmem:[%s3096_s2 + $0x8] sm:$0xf] %vm1152_vm4, %v1138_v47  ;;  %v1132_v25 = vmax.f32 %v1116_v26, 0.0  ;;  %v1144_v14 = vpack.c.bf16 %v1128_v20, %v1128_v20  ;;  %v1169_v2 = vmul.f32 %v2708_v16, %v2301_v24  ;;  %v1133_v3 = vmax.f32 %v1117_v52, 0.0 }
 0x1af   :  { %1156 = vst.msk [vmem:[%s3096_s2 + $0xc] sm:$0xf] %vm1152_vm4, %v1139_v9  ;;  %v1145_v59 = vpack.c.bf16 %v1129_v4, %v1129_v4  ;;  %v1170_v61 = vmul.f32 %v2708_v16, %v2312_v7  ;;  %v1134_v34 = vmax.f32 %v1118_v51, 0.0  ;;  %v1146_v45 = vpack.c.bf16 %v1130_v38, %v1130_v38  ;;  %v3210_v51 = vld [vmem:[#allocation26_spill] sm:$0xff] }
 0x1b0   :  { %1157 = vst.msk [vmem:[%s3096_s2 + $0x10] sm:$0xf] %vm1152_vm4, %v1140_v41  ;;  %v1171_v24 = vmul.f32 %v2708_v16, %v3207_v23  ;;  %v1135_v48 = vmax.f32 %v1119_v21, 0.0  ;;  %v1147_v49 = vpack.c.bf16 %v1131_v13, %v1131_v13  ;;  %v1172_v7 = vmul.f32 %v2708_v16, %v3208_v19 }
 0x1b1   :  { %1158 = vst.msk [vmem:[%s3096_s2 + $0x14] sm:$0xf] %vm1152_vm4, %v1141_v54  ;;  %v1148_v63 = vpack.c.bf16 %v1132_v25, %v1132_v25  ;;  %v1173_v30 = vmul.f32 %v2708_v16, %v2349_v62  ;;  %v1185_v26 = vmax.f32 %v1169_v2, 0.0  ;;  %v1149_v35 = vpack.c.bf16 %v1133_v3, %v1133_v3  ;;  %v3212_v3 = vld [vmem:[#allocation23_spill] sm:$0xff] }
 0x1b2   :  { %1159 = vst.msk [vmem:[%s3096_s2 + $0x18] sm:$0xf] %vm1152_vm4, %v1142_v55  ;;  %v1174_v10 = vmul.f32 %v2708_v16, %v2363_v1  ;;  %v1186_v31 = vmax.f32 %v1170_v61, 0.0  ;;  %v1150_v44 = vpack.c.bf16 %v1134_v34, %v1134_v34  ;;  %v1175_v62 = vmul.f32 %v2708_v16, %v2373_v39 }
 0x1b3   :  { %1160 = vst.msk [vmem:[%s3096_s2 + $0x1c] sm:$0xf] %vm1152_vm4, %v1143_v53  ;;  %v1187_v11 = vmax.f32 %v1171_v24, 0.0  ;;  %v1151_v5 = vpack.c.bf16 %v1135_v48, %v1135_v48  ;;  %v1176_v1 = vmul.f32 %v2708_v16, %v2383_v27  ;;  %v1188_v0 = vmax.f32 %v1172_v7, 0.0  ;;  %v3211_v53 = vld [vmem:[#allocation22_spill] sm:$0xff] }
 0x1b4   :  { %1161 = vst.msk [vmem:[%s3096_s2 + $0x20] sm:$0xf] %vm1152_vm4, %v1144_v14  ;;  %v1177_v40 = vmul.f32 %v2708_v16, %v2391_v32  ;;  %v1189_v39 = vmax.f32 %v1173_v30, 0.0  ;;  %v1201_v8 = vpack.c.bf16 %v1185_v26, %v1185_v26  ;;  %v1178_v46 = vmul.f32 %v2708_v16, %v2403_v12 }
 0x1b5   :  { %1162 = vst.msk [vmem:[%s3096_s2 + $0x24] sm:$0xf] %vm1152_vm4, %v1145_v59  ;;  %v1190_v27 = vmax.f32 %v1174_v10, 0.0  ;;  %v1202_v56 = vpack.c.bf16 %v1186_v31, %v1186_v31  ;;  %v1179_v32 = vmul.f32 %v2708_v16, %v2435_v22  ;;  %v1191_v60 = vmax.f32 %v1175_v62, 0.0  ;;  %v3216_v10 = vld [vmem:[#allocation9_spill] sm:$0xff] }
 0x1b6   :  { %1163 = vst.msk [vmem:[%s3096_s2 + $0x28] sm:$0xf] %vm1152_vm4, %v1146_v45  ;;  %v1203_v18 = vpack.c.bf16 %v1187_v11, %v1187_v11  ;;  %v1180_v12 = vmul.f32 %v2708_v16, %v2463_v37  ;;  %v1192_v50 = vmax.f32 %v1176_v1, 0.0  ;;  %v1204_v47 = vpack.c.bf16 %v1188_v0, %v1188_v0  ;;  %v3209_v37 = vld [vmem:[#allocation25_spill] sm:$0xff]  ;;  %v3213_v45 = vld [vmem:[#allocation24_spill] sm:$0xff]  ;;  %v3217_v11 = vld [vmem:[#allocation10_spill] sm:$0xff] }
 0x1b7   :  { %1164 = vst.msk [vmem:[%s3096_s2 + $0x2c] sm:$0xf] %vm1152_vm4, %v1147_v49  ;;  %v1181_v36 = vmul.f32 %v2708_v16, %v2479_v17  ;;  %v1193_v9 = vmax.f32 %v1177_v40, 0.0  ;;  %v1205_v20 = vpack.c.bf16 %v1189_v39, %v1189_v39  ;;  %v1182_v22 = vmul.f32 %v2708_v16, %v2483_v43  ;;  %v3214_v49 = vld [vmem:[#allocation5_spill] sm:$0xff] }
 0x1b8   :  { %1165 = vst.msk [vmem:[%s3096_s2 + $0x30] sm:$0xf] %vm1152_vm4, %v1148_v63  ;;  %v1194_v41 = vmax.f32 %v1178_v46, 0.0  ;;  %v1206_v52 = vpack.c.bf16 %v1190_v27, %v1190_v27  ;;  %v1183_v17 = vmul.f32 %v2708_v16, %v3209_v37  ;;  %v1195_v4 = vmax.f32 %v1179_v32, 0.0  ;;  %v3215_v63 = vld [vmem:[#allocation7_spill] sm:$0xff] }
 0x1b9   :  { %1166 = vst.msk [vmem:[%s3096_s2 + $0x34] sm:$0xf] %vm1152_vm4, %v1149_v35  ;;  %v1207_v54 = vpack.c.bf16 %v1191_v60, %v1191_v60  ;;  %v1184_v43 = vmul.f32 %v2708_v16, %v3210_v51  ;;  %v1196_v38 = vmax.f32 %v1180_v12, 0.0  ;;  %v1208_v55 = vpack.c.bf16 %v1192_v50, %v1192_v50  ;;  %v3219_v50 = vld [vmem:[#allocation28_spill] sm:$0xff] }
 0x1ba   :  { %1167 = vst.msk [vmem:[%s3096_s2 + $0x38] sm:$0xf] %vm1152_vm4, %v1150_v44  ;;  %v1197_v21 = vmax.f32 %v1181_v36, 0.0  ;;  %v1209_v13 = vpack.c.bf16 %v1193_v9, %v1193_v9  ;;  %v1234_v25 = vmul.f32 %v2708_v16, %v3211_v53  ;;  %v1198_v14 = vmax.f32 %v1182_v22, 0.0 }
 0x1bb   :  { %1168 = vst.msk [vmem:[%s3096_s2 + $0x3c] sm:$0xf] %vm1152_vm4, %v1151_v5  ;;  %v1210_v2 = vpack.c.bf16 %v1194_v41, %v1194_v41  ;;  %v1235_v59 = vmul.f32 %v2708_v16, %v3212_v3  ;;  %v1199_v61 = vmax.f32 %v1183_v17, 0.0  ;;  %v1211_v34 = vpack.c.bf16 %v1195_v4, %v1195_v4 }
 0x1bc   :  { %1720 = vst.msk [vmem:[%s3096_s2 + $0x40] sm:$0xf] %vm1152_vm4, %v1201_v8  ;;  %v1236_v23 = vmul.f32 %v2708_v16, %v3213_v45  ;;  %v1200_v24 = vmax.f32 %v1184_v43, 0.0  ;;  %v1212_v48 = vpack.c.bf16 %v1196_v38, %v1196_v38  ;;  %v1237_v19 = vmul.f32 %v2708_v16, %v3214_v49 }
 0x1bd   :  { %1721 = vst.msk [vmem:[%s3096_s2 + $0x44] sm:$0xf] %vm1152_vm4, %v1202_v56  ;;  %v1213_v7 = vpack.c.bf16 %v1197_v21, %v1197_v21  ;;  %v1238_v30 = vmul.f32 %v2708_v16, %v3215_v63  ;;  %v1250_v26 = vmax.f32 %v1234_v25, 0.0  ;;  %v1214_v35 = vpack.c.bf16 %v1198_v14, %v1198_v14  ;;  %v3218_v56 = vld [vmem:[#allocation27_spill] sm:$0xff] }
 0x1be   :  { %1722 = vst.msk [vmem:[%s3096_s2 + $0x48] sm:$0xf] %vm1152_vm4, %v1203_v18  ;;  %v1239_v31 = vmul.f32 %v2708_v16, %v3216_v10  ;;  %v1251_v44 = vmax.f32 %v1235_v59, 0.0  ;;  %v1215_v62 = vpack.c.bf16 %v1199_v61, %v1199_v61  ;;  %v1240_v5 = vmul.f32 %v2708_v16, %v3217_v11  ;;  %v3227_v11 = vld [vmem:[#allocation13_spill] sm:$0xff] }
 0x1bf   :  { %1723 = vst.msk [vmem:[%s3096_s2 + $0x4c] sm:$0xf] %vm1152_vm4, %v1204_v47  ;;  %v1252_v1 = vmax.f32 %v1236_v23, 0.0  ;;  %v1216_v0 = vpack.c.bf16 %v1200_v24, %v1200_v24  ;;  %v1241_v40 = vmul.f32 %v2708_v16, %v2505_v28  ;;  %v1253_v39 = vmax.f32 %v1237_v19, 0.0  ;;  %v3224_v19 = vld [vmem:[#allocation8_spill] sm:$0xff] }
 0x1c0   :  { %1724 = vst.msk [vmem:[%s3096_s2 + $0x50] sm:$0xf] %vm1152_vm4, %v1205_v20  ;;  %v1242_v8 = vmul.f32 %v2708_v16, %v2518_v6  ;;  %v1254_v46 = vmax.f32 %v1238_v30, 0.0  ;;  %v1266_v27 = vpack.c.bf16 %v1250_v26, %v1250_v26  ;;  %v1243_v32 = vmul.f32 %v2708_v16, %v3218_v56  ;;  %v3225_v26 = vld [vmem:[#allocation11_spill] sm:$0xff] }
 0x1c1   :  { %1725 = vst.msk [vmem:[%s3096_s2 + $0x54] sm:$0xf] %vm1152_vm4, %v1206_v52  ;;  %v1255_v28 = vmax.f32 %v1239_v31, 0.0  ;;  %v1267_v60 = vpack.c.bf16 %v1251_v44, %v1251_v44  ;;  %v1244_v6 = vmul.f32 %v2708_v16, %v2546_v33  ;;  %v1256_v18 = vmax.f32 %v1240_v5, 0.0  ;;  %v3226_v31 = vld [vmem:[#allocation12_spill] sm:$0xff] }
 0x1c2   :  { %1726 = vst.msk [vmem:[%s3096_s2 + $0x58] sm:$0xf] %vm1152_vm4, %v1207_v54  ;;  %v1268_v12 = vpack.c.bf16 %v1252_v1, %v1252_v1  ;;  %v1245_v47 = vmul.f32 %v2708_v16, %v3219_v50  ;;  %v1257_v36 = vmax.f32 %v1241_v40, 0.0  ;;  %v1269_v9 = vpack.c.bf16 %v1253_v39, %v1253_v39  ;;  %v3228_v40 = vld [vmem:[#allocation14_spill] sm:$0xff]  ;;  %v3231_v50 = vld [vmem:[#allocation17_spill] sm:$0xff] }
 0x1c3   :  { %1727 = vst.msk [vmem:[%s3096_s2 + $0x5c] sm:$0xf] %vm1152_vm4, %v1208_v55  ;;  %v1246_v20 = vmul.f32 %v2708_v16, %v2563_v42  ;;  %v1258_v22 = vmax.f32 %v1242_v8, 0.0  ;;  %v1270_v41 = vpack.c.bf16 %v1254_v46, %v1254_v46  ;;  %v1247_v33 = vmul.f32 %v2708_v16, %v2574_v15 }
 0x1c4   :  { %1728 = vst.msk [vmem:[%s3096_s2 + $0x60] sm:$0xf] %vm1152_vm4, %v1209_v13  ;;  %v1259_v52 = vmax.f32 %v1243_v32, 0.0  ;;  %v1271_v37 = vpack.c.bf16 %v1255_v28, %v1255_v28  ;;  %v1248_v42 = vmul.f32 %v2708_v16, %v2590_v58  ;;  %v1260_v17 = vmax.f32 %v1244_v6, 0.0  ;;  %v3220_v58 = vld [vmem:[#allocation2_spill] sm:$0xff] }
 0x1c5   :  { %1729 = vst.msk [vmem:[%s3096_s2 + $0x64] sm:$0xf] %vm1152_vm4, %v1210_v2  ;;  %v1272_v4 = vpack.c.bf16 %v1256_v18, %v1256_v18  ;;  %v1249_v15 = vmul.f32 %v2708_v16, %v2594_v29  ;;  %v1261_v54 = vmax.f32 %v1245_v47, 0.0  ;;  %v1273_v51 = vpack.c.bf16 %v1257_v36, %v1257_v36  ;;  %v3221_v29 = vld [vmem:[#allocation3_spill] sm:$0xff]  ;;  %v3222_v2 = vld [vmem:[#allocation4_spill] sm:$0xff] }
 0x1c6   :  { %1730 = vst.msk [vmem:[%s3096_s2 + $0x68] sm:$0xf] %vm1152_vm4, %v1211_v34  ;;  %v1262_v43 = vmax.f32 %v1246_v20, 0.0  ;;  %v1274_v38 = vpack.c.bf16 %v1258_v22, %v1258_v22  ;;  %v1299_v55 = vmul.f32 %v2708_v16, %v3220_v58  ;;  %v1263_v21 = vmax.f32 %v1247_v33, 0.0  ;;  %v3223_v34 = vld [vmem:[#allocation6_spill] sm:$0xff] }
 0x1c7   :  { %1731 = vst.msk [vmem:[%s3096_s2 + $0x6c] sm:$0xf] %vm1152_vm4, %v1212_v48  ;;  %v1275_v13 = vpack.c.bf16 %v1259_v52, %v1259_v52  ;;  %v1300_v53 = vmul.f32 %v2708_v16, %v3221_v29  ;;  %v1264_v25 = vmax.f32 %v1248_v42, 0.0  ;;  %v1276_v14 = vpack.c.bf16 %v1260_v17, %v1260_v17  ;;  %v3232_v20 = vld [vmem:[#allocation18_spill] sm:$0xff]  ;;  %v3233_v52 = vld [vmem:[#allocation19_spill] sm:$0xff] }
 0x1c8   :  { %1732 = vst.msk [vmem:[%s3096_s2 + $0x70] sm:$0xf] %vm1152_vm4, %v1213_v7  ;;  %v1301_v3 = vmul.f32 %v2708_v16, %v3222_v2  ;;  %v1265_v59 = vmax.f32 %v1249_v15, 0.0  ;;  %v1277_v61 = vpack.c.bf16 %v1261_v54, %v1261_v54  ;;  %v1302_v45 = vmul.f32 %v2708_v16, %v3223_v34 }
 0x1c9   :  { %1733 = vst.msk [vmem:[%s3096_s2 + $0x74] sm:$0xf] %vm1152_vm4, %v1214_v35  ;;  %v1278_v23 = vpack.c.bf16 %v1262_v43, %v1262_v43  ;;  %v1303_v24 = vmul.f32 %v2708_v16, %v2601_v57  ;;  %v1315_v48 = vmax.f32 %v1299_v55, 0.0  ;;  %v1279_v49 = vpack.c.bf16 %v1263_v21, %v1263_v21 }
 0x1ca   :  { %1734 = vst.msk [vmem:[%s3096_s2 + $0x78] sm:$0xf] %vm1152_vm4, %v1215_v62  ;;  %v1304_v7 = vmul.f32 %v2708_v16, %v3224_v19  ;;  %v1316_v63 = vmax.f32 %v1300_v53, 0.0  ;;  %v1280_v30 = vpack.c.bf16 %v1264_v25, %v1264_v25  ;;  %v1305_v57 = vmul.f32 %v2708_v16, %v3225_v26 }
 0x1cb   :  { %1735 = vst.msk [vmem:[%s3096_s2 + $0x7c] sm:$0xf] %vm1152_vm4, %v1216_v0  ;;  %v1317_v35 = vmax.f32 %v1301_v3, 0.0  ;;  %v1281_v10 = vpack.c.bf16 %v1265_v59, %v1265_v59  ;;  %v1306_v44 = vmul.f32 %v2708_v16, %v3226_v31  ;;  %v1318_v62 = vmax.f32 %v1302_v45, 0.0 }
 0x1cc   :  { %1736 = vst.msk [vmem:[%s3096_s2 + $0x80] sm:$0xf] %vm1152_vm4, %v1266_v27  ;;  %v1307_v5 = vmul.f32 %v2708_v16, %v3227_v11  ;;  %v1319_v1 = vmax.f32 %v1303_v24, 0.0  ;;  %v1331_v0 = vpack.c.bf16 %v1315_v48, %v1315_v48  ;;  %v1308_v39 = vmul.f32 %v2708_v16, %v3228_v40  ;;  %v3229_v27 = vld [vmem:[#allocation15_spill] sm:$0xff] }
 0x1cd   :  { %1737 = vst.msk [vmem:[%s3096_s2 + $0x84] sm:$0xf] %vm1152_vm4, %v1267_v60  ;;  %v1320_v8 = vmax.f32 %v1304_v7, 0.0  ;;  %v1332_v46 = vpack.c.bf16 %v1316_v63, %v1316_v63  ;;  %v1309_v56 = vmul.f32 %v2708_v16, %v3229_v27  ;;  %v1321_v32 = vmax.f32 %v1305_v57, 0.0  ;;  %v3230_v60 = vld [vmem:[#allocation16_spill] sm:$0xff] }
 0x1ce   :  { %1738 = vst.msk [vmem:[%s3096_s2 + $0x88] sm:$0xf] %vm1152_vm4, %v1268_v12  ;;  %v1333_v28 = vpack.c.bf16 %v1317_v35, %v1317_v35  ;;  %v1310_v6 = vmul.f32 %v2708_v16, %v3230_v60  ;;  %v1322_v18 = vmax.f32 %v1306_v44, 0.0  ;;  %v1334_v12 = vpack.c.bf16 %v1318_v62, %v1318_v62 }
 0x1cf   :  { %1739 = vst.msk [vmem:[%s3096_s2 + $0x8c] sm:$0xf] %vm1152_vm4, %v1269_v9  ;;  %v1311_v47 = vmul.f32 %v2708_v16, %v3231_v50  ;;  %v1323_v36 = vmax.f32 %v1307_v5, 0.0  ;;  %v1335_v9 = vpack.c.bf16 %v1319_v1, %v1319_v1  ;;  %v1312_v22 = vmul.f32 %v2708_v16, %v3232_v20 }
 0x1d0   :  { %1740 = vst.msk [vmem:[%s3096_s2 + $0x90] sm:$0xf] %vm1152_vm4, %v1270_v41  ;;  %v1324_v41 = vmax.f32 %v1308_v39, 0.0  ;;  %v1336_v33 = vpack.c.bf16 %v1320_v8, %v1320_v8  ;;  %v1325_v42 = vmax.f32 %v1309_v56, 0.0  ;;  %v1337_v17 = vpack.c.bf16 %v1321_v32, %v1321_v32 }
 0x1d1   :  { %1741 = vst.msk [vmem:[%s3096_s2 + $0x94] sm:$0xf] %vm1152_vm4, %v1271_v37  ;;  %v1313_v37 = vmul.f32 %v2708_v16, %v3233_v52  ;;  %v1326_v54 = vmax.f32 %v1310_v6, 0.0  ;;  %v1327_v43 = vmax.f32 %v1311_v47, 0.0  ;;  %v1328_v58 = vmax.f32 %v1312_v22, 0.0 }
 0x1d2   :  { %1742 = vst.msk [vmem:[%s3096_s2 + $0x98] sm:$0xf] %vm1152_vm4, %v1272_v4  ;;  %v3234_v4 = vld [vmem:[#allocation29_spill] sm:$0xff]  ;;  %v1340_v55 = vpack.c.bf16 %v1324_v41, %v1324_v41  ;;  %v1341_v21 = vpack.c.bf16 %v1325_v42, %v1325_v42 }
 0x1d3   :  { %1743 = vst.msk [vmem:[%s3096_s2 + $0x9c] sm:$0xf] %vm1152_vm4, %v1273_v51  ;;  %v1314_v15 = vmul.f32 %v2708_v16, %v3234_v4  ;;  %v1338_v51 = vpack.c.bf16 %v1322_v18, %v1322_v18  ;;  %v1329_v16 = vmax.f32 %v1313_v37, 0.0  ;;  %v1342_v29 = vpack.c.bf16 %v1326_v54, %v1326_v54 }
 0x1d4   :  { %1744 = vst.msk [vmem:[%s3096_s2 + $0xa0] sm:$0xf] %vm1152_vm4, %v1274_v38  ;;  %v1339_v38 = vpack.c.bf16 %v1323_v36, %v1323_v36  ;;  %v1343_v53 = vpack.c.bf16 %v1327_v43, %v1327_v43  ;;  %v1344_v25 = vpack.c.bf16 %v1328_v58, %v1328_v58 }
 0x1d5   :  { %1745 = vst.msk [vmem:[%s3096_s2 + $0xa4] sm:$0xf] %vm1152_vm4, %v1275_v13  ;;  %v1330_v13 = vmax.f32 %v1314_v15, 0.0 }
 0x1d6   :  { %1746 = vst.msk [vmem:[%s3096_s2 + $0xa8] sm:$0xf] %vm1152_vm4, %v1276_v14  ;;  %v1345_v14 = vpack.c.bf16 %v1329_v16, %v1329_v16 }
 0x1d7   :  { %1747 = vst.msk [vmem:[%s3096_s2 + $0xac] sm:$0xf] %vm1152_vm4, %v1277_v61  ;;  %v1346_v2 = vpack.c.bf16 %v1330_v13, %v1330_v13 }
 0x1d8   :  { %1748 = vst.msk [vmem:[%s3096_s2 + $0xb0] sm:$0xf] %vm1152_vm4, %v1278_v23 }
 0x1d9   :  { %1749 = vst.msk [vmem:[%s3096_s2 + $0xb4] sm:$0xf] %vm1152_vm4, %v1279_v49 }
 0x1da   :  { %1750 = vst.msk [vmem:[%s3096_s2 + $0xb8] sm:$0xf] %vm1152_vm4, %v1280_v30 }
 0x1db   :  { %1751 = vst.msk [vmem:[%s3096_s2 + $0xbc] sm:$0xf] %vm1152_vm4, %v1281_v10 }
 0x1dc   :  { %1752 = vst.msk [vmem:[%s3096_s2 + $0xc0] sm:$0xf] %vm1152_vm4, %v1331_v0 }
 0x1dd   :  { %1753 = vst.msk [vmem:[%s3096_s2 + $0xc4] sm:$0xf] %vm1152_vm4, %v1332_v46 }
 0x1de   :  { %1754 = vst.msk [vmem:[%s3096_s2 + $0xc8] sm:$0xf] %vm1152_vm4, %v1333_v28 }
 0x1df   :  { %1755 = vst.msk [vmem:[%s3096_s2 + $0xcc] sm:$0xf] %vm1152_vm4, %v1334_v12 }
 0x1e0   :  { %1756 = vst.msk [vmem:[%s3096_s2 + $0xd0] sm:$0xf] %vm1152_vm4, %v1335_v9 }
 0x1e1   :  { %1757 = vst.msk [vmem:[%s3096_s2 + $0xd4] sm:$0xf] %vm1152_vm4, %v1336_v33 }
 0x1e2   :  { %1758 = vst.msk [vmem:[%s3096_s2 + $0xd8] sm:$0xf] %vm1152_vm4, %v1337_v17 }
 0x1e3   :  { %1759 = vst.msk [vmem:[%s3096_s2 + $0xdc] sm:$0xf] %vm1152_vm4, %v1338_v51 }
 0x1e4   :  { %1760 = vst.msk [vmem:[%s3096_s2 + $0xe0] sm:$0xf] %vm1152_vm4, %v1339_v38 }
 0x1e5   :  { %1761 = vst.msk [vmem:[%s3096_s2 + $0xe4] sm:$0xf] %vm1152_vm4, %v1340_v55 }
 0x1e6   :  { %1762 = vst.msk [vmem:[%s3096_s2 + $0xe8] sm:$0xf] %vm1152_vm4, %v1341_v21 }
 0x1e7   :  { %1763 = vst.msk [vmem:[%s3096_s2 + $0xec] sm:$0xf] %vm1152_vm4, %v1342_v29 }
 0x1e8   :  { %1764 = vst.msk [vmem:[%s3096_s2 + $0xf0] sm:$0xf] %vm1152_vm4, %v1343_v53 }
 0x1e9   :  { %1765 = vst.msk [vmem:[%s3096_s2 + $0xf4] sm:$0xf] %vm1152_vm4, %v1344_v25 }
 0x1ea   :  { %1766 = vst.msk [vmem:[%s3096_s2 + $0xf8] sm:$0xf] %vm1152_vm4, %v1345_v14 }
 0x1eb   :  { %1767 = vst.msk [vmem:[%s3096_s2 + $0xfc] sm:$0xf] %vm1152_vm4, %v1346_v2 }

// kernel: presgan_forward.7
= control target key start
LH: loop header
LB: loop body
LE: loop exit
PB: predicated region body
PF: predicated region fallthrough
CT: control target
= control target key end

     0   :  { %vm268_vm0 = vcmask 523264   ;;  %s6372_s1 = inlined_call_operand.vmem [shape: bf16[4,64,128], index: 1, kind: input, shape index: {}]   ;;  %s6373_s0 = inlined_call_operand.vmem [shape: bf16[4,512,64], index: 0, kind: input, shape index: {}]   ;;  %s6374_s2 = inlined_call_operand.vmem [shape: bf16[4,512,128], index: 2, kind: output, shape index: {}]  }
   0x1   :  { %v4025_v0 = vld [vmem:[%s6372_s1 + $0x18] sm:$0xff]  ;;  %v4024_v4 = vld [vmem:[%s6372_s1 + $0x10] sm:$0xff]  ;;  %v4023_v8 = vld [vmem:[%s6372_s1 + $0x8] sm:$0xff] }
   0x2   :  { %v4061_v1 = vld [vmem:[%s6372_s1 + $0x38] sm:$0xff]  ;;  %369 = vmatpush.bf16.msra.mxu0 %v4025_v0  ;;  %v4060_v5 = vld [vmem:[%s6372_s1 + $0x30] sm:$0xff]  ;;  %v4059_v9 = vld [vmem:[%s6372_s1 + $0x28] sm:$0xff] }
   0x3   :  { %v4097_v2 = vld [vmem:[%s6372_s1 + $0x58] sm:$0xff]  ;;  %1084 = vmatpush.bf16.msra.mxu1 %v4061_v1  ;;  %v4096_v6 = vld [vmem:[%s6372_s1 + $0x50] sm:$0xff]  ;;  %v4095_v10 = vld [vmem:[%s6372_s1 + $0x48] sm:$0xff] }
   0x4   :  { %v4133_v3 = vld [vmem:[%s6372_s1 + $0x78] sm:$0xff]  ;;  %1800 = vmatpush.bf16.msra.mxu2 %v4097_v2  ;;  %v4132_v7 = vld [vmem:[%s6372_s1 + $0x70] sm:$0xff]  ;;  %v4131_v11 = vld [vmem:[%s6372_s1 + $0x68] sm:$0xff] }
   0x5   :  { %2516 = vmatpush.bf16.msra.mxu3 %v4133_v3  ;;  %v4022_v12 = vld [vmem:[%s6372_s1] sm:$0xff]  ;;  %v3991_v20 = vld [vmem:[%s6373_s0 + $0x8] sm:$0xff]  ;;  %v3992_v24 = vld [vmem:[%s6373_s0 + $0x10] sm:$0xff] }
   0x6   :  { %370 = vmatpush.bf16.msra.mxu0 %v4024_v4  ;;  %v4058_v13 = vld [vmem:[%s6372_s1 + $0x20] sm:$0xff]  ;;  %v4027_v21 = vld [vmem:[%s6373_s0 + $0x108] sm:$0xff]  ;;  %v4028_v25 = vld [vmem:[%s6373_s0 + $0x110] sm:$0xff] }
   0x7   :  { %1085 = vmatpush.bf16.msra.mxu1 %v4060_v5  ;;  %v4094_v14 = vld [vmem:[%s6372_s1 + $0x40] sm:$0xff]  ;;  %v4063_v22 = vld [vmem:[%s6373_s0 + $0x208] sm:$0xff]  ;;  %v4064_v26 = vld [vmem:[%s6373_s0 + $0x210] sm:$0xff] }
   0x8   :  { %1801 = vmatpush.bf16.msra.mxu2 %v4096_v6  ;;  %v4130_v15 = vld [vmem:[%s6372_s1 + $0x60] sm:$0xff]  ;;  %v4099_v23 = vld [vmem:[%s6373_s0 + $0x308] sm:$0xff]  ;;  %v4100_v27 = vld [vmem:[%s6373_s0 + $0x310] sm:$0xff] }
   0x9   :  { %2517 = vmatpush.bf16.msra.mxu3 %v4132_v7  ;;  %v3990_v16 = vld [vmem:[%s6373_s0] sm:$0xff]  ;;  %v3993_v28 = vld [vmem:[%s6373_s0 + $0x18] sm:$0xff]  ;;  %v3995_v36 = vld [vmem:[%s6373_s0 + $0x28] sm:$0xff] }
   0xa   :  { %371 = vmatpush.bf16.msra.mxu0 %v4023_v8  ;;  %v4026_v17 = vld [vmem:[%s6373_s0 + $0x100] sm:$0xff]  ;;  %v4029_v29 = vld [vmem:[%s6373_s0 + $0x118] sm:$0xff]  ;;  %v4031_v37 = vld [vmem:[%s6373_s0 + $0x128] sm:$0xff] }
   0xb   :  { %1086 = vmatpush.bf16.msra.mxu1 %v4059_v9  ;;  %v4062_v18 = vld [vmem:[%s6373_s0 + $0x200] sm:$0xff]  ;;  %v4065_v30 = vld [vmem:[%s6373_s0 + $0x218] sm:$0xff]  ;;  %v4067_v38 = vld [vmem:[%s6373_s0 + $0x228] sm:$0xff] }
   0xc   :  { %1802 = vmatpush.bf16.msra.mxu2 %v4095_v10  ;;  %v4098_v19 = vld [vmem:[%s6373_s0 + $0x300] sm:$0xff]  ;;  %v4101_v31 = vld [vmem:[%s6373_s0 + $0x318] sm:$0xff]  ;;  %v4103_v39 = vld [vmem:[%s6373_s0 + $0x328] sm:$0xff] }
   0xd   :  { %2518 = vmatpush.bf16.msra.mxu3 %v4131_v11  ;;  %v3994_v32 = vld [vmem:[%s6373_s0 + $0x20] sm:$0xff]  ;;  %v3996_v40 = vld [vmem:[%s6373_s0 + $0x30] sm:$0xff]  ;;  %v3997_v44 = vld [vmem:[%s6373_s0 + $0x38] sm:$0xff] }
   0xe   :  { %372 = vmatpush.bf16.msra.mxu0 %v4022_v12  ;;  %v4030_v33 = vld [vmem:[%s6373_s0 + $0x120] sm:$0xff]  ;;  %v4032_v41 = vld [vmem:[%s6373_s0 + $0x130] sm:$0xff]  ;;  %v4033_v45 = vld [vmem:[%s6373_s0 + $0x138] sm:$0xff] }
   0xf   :  { %1087 = vmatpush.bf16.msra.mxu1 %v4058_v13  ;;  %v4066_v34 = vld [vmem:[%s6373_s0 + $0x220] sm:$0xff]  ;;  %v4068_v42 = vld [vmem:[%s6373_s0 + $0x230] sm:$0xff]  ;;  %v4069_v46 = vld [vmem:[%s6373_s0 + $0x238] sm:$0xff] }
  0x10   :  { %1803 = vmatpush.bf16.msra.mxu2 %v4094_v14  ;;  %v4102_v35 = vld [vmem:[%s6373_s0 + $0x320] sm:$0xff]  ;;  %v4104_v43 = vld [vmem:[%s6373_s0 + $0x330] sm:$0xff]  ;;  %v4105_v47 = vld [vmem:[%s6373_s0 + $0x338] sm:$0xff] }
  0x11   :  { %2519 = vmatpush.bf16.msra.mxu3 %v4130_v15  ;;  %3022 = vmatmul.msk.bf16.vlgmr.msra.gmra.mxu0 %vm268_vm0, %v3990_v16  ;;  %v3998_v48 = vld [vmem:[%s6373_s0 + $0x40] sm:$0xff]  ;;  %v3999_v62 = vld [vmem:[%s6373_s0 + $0x48] sm:$0xff] }
  0x12   :  { %3270 = vmatmul.msk.bf16.vlgmr.msra.gmra.mxu1 %vm268_vm0, %v4026_v17  ;;  %v4034_v49 = vld [vmem:[%s6373_s0 + $0x140] sm:$0xff]  ;;  %v4035_v63 = vld [vmem:[%s6373_s0 + $0x148] sm:$0xff] }
  0x13   :  { %3582 = vmatmul.msk.bf16.vlgmr.msra.gmra.mxu2 %vm268_vm0, %v4062_v18  ;;  %v4070_v52 = vld [vmem:[%s6373_s0 + $0x240] sm:$0xff]  ;;  %v4071_v3 = vld [vmem:[%s6373_s0 + $0x248] sm:$0xff] }
  0x14   :  { %3894 = vmatmul.msk.bf16.vlgmr.msra.gmra.mxu3 %vm268_vm0, %v4098_v19  ;;  %v4106_v53 = vld [vmem:[%s6373_s0 + $0x340] sm:$0xff]  ;;  %v4107_v4 = vld [vmem:[%s6373_s0 + $0x348] sm:$0xff] }
  0x21   :  { %3023 = vmatmul.msk.bf16.gmra.mxu0 %vm268_vm0, %v3991_v20 }
  0x22   :  { %3271 = vmatmul.msk.bf16.gmra.mxu1 %vm268_vm0, %v4027_v21 }
  0x23   :  { %3583 = vmatmul.msk.bf16.gmra.mxu2 %vm268_vm0, %v4063_v22  ;;  %v4000_v22 = vld [vmem:[%s6373_s0 + $0x50] sm:$0xff] }
  0x24   :  { %3895 = vmatmul.msk.bf16.gmra.mxu3 %vm268_vm0, %v4099_v23  ;;  %v4036_v23 = vld [vmem:[%s6373_s0 + $0x150] sm:$0xff] }
  0x31   :  { %3024 = vmatmul.msk.bf16.gmra.mxu0 %vm268_vm0, %v3992_v24 }
  0x32   :  { %3272 = vmatmul.msk.bf16.gmra.mxu1 %vm268_vm0, %v4028_v25 }
  0x33   :  { %3584 = vmatmul.msk.bf16.gmra.mxu2 %vm268_vm0, %v4064_v26 }
  0x34   :  { %3896 = vmatmul.msk.bf16.gmra.mxu3 %vm268_vm0, %v4100_v27  ;;  %v4072_v27 = vld [vmem:[%s6373_s0 + $0x250] sm:$0xff] }
  0x41   :  { %3025 = vmatmul.msk.bf16.gmra.mxu0 %vm268_vm0, %v3993_v28  ;;  %v4108_v28 = vld [vmem:[%s6373_s0 + $0x350] sm:$0xff] }
  0x42   :  { %3273 = vmatmul.msk.bf16.gmra.mxu1 %vm268_vm0, %v4029_v29 }
  0x43   :  { %3585 = vmatmul.msk.bf16.gmra.mxu2 %vm268_vm0, %v4065_v30 }
  0x44   :  { %3897 = vmatmul.msk.bf16.gmra.mxu3 %vm268_vm0, %v4101_v31 }
  0x51   :  { %3026 = vmatmul.msk.bf16.gmra.mxu0 %vm268_vm0, %v3994_v32 }
  0x52   :  { %3274 = vmatmul.msk.bf16.gmra.mxu1 %vm268_vm0, %v4030_v33 }
  0x53   :  { %3586 = vmatmul.msk.bf16.gmra.mxu2 %vm268_vm0, %v4066_v34 }
  0x54   :  { %3898 = vmatmul.msk.bf16.gmra.mxu3 %vm268_vm0, %v4102_v35 }
  0x61   :  { %3027 = vmatmul.msk.bf16.gmra.mxu0 %vm268_vm0, %v3995_v36 }
  0x62   :  { %3275 = vmatmul.msk.bf16.gmra.mxu1 %vm268_vm0, %v4031_v37 }
  0x63   :  { %3587 = vmatmul.msk.bf16.gmra.mxu2 %vm268_vm0, %v4067_v38 }
  0x64   :  { %3899 = vmatmul.msk.bf16.gmra.mxu3 %vm268_vm0, %v4103_v39 }
  0x71   :  { %3028 = vmatmul.msk.bf16.gmra.mxu0 %vm268_vm0, %v3996_v40 }
  0x72   :  { %3276 = vmatmul.msk.bf16.gmra.mxu1 %vm268_vm0, %v4032_v41 }
  0x73   :  { %3588 = vmatmul.msk.bf16.gmra.mxu2 %vm268_vm0, %v4068_v42 }
  0x74   :  { %3900 = vmatmul.msk.bf16.gmra.mxu3 %vm268_vm0, %v4104_v43 }
  0x81   :  { %3029 = vmatmul.msk.bf16.gmra.mxu0 %vm268_vm0, %v3997_v44 }
  0x82   :  { %3277 = vmatmul.msk.bf16.gmra.mxu1 %vm268_vm0, %v4033_v45 }
  0x83   :  { %3589 = vmatmul.msk.bf16.gmra.mxu2 %vm268_vm0, %v4069_v46  ;;  %v4001_v46 = vld [vmem:[%s6373_s0 + $0x58] sm:$0xff] }
  0x84   :  { %3901 = vmatmul.msk.bf16.gmra.mxu3 %vm268_vm0, %v4105_v47  ;;  %v4037_v47 = vld [vmem:[%s6373_s0 + $0x158] sm:$0xff] }
  0x8e   :  { %v374_v50 = vpop.f32.mrf.mxu0 }
  0x8f   :  { %v1089_v51 = vpop.f32.mrf.mxu1  ;;  %4901 = vtanh.f32 %v374_v50 }
  0x90   :  { %4903 = vtanh.f32 %v1089_v51  ;;  %v4073_v51 = vld [vmem:[%s6373_s0 + $0x258] sm:$0xff] }
  0x91   :  { %3030 = vmatmul.msk.bf16.gmra.mxu0 %vm268_vm0, %v3998_v48 }
  0x92   :  { %3278 = vmatmul.msk.bf16.gmra.mxu1 %vm268_vm0, %v4034_v49 }
  0x93   :  { %3590 = vmatmul.msk.bf16.gmra.mxu2 %vm268_vm0, %v4070_v52  ;;  %v4109_v52 = vld [vmem:[%s6373_s0 + $0x358] sm:$0xff] }
  0x94   :  { %3902 = vmatmul.msk.bf16.gmra.mxu3 %vm268_vm0, %v4106_v53 }
  0x95   :  { %v4902_v58 = vpop.eup %4901 }
  0x96   :  { %v1805_v54 = vpop.f32.mrf.mxu2  ;;  %v376_v56 = vpop.f32.mrf.mxu0 }
  0x97   :  { %v2521_v55 = vpop.f32.mrf.mxu3  ;;  %v1091_v57 = vpop.f32.mrf.mxu1  ;;  %4905 = vtanh.f32 %v376_v56 }
  0x98   :  { %4907 = vtanh.f32 %v1091_v57  ;;  %v4904_v59 = vpop.eup %4903 }
  0x99   :  { %4909 = vtanh.f32 %v1805_v54 }
  0x9a   :  { %4911 = vtanh.f32 %v2521_v55 }
  0x9d   :  { %v4906_v0 = vpop.eup %4905 }
  0x9e   :  { %v1807_v60 = vpop.f32.mrf.mxu2  ;;  %v379_v1 = vpop.f32.mrf.mxu0  ;;  %v4137_v6 = vpack.c.bf16 %v4906_v0, %v4902_v58 }
  0x9f   :  { %v2523_v61 = vpop.f32.mrf.mxu3  ;;  %4913 = vtanh.f32 %v1807_v60  ;;  %v1094_v2 = vpop.f32.mrf.mxu1 }
  0xa0   :  { %v4908_v5 = vpop.eup %4907  ;;  %4915 = vtanh.f32 %v2523_v61  ;;  %4138 = vst [vmem:[%s6374_s2] sm:$0xff] %v4137_v6   ;;  %v4002_v6 = vld [vmem:[%s6373_s0 + $0x60] sm:$0xff] }
  0xa1   :  { %v4297_v7 = vpack.c.bf16 %v4908_v5, %v4904_v59  ;;  %3031 = vmatmul.msk.bf16.gmra.mxu0 %vm268_vm0, %v3999_v62  ;;  %v4910_v8 = vpop.eup %4909  ;;  %4917 = vtanh.f32 %v379_v1 }
  0xa2   :  { %3279 = vmatmul.msk.bf16.gmra.mxu1 %vm268_vm0, %v4035_v63  ;;  %v4912_v9 = vpop.eup %4911  ;;  %4919 = vtanh.f32 %v1094_v2 }
  0xa3   :  { %4805 = vst [vmem:[%s6374_s2 + $0x100] sm:$0xff] %v4297_v7   ;;  %3591 = vmatmul.msk.bf16.gmra.mxu2 %vm268_vm0, %v4071_v3  ;;  %v4038_v7 = vld [vmem:[%s6373_s0 + $0x160] sm:$0xff] }
  0xa4   :  { %3903 = vmatmul.msk.bf16.gmra.mxu3 %vm268_vm0, %v4107_v4 }
  0xa5   :  { %v4914_v10 = vpop.eup %4913 }
  0xa6   :  { %v4916_v11 = vpop.eup %4915  ;;  %v4457_v12 = vpack.c.bf16 %v4914_v10, %v4910_v8  ;;  %v1810_v13 = vpop.f32.mrf.mxu2 }
  0xa7   :  { %v2526_v14 = vpop.f32.mrf.mxu3  ;;  %v4617_v15 = vpack.c.bf16 %v4916_v11, %v4912_v9  ;;  %v381_v16 = vpop.f32.mrf.mxu0  ;;  %v4074_v11 = vld [vmem:[%s6373_s0 + $0x260] sm:$0xff] }
  0xa8   :  { %v1096_v17 = vpop.f32.mrf.mxu1  ;;  %4837 = vst [vmem:[%s6374_s2 + $0x200] sm:$0xff] %v4457_v12   ;;  %4921 = vtanh.f32 %v381_v16  ;;  %v4918_v18 = vpop.eup %4917  ;;  %v4110_v12 = vld [vmem:[%s6373_s0 + $0x360] sm:$0xff] }
  0xa9   :  { %4869 = vst [vmem:[%s6374_s2 + $0x300] sm:$0xff] %v4617_v15   ;;  %4923 = vtanh.f32 %v1096_v17  ;;  %v4920_v19 = vpop.eup %4919 }
  0xaa   :  { %4925 = vtanh.f32 %v1810_v13 }
  0xab   :  { %4927 = vtanh.f32 %v2526_v14 }
  0xae   :  { %v1812_v20 = vpop.f32.mrf.mxu2  ;;  %v4922_v24 = vpop.eup %4921 }
  0xaf   :  { %v2528_v21 = vpop.f32.mrf.mxu3  ;;  %4929 = vtanh.f32 %v1812_v20  ;;  %v384_v25 = vpop.f32.mrf.mxu0  ;;  %v4142_v30 = vpack.c.bf16 %v4922_v24, %v4918_v18 }
  0xb0   :  { %v1099_v26 = vpop.f32.mrf.mxu1  ;;  %v4924_v29 = vpop.eup %4923  ;;  %4931 = vtanh.f32 %v2528_v21 }
  0xb1   :  { %v4302_v31 = vpack.c.bf16 %v4924_v29, %v4920_v19  ;;  %4774 = vst [vmem:[%s6374_s2 + $0x8] sm:$0xff] %v4142_v30   ;;  %3032 = vmatmul.msk.bf16.gmra.mxu0 %vm268_vm0, %v4000_v22  ;;  %v4926_v32 = vpop.eup %4925  ;;  %4933 = vtanh.f32 %v384_v25  ;;  %v4003_v30 = vld [vmem:[%s6373_s0 + $0x68] sm:$0xff] }
  0xb2   :  { %3280 = vmatmul.msk.bf16.gmra.mxu1 %vm268_vm0, %v4036_v23  ;;  %v4928_v33 = vpop.eup %4927  ;;  %4935 = vtanh.f32 %v1099_v26 }
  0xb3   :  { %4806 = vst [vmem:[%s6374_s2 + $0x108] sm:$0xff] %v4302_v31   ;;  %3592 = vmatmul.msk.bf16.gmra.mxu2 %vm268_vm0, %v4072_v27  ;;  %v4039_v31 = vld [vmem:[%s6373_s0 + $0x168] sm:$0xff] }
  0xb4   :  { %3904 = vmatmul.msk.bf16.gmra.mxu3 %vm268_vm0, %v4108_v28 }
  0xb5   :  { %v4930_v34 = vpop.eup %4929 }
  0xb6   :  { %v4932_v35 = vpop.eup %4931  ;;  %v4462_v36 = vpack.c.bf16 %v4930_v34, %v4926_v32  ;;  %v1815_v37 = vpop.f32.mrf.mxu2 }
  0xb7   :  { %v2531_v38 = vpop.f32.mrf.mxu3  ;;  %v4622_v39 = vpack.c.bf16 %v4932_v35, %v4928_v33  ;;  %v386_v40 = vpop.f32.mrf.mxu0  ;;  %v4075_v35 = vld [vmem:[%s6373_s0 + $0x268] sm:$0xff] }
  0xb8   :  { %v1101_v41 = vpop.f32.mrf.mxu1  ;;  %4838 = vst [vmem:[%s6374_s2 + $0x208] sm:$0xff] %v4462_v36   ;;  %4937 = vtanh.f32 %v386_v40  ;;  %v4934_v42 = vpop.eup %4933  ;;  %v4111_v36 = vld [vmem:[%s6373_s0 + $0x368] sm:$0xff] }
  0xb9   :  { %4870 = vst [vmem:[%s6374_s2 + $0x308] sm:$0xff] %v4622_v39   ;;  %4939 = vtanh.f32 %v1101_v41  ;;  %v4936_v43 = vpop.eup %4935 }
  0xba   :  { %4941 = vtanh.f32 %v1815_v37 }
  0xbb   :  { %4943 = vtanh.f32 %v2531_v38 }
  0xbe   :  { %v1817_v44 = vpop.f32.mrf.mxu2  ;;  %v4938_v48 = vpop.eup %4937 }
  0xbf   :  { %v2533_v45 = vpop.f32.mrf.mxu3  ;;  %4945 = vtanh.f32 %v1817_v44  ;;  %v389_v49 = vpop.f32.mrf.mxu0  ;;  %v4147_v54 = vpack.c.bf16 %v4938_v48, %v4934_v42 }
  0xc0   :  { %v1104_v50 = vpop.f32.mrf.mxu1  ;;  %v4940_v53 = vpop.eup %4939  ;;  %4947 = vtanh.f32 %v2533_v45 }
  0xc1   :  { %v4307_v55 = vpack.c.bf16 %v4940_v53, %v4936_v43  ;;  %4775 = vst [vmem:[%s6374_s2 + $0x10] sm:$0xff] %v4147_v54   ;;  %3033 = vmatmul.msk.bf16.gmra.mxu0 %vm268_vm0, %v4001_v46  ;;  %v4942_v56 = vpop.eup %4941  ;;  %4949 = vtanh.f32 %v389_v49  ;;  %v4004_v54 = vld [vmem:[%s6373_s0 + $0x70] sm:$0xff] }
  0xc2   :  { %3281 = vmatmul.msk.bf16.gmra.mxu1 %vm268_vm0, %v4037_v47  ;;  %v4944_v57 = vpop.eup %4943  ;;  %4951 = vtanh.f32 %v1104_v50 }
  0xc3   :  { %4807 = vst [vmem:[%s6374_s2 + $0x110] sm:$0xff] %v4307_v55   ;;  %3593 = vmatmul.msk.bf16.gmra.mxu2 %vm268_vm0, %v4073_v51  ;;  %v4040_v55 = vld [vmem:[%s6373_s0 + $0x170] sm:$0xff] }
  0xc4   :  { %3905 = vmatmul.msk.bf16.gmra.mxu3 %vm268_vm0, %v4109_v52 }
  0xc5   :  { %v4946_v58 = vpop.eup %4945 }
  0xc6   :  { %v4948_v59 = vpop.eup %4947  ;;  %v4467_v60 = vpack.c.bf16 %v4946_v58, %v4942_v56  ;;  %v1820_v61 = vpop.f32.mrf.mxu2 }
  0xc7   :  { %v2536_v62 = vpop.f32.mrf.mxu3  ;;  %v4627_v63 = vpack.c.bf16 %v4948_v59, %v4944_v57  ;;  %v391_v0 = vpop.f32.mrf.mxu0  ;;  %v4076_v59 = vld [vmem:[%s6373_s0 + $0x270] sm:$0xff] }
  0xc8   :  { %v1106_v1 = vpop.f32.mrf.mxu1  ;;  %4839 = vst [vmem:[%s6374_s2 + $0x210] sm:$0xff] %v4467_v60   ;;  %4953 = vtanh.f32 %v391_v0  ;;  %v4950_v2 = vpop.eup %4949  ;;  %v4112_v60 = vld [vmem:[%s6373_s0 + $0x370] sm:$0xff] }
  0xc9   :  { %4871 = vst [vmem:[%s6374_s2 + $0x310] sm:$0xff] %v4627_v63   ;;  %4955 = vtanh.f32 %v1106_v1  ;;  %v4952_v3 = vpop.eup %4951 }
  0xca   :  { %4957 = vtanh.f32 %v1820_v61 }
  0xcb   :  { %4959 = vtanh.f32 %v2536_v62 }
  0xce   :  { %v1822_v4 = vpop.f32.mrf.mxu2  ;;  %v4954_v8 = vpop.eup %4953 }
  0xcf   :  { %v2538_v5 = vpop.f32.mrf.mxu3  ;;  %4961 = vtanh.f32 %v1822_v4  ;;  %v394_v9 = vpop.f32.mrf.mxu0  ;;  %v4152_v14 = vpack.c.bf16 %v4954_v8, %v4950_v2 }
  0xd0   :  { %v1109_v10 = vpop.f32.mrf.mxu1  ;;  %v4956_v13 = vpop.eup %4955  ;;  %4963 = vtanh.f32 %v2538_v5 }
  0xd1   :  { %v4312_v15 = vpack.c.bf16 %v4956_v13, %v4952_v3  ;;  %4776 = vst [vmem:[%s6374_s2 + $0x18] sm:$0xff] %v4152_v14   ;;  %3034 = vmatmul.msk.bf16.gmra.mxu0 %vm268_vm0, %v4002_v6  ;;  %v4958_v16 = vpop.eup %4957  ;;  %4965 = vtanh.f32 %v394_v9  ;;  %v4005_v14 = vld [vmem:[%s6373_s0 + $0x78] sm:$0xff] }
  0xd2   :  { %3282 = vmatmul.msk.bf16.gmra.mxu1 %vm268_vm0, %v4038_v7  ;;  %v4960_v17 = vpop.eup %4959  ;;  %4967 = vtanh.f32 %v1109_v10 }
  0xd3   :  { %4808 = vst [vmem:[%s6374_s2 + $0x118] sm:$0xff] %v4312_v15   ;;  %3594 = vmatmul.msk.bf16.gmra.mxu2 %vm268_vm0, %v4074_v11  ;;  %v4041_v15 = vld [vmem:[%s6373_s0 + $0x178] sm:$0xff] }
  0xd4   :  { %3906 = vmatmul.msk.bf16.gmra.mxu3 %vm268_vm0, %v4110_v12 }
  0xd5   :  { %v4962_v18 = vpop.eup %4961 }
  0xd6   :  { %v4964_v19 = vpop.eup %4963  ;;  %v4472_v20 = vpack.c.bf16 %v4962_v18, %v4958_v16  ;;  %v1825_v21 = vpop.f32.mrf.mxu2 }
  0xd7   :  { %v2541_v22 = vpop.f32.mrf.mxu3  ;;  %v4632_v23 = vpack.c.bf16 %v4964_v19, %v4960_v17  ;;  %v396_v24 = vpop.f32.mrf.mxu0  ;;  %v4077_v19 = vld [vmem:[%s6373_s0 + $0x278] sm:$0xff] }
  0xd8   :  { %v1111_v25 = vpop.f32.mrf.mxu1  ;;  %4840 = vst [vmem:[%s6374_s2 + $0x218] sm:$0xff] %v4472_v20   ;;  %4969 = vtanh.f32 %v396_v24  ;;  %v4966_v26 = vpop.eup %4965  ;;  %v4113_v20 = vld [vmem:[%s6373_s0 + $0x378] sm:$0xff] }
  0xd9   :  { %4872 = vst [vmem:[%s6374_s2 + $0x318] sm:$0xff] %v4632_v23   ;;  %4971 = vtanh.f32 %v1111_v25  ;;  %v4968_v27 = vpop.eup %4967 }
  0xda   :  { %4973 = vtanh.f32 %v1825_v21 }
  0xdb   :  { %4975 = vtanh.f32 %v2541_v22 }
  0xde   :  { %v1827_v28 = vpop.f32.mrf.mxu2  ;;  %v4970_v32 = vpop.eup %4969 }
  0xdf   :  { %v2543_v29 = vpop.f32.mrf.mxu3  ;;  %4977 = vtanh.f32 %v1827_v28  ;;  %v399_v33 = vpop.f32.mrf.mxu0  ;;  %v4157_v38 = vpack.c.bf16 %v4970_v32, %v4966_v26 }
  0xe0   :  { %v1114_v34 = vpop.f32.mrf.mxu1  ;;  %v4972_v37 = vpop.eup %4971  ;;  %4979 = vtanh.f32 %v2543_v29 }
  0xe1   :  { %v4317_v39 = vpack.c.bf16 %v4972_v37, %v4968_v27  ;;  %4777 = vst [vmem:[%s6374_s2 + $0x20] sm:$0xff] %v4157_v38   ;;  %3035 = vmatmul.msk.bf16.gmra.mxu0 %vm268_vm0, %v4003_v30  ;;  %v4974_v40 = vpop.eup %4973  ;;  %4981 = vtanh.f32 %v399_v33  ;;  %v4006_v38 = vld [vmem:[%s6373_s0 + $0x80] sm:$0xff] }
  0xe2   :  { %3283 = vmatmul.msk.bf16.gmra.mxu1 %vm268_vm0, %v4039_v31  ;;  %v4976_v41 = vpop.eup %4975  ;;  %4983 = vtanh.f32 %v1114_v34 }
  0xe3   :  { %4809 = vst [vmem:[%s6374_s2 + $0x120] sm:$0xff] %v4317_v39   ;;  %3595 = vmatmul.msk.bf16.gmra.mxu2 %vm268_vm0, %v4075_v35  ;;  %v4042_v39 = vld [vmem:[%s6373_s0 + $0x180] sm:$0xff] }
  0xe4   :  { %3907 = vmatmul.msk.bf16.gmra.mxu3 %vm268_vm0, %v4111_v36 }
  0xe5   :  { %v4978_v42 = vpop.eup %4977 }
  0xe6   :  { %v4980_v43 = vpop.eup %4979  ;;  %v4477_v44 = vpack.c.bf16 %v4978_v42, %v4974_v40  ;;  %v1830_v45 = vpop.f32.mrf.mxu2 }
  0xe7   :  { %v2546_v46 = vpop.f32.mrf.mxu3  ;;  %v4637_v47 = vpack.c.bf16 %v4980_v43, %v4976_v41  ;;  %v401_v48 = vpop.f32.mrf.mxu0  ;;  %v4078_v43 = vld [vmem:[%s6373_s0 + $0x280] sm:$0xff] }
  0xe8   :  { %v1116_v49 = vpop.f32.mrf.mxu1  ;;  %4841 = vst [vmem:[%s6374_s2 + $0x220] sm:$0xff] %v4477_v44   ;;  %4985 = vtanh.f32 %v401_v48  ;;  %v4982_v50 = vpop.eup %4981  ;;  %v4114_v44 = vld [vmem:[%s6373_s0 + $0x380] sm:$0xff] }
  0xe9   :  { %4873 = vst [vmem:[%s6374_s2 + $0x320] sm:$0xff] %v4637_v47   ;;  %4987 = vtanh.f32 %v1116_v49  ;;  %v4984_v51 = vpop.eup %4983 }
  0xea   :  { %4989 = vtanh.f32 %v1830_v45 }
  0xeb   :  { %4991 = vtanh.f32 %v2546_v46 }
  0xee   :  { %v1832_v52 = vpop.f32.mrf.mxu2  ;;  %v4986_v56 = vpop.eup %4985 }
  0xef   :  { %v2548_v53 = vpop.f32.mrf.mxu3  ;;  %4993 = vtanh.f32 %v1832_v52  ;;  %v404_v57 = vpop.f32.mrf.mxu0  ;;  %v4162_v62 = vpack.c.bf16 %v4986_v56, %v4982_v50 }
  0xf0   :  { %v1119_v58 = vpop.f32.mrf.mxu1  ;;  %v4988_v61 = vpop.eup %4987  ;;  %4995 = vtanh.f32 %v2548_v53 }
  0xf1   :  { %v4322_v63 = vpack.c.bf16 %v4988_v61, %v4984_v51  ;;  %4778 = vst [vmem:[%s6374_s2 + $0x28] sm:$0xff] %v4162_v62   ;;  %3036 = vmatmul.msk.bf16.gmra.mxu0 %vm268_vm0, %v4004_v54  ;;  %v4990_v0 = vpop.eup %4989  ;;  %4997 = vtanh.f32 %v404_v57  ;;  %v4007_v62 = vld [vmem:[%s6373_s0 + $0x88] sm:$0xff] }
  0xf2   :  { %3284 = vmatmul.msk.bf16.gmra.mxu1 %vm268_vm0, %v4040_v55  ;;  %v4992_v1 = vpop.eup %4991  ;;  %4999 = vtanh.f32 %v1119_v58 }
  0xf3   :  { %4810 = vst [vmem:[%s6374_s2 + $0x128] sm:$0xff] %v4322_v63   ;;  %3596 = vmatmul.msk.bf16.gmra.mxu2 %vm268_vm0, %v4076_v59  ;;  %v4043_v63 = vld [vmem:[%s6373_s0 + $0x188] sm:$0xff] }
  0xf4   :  { %3908 = vmatmul.msk.bf16.gmra.mxu3 %vm268_vm0, %v4112_v60 }
  0xf5   :  { %v4994_v2 = vpop.eup %4993 }
  0xf6   :  { %v4996_v3 = vpop.eup %4995  ;;  %v4482_v4 = vpack.c.bf16 %v4994_v2, %v4990_v0  ;;  %v1835_v5 = vpop.f32.mrf.mxu2 }
  0xf7   :  { %v2551_v6 = vpop.f32.mrf.mxu3  ;;  %v4642_v7 = vpack.c.bf16 %v4996_v3, %v4992_v1  ;;  %v406_v8 = vpop.f32.mrf.mxu0  ;;  %v4079_v3 = vld [vmem:[%s6373_s0 + $0x288] sm:$0xff] }
  0xf8   :  { %v1121_v9 = vpop.f32.mrf.mxu1  ;;  %4842 = vst [vmem:[%s6374_s2 + $0x228] sm:$0xff] %v4482_v4   ;;  %5001 = vtanh.f32 %v406_v8  ;;  %v4998_v10 = vpop.eup %4997  ;;  %v4115_v4 = vld [vmem:[%s6373_s0 + $0x388] sm:$0xff] }
  0xf9   :  { %4874 = vst [vmem:[%s6374_s2 + $0x328] sm:$0xff] %v4642_v7   ;;  %5003 = vtanh.f32 %v1121_v9  ;;  %v5000_v11 = vpop.eup %4999 }
  0xfa   :  { %5005 = vtanh.f32 %v1835_v5 }
  0xfb   :  { %5007 = vtanh.f32 %v2551_v6 }
  0xfe   :  { %v1837_v12 = vpop.f32.mrf.mxu2  ;;  %v5002_v16 = vpop.eup %5001 }
  0xff   :  { %v2553_v13 = vpop.f32.mrf.mxu3  ;;  %5009 = vtanh.f32 %v1837_v12  ;;  %v409_v17 = vpop.f32.mrf.mxu0  ;;  %v4167_v22 = vpack.c.bf16 %v5002_v16, %v4998_v10 }
 0x100   :  { %v1124_v18 = vpop.f32.mrf.mxu1  ;;  %v5004_v21 = vpop.eup %5003  ;;  %5011 = vtanh.f32 %v2553_v13 }
 0x101   :  { %v4327_v23 = vpack.c.bf16 %v5004_v21, %v5000_v11  ;;  %4779 = vst [vmem:[%s6374_s2 + $0x30] sm:$0xff] %v4167_v22   ;;  %3037 = vmatmul.msk.bf16.gmra.mxu0 %vm268_vm0, %v4005_v14  ;;  %v5006_v24 = vpop.eup %5005  ;;  %5013 = vtanh.f32 %v409_v17  ;;  %v4008_v22 = vld [vmem:[%s6373_s0 + $0x90] sm:$0xff] }
 0x102   :  { %3285 = vmatmul.msk.bf16.gmra.mxu1 %vm268_vm0, %v4041_v15  ;;  %v5008_v25 = vpop.eup %5007  ;;  %5015 = vtanh.f32 %v1124_v18 }
 0x103   :  { %4811 = vst [vmem:[%s6374_s2 + $0x130] sm:$0xff] %v4327_v23   ;;  %3597 = vmatmul.msk.bf16.gmra.mxu2 %vm268_vm0, %v4077_v19  ;;  %v4044_v23 = vld [vmem:[%s6373_s0 + $0x190] sm:$0xff] }
 0x104   :  { %3909 = vmatmul.msk.bf16.gmra.mxu3 %vm268_vm0, %v4113_v20 }
 0x105   :  { %v5010_v26 = vpop.eup %5009 }
 0x106   :  { %v5012_v27 = vpop.eup %5011  ;;  %v4487_v28 = vpack.c.bf16 %v5010_v26, %v5006_v24  ;;  %v1840_v29 = vpop.f32.mrf.mxu2 }
 0x107   :  { %v2556_v30 = vpop.f32.mrf.mxu3  ;;  %v4647_v31 = vpack.c.bf16 %v5012_v27, %v5008_v25  ;;  %v411_v32 = vpop.f32.mrf.mxu0  ;;  %v4080_v27 = vld [vmem:[%s6373_s0 + $0x290] sm:$0xff] }
 0x108   :  { %v1126_v33 = vpop.f32.mrf.mxu1  ;;  %4843 = vst [vmem:[%s6374_s2 + $0x230] sm:$0xff] %v4487_v28   ;;  %5017 = vtanh.f32 %v411_v32  ;;  %v5014_v34 = vpop.eup %5013  ;;  %v4116_v28 = vld [vmem:[%s6373_s0 + $0x390] sm:$0xff] }
 0x109   :  { %4875 = vst [vmem:[%s6374_s2 + $0x330] sm:$0xff] %v4647_v31   ;;  %5019 = vtanh.f32 %v1126_v33  ;;  %v5016_v35 = vpop.eup %5015 }
 0x10a   :  { %5021 = vtanh.f32 %v1840_v29 }
 0x10b   :  { %5023 = vtanh.f32 %v2556_v30 }
 0x10e   :  { %v1842_v36 = vpop.f32.mrf.mxu2  ;;  %v5018_v40 = vpop.eup %5017 }
 0x10f   :  { %v2558_v37 = vpop.f32.mrf.mxu3  ;;  %5025 = vtanh.f32 %v1842_v36  ;;  %v414_v41 = vpop.f32.mrf.mxu0  ;;  %v4172_v46 = vpack.c.bf16 %v5018_v40, %v5014_v34 }
 0x110   :  { %v1129_v42 = vpop.f32.mrf.mxu1  ;;  %v5020_v45 = vpop.eup %5019  ;;  %5027 = vtanh.f32 %v2558_v37 }
 0x111   :  { %v4332_v47 = vpack.c.bf16 %v5020_v45, %v5016_v35  ;;  %4780 = vst [vmem:[%s6374_s2 + $0x38] sm:$0xff] %v4172_v46   ;;  %3038 = vmatmul.msk.bf16.gmra.mxu0 %vm268_vm0, %v4006_v38  ;;  %v5022_v48 = vpop.eup %5021  ;;  %5029 = vtanh.f32 %v414_v41  ;;  %v4009_v46 = vld [vmem:[%s6373_s0 + $0x98] sm:$0xff] }
 0x112   :  { %3286 = vmatmul.msk.bf16.gmra.mxu1 %vm268_vm0, %v4042_v39  ;;  %v5024_v49 = vpop.eup %5023  ;;  %5031 = vtanh.f32 %v1129_v42 }
 0x113   :  { %4812 = vst [vmem:[%s6374_s2 + $0x138] sm:$0xff] %v4332_v47   ;;  %3598 = vmatmul.msk.bf16.gmra.mxu2 %vm268_vm0, %v4078_v43  ;;  %v4045_v47 = vld [vmem:[%s6373_s0 + $0x198] sm:$0xff] }
 0x114   :  { %3910 = vmatmul.msk.bf16.gmra.mxu3 %vm268_vm0, %v4114_v44 }
 0x115   :  { %v5026_v50 = vpop.eup %5025 }
 0x116   :  { %v5028_v51 = vpop.eup %5027  ;;  %v4492_v52 = vpack.c.bf16 %v5026_v50, %v5022_v48  ;;  %v1845_v53 = vpop.f32.mrf.mxu2 }
 0x117   :  { %v2561_v54 = vpop.f32.mrf.mxu3  ;;  %v4652_v55 = vpack.c.bf16 %v5028_v51, %v5024_v49  ;;  %v416_v56 = vpop.f32.mrf.mxu0  ;;  %v4081_v51 = vld [vmem:[%s6373_s0 + $0x298] sm:$0xff] }
 0x118   :  { %v1131_v57 = vpop.f32.mrf.mxu1  ;;  %4844 = vst [vmem:[%s6374_s2 + $0x238] sm:$0xff] %v4492_v52   ;;  %5033 = vtanh.f32 %v416_v56  ;;  %v5030_v58 = vpop.eup %5029  ;;  %v4117_v52 = vld [vmem:[%s6373_s0 + $0x398] sm:$0xff] }
 0x119   :  { %4876 = vst [vmem:[%s6374_s2 + $0x338] sm:$0xff] %v4652_v55   ;;  %5035 = vtanh.f32 %v1131_v57  ;;  %v5032_v59 = vpop.eup %5031 }
 0x11a   :  { %5037 = vtanh.f32 %v1845_v53 }
 0x11b   :  { %5039 = vtanh.f32 %v2561_v54 }
 0x11e   :  { %v1847_v60 = vpop.f32.mrf.mxu2  ;;  %v5034_v0 = vpop.eup %5033 }
 0x11f   :  { %v2563_v61 = vpop.f32.mrf.mxu3  ;;  %5041 = vtanh.f32 %v1847_v60  ;;  %v419_v1 = vpop.f32.mrf.mxu0  ;;  %v4177_v6 = vpack.c.bf16 %v5034_v0, %v5030_v58 }
 0x120   :  { %v1134_v2 = vpop.f32.mrf.mxu1  ;;  %v5036_v5 = vpop.eup %5035  ;;  %5043 = vtanh.f32 %v2563_v61 }
 0x121   :  { %v4337_v7 = vpack.c.bf16 %v5036_v5, %v5032_v59  ;;  %4781 = vst [vmem:[%s6374_s2 + $0x40] sm:$0xff] %v4177_v6   ;;  %3039 = vmatmul.msk.bf16.gmra.mxu0 %vm268_vm0, %v4007_v62  ;;  %v5038_v8 = vpop.eup %5037  ;;  %5045 = vtanh.f32 %v419_v1  ;;  %v4010_v6 = vld [vmem:[%s6373_s0 + $0xa0] sm:$0xff] }
 0x122   :  { %3287 = vmatmul.msk.bf16.gmra.mxu1 %vm268_vm0, %v4043_v63  ;;  %v5040_v9 = vpop.eup %5039  ;;  %5047 = vtanh.f32 %v1134_v2 }
 0x123   :  { %4813 = vst [vmem:[%s6374_s2 + $0x140] sm:$0xff] %v4337_v7   ;;  %3599 = vmatmul.msk.bf16.gmra.mxu2 %vm268_vm0, %v4079_v3  ;;  %v4046_v7 = vld [vmem:[%s6373_s0 + $0x1a0] sm:$0xff] }
 0x124   :  { %3911 = vmatmul.msk.bf16.gmra.mxu3 %vm268_vm0, %v4115_v4 }
 0x125   :  { %v5042_v10 = vpop.eup %5041 }
 0x126   :  { %v5044_v11 = vpop.eup %5043  ;;  %v4497_v12 = vpack.c.bf16 %v5042_v10, %v5038_v8  ;;  %v1850_v13 = vpop.f32.mrf.mxu2 }
 0x127   :  { %v2566_v14 = vpop.f32.mrf.mxu3  ;;  %v4657_v15 = vpack.c.bf16 %v5044_v11, %v5040_v9  ;;  %v421_v16 = vpop.f32.mrf.mxu0  ;;  %v4082_v11 = vld [vmem:[%s6373_s0 + $0x2a0] sm:$0xff] }
 0x128   :  { %v1136_v17 = vpop.f32.mrf.mxu1  ;;  %4845 = vst [vmem:[%s6374_s2 + $0x240] sm:$0xff] %v4497_v12   ;;  %5049 = vtanh.f32 %v421_v16  ;;  %v5046_v18 = vpop.eup %5045  ;;  %v4118_v12 = vld [vmem:[%s6373_s0 + $0x3a0] sm:$0xff] }
 0x129   :  { %4877 = vst [vmem:[%s6374_s2 + $0x340] sm:$0xff] %v4657_v15   ;;  %5051 = vtanh.f32 %v1136_v17  ;;  %v5048_v19 = vpop.eup %5047 }
 0x12a   :  { %5053 = vtanh.f32 %v1850_v13 }
 0x12b   :  { %5055 = vtanh.f32 %v2566_v14 }
 0x12e   :  { %v1852_v20 = vpop.f32.mrf.mxu2  ;;  %v5050_v24 = vpop.eup %5049 }
 0x12f   :  { %v2568_v21 = vpop.f32.mrf.mxu3  ;;  %5057 = vtanh.f32 %v1852_v20  ;;  %v424_v25 = vpop.f32.mrf.mxu0  ;;  %v4182_v30 = vpack.c.bf16 %v5050_v24, %v5046_v18 }
 0x130   :  { %v1139_v26 = vpop.f32.mrf.mxu1  ;;  %v5052_v29 = vpop.eup %5051  ;;  %5059 = vtanh.f32 %v2568_v21 }
 0x131   :  { %v4342_v31 = vpack.c.bf16 %v5052_v29, %v5048_v19  ;;  %4782 = vst [vmem:[%s6374_s2 + $0x48] sm:$0xff] %v4182_v30   ;;  %3040 = vmatmul.msk.bf16.gmra.mxu0 %vm268_vm0, %v4008_v22  ;;  %v5054_v32 = vpop.eup %5053  ;;  %5061 = vtanh.f32 %v424_v25  ;;  %v4011_v30 = vld [vmem:[%s6373_s0 + $0xa8] sm:$0xff] }
 0x132   :  { %3288 = vmatmul.msk.bf16.gmra.mxu1 %vm268_vm0, %v4044_v23  ;;  %v5056_v33 = vpop.eup %5055  ;;  %5063 = vtanh.f32 %v1139_v26 }
 0x133   :  { %4814 = vst [vmem:[%s6374_s2 + $0x148] sm:$0xff] %v4342_v31   ;;  %3600 = vmatmul.msk.bf16.gmra.mxu2 %vm268_vm0, %v4080_v27  ;;  %v4047_v31 = vld [vmem:[%s6373_s0 + $0x1a8] sm:$0xff] }
 0x134   :  { %3912 = vmatmul.msk.bf16.gmra.mxu3 %vm268_vm0, %v4116_v28 }
 0x135   :  { %v5058_v34 = vpop.eup %5057 }
 0x136   :  { %v5060_v35 = vpop.eup %5059  ;;  %v4502_v36 = vpack.c.bf16 %v5058_v34, %v5054_v32  ;;  %v1855_v37 = vpop.f32.mrf.mxu2 }
 0x137   :  { %v2571_v38 = vpop.f32.mrf.mxu3  ;;  %v4662_v39 = vpack.c.bf16 %v5060_v35, %v5056_v33  ;;  %v426_v40 = vpop.f32.mrf.mxu0  ;;  %v4083_v35 = vld [vmem:[%s6373_s0 + $0x2a8] sm:$0xff] }
 0x138   :  { %v1141_v41 = vpop.f32.mrf.mxu1  ;;  %4846 = vst [vmem:[%s6374_s2 + $0x248] sm:$0xff] %v4502_v36   ;;  %5065 = vtanh.f32 %v426_v40  ;;  %v5062_v42 = vpop.eup %5061  ;;  %v4119_v36 = vld [vmem:[%s6373_s0 + $0x3a8] sm:$0xff] }
 0x139   :  { %4878 = vst [vmem:[%s6374_s2 + $0x348] sm:$0xff] %v4662_v39   ;;  %5067 = vtanh.f32 %v1141_v41  ;;  %v5064_v43 = vpop.eup %5063 }
 0x13a   :  { %5069 = vtanh.f32 %v1855_v37 }
 0x13b   :  { %5071 = vtanh.f32 %v2571_v38 }
 0x13e   :  { %v1857_v44 = vpop.f32.mrf.mxu2  ;;  %v5066_v48 = vpop.eup %5065 }
 0x13f   :  { %v2573_v45 = vpop.f32.mrf.mxu3  ;;  %5073 = vtanh.f32 %v1857_v44  ;;  %v429_v49 = vpop.f32.mrf.mxu0  ;;  %v4187_v54 = vpack.c.bf16 %v5066_v48, %v5062_v42 }
 0x140   :  { %v1144_v50 = vpop.f32.mrf.mxu1  ;;  %v5068_v53 = vpop.eup %5067  ;;  %5075 = vtanh.f32 %v2573_v45 }
 0x141   :  { %v4347_v55 = vpack.c.bf16 %v5068_v53, %v5064_v43  ;;  %4783 = vst [vmem:[%s6374_s2 + $0x50] sm:$0xff] %v4187_v54   ;;  %3041 = vmatmul.msk.bf16.gmra.mxu0 %vm268_vm0, %v4009_v46  ;;  %v5070_v56 = vpop.eup %5069  ;;  %5077 = vtanh.f32 %v429_v49  ;;  %v4012_v54 = vld [vmem:[%s6373_s0 + $0xb0] sm:$0xff] }
 0x142   :  { %3289 = vmatmul.msk.bf16.gmra.mxu1 %vm268_vm0, %v4045_v47  ;;  %v5072_v57 = vpop.eup %5071  ;;  %5079 = vtanh.f32 %v1144_v50 }
 0x143   :  { %4815 = vst [vmem:[%s6374_s2 + $0x150] sm:$0xff] %v4347_v55   ;;  %3601 = vmatmul.msk.bf16.gmra.mxu2 %vm268_vm0, %v4081_v51  ;;  %v4048_v55 = vld [vmem:[%s6373_s0 + $0x1b0] sm:$0xff] }
 0x144   :  { %3913 = vmatmul.msk.bf16.gmra.mxu3 %vm268_vm0, %v4117_v52 }
 0x145   :  { %v5074_v58 = vpop.eup %5073 }
 0x146   :  { %v5076_v59 = vpop.eup %5075  ;;  %v4507_v60 = vpack.c.bf16 %v5074_v58, %v5070_v56  ;;  %v1860_v61 = vpop.f32.mrf.mxu2 }
 0x147   :  { %v2576_v62 = vpop.f32.mrf.mxu3  ;;  %v4667_v63 = vpack.c.bf16 %v5076_v59, %v5072_v57  ;;  %v431_v0 = vpop.f32.mrf.mxu0  ;;  %v4084_v59 = vld [vmem:[%s6373_s0 + $0x2b0] sm:$0xff] }
 0x148   :  { %v1146_v1 = vpop.f32.mrf.mxu1  ;;  %4847 = vst [vmem:[%s6374_s2 + $0x250] sm:$0xff] %v4507_v60   ;;  %5081 = vtanh.f32 %v431_v0  ;;  %v5078_v2 = vpop.eup %5077  ;;  %v4120_v60 = vld [vmem:[%s6373_s0 + $0x3b0] sm:$0xff] }
 0x149   :  { %4879 = vst [vmem:[%s6374_s2 + $0x350] sm:$0xff] %v4667_v63   ;;  %5083 = vtanh.f32 %v1146_v1  ;;  %v5080_v3 = vpop.eup %5079 }
 0x14a   :  { %5085 = vtanh.f32 %v1860_v61 }
 0x14b   :  { %5087 = vtanh.f32 %v2576_v62 }
 0x14e   :  { %v1862_v4 = vpop.f32.mrf.mxu2  ;;  %v5082_v8 = vpop.eup %5081 }
 0x14f   :  { %v2578_v5 = vpop.f32.mrf.mxu3  ;;  %5089 = vtanh.f32 %v1862_v4  ;;  %v434_v9 = vpop.f32.mrf.mxu0  ;;  %v4192_v14 = vpack.c.bf16 %v5082_v8, %v5078_v2 }
 0x150   :  { %v1149_v10 = vpop.f32.mrf.mxu1  ;;  %v5084_v13 = vpop.eup %5083  ;;  %5091 = vtanh.f32 %v2578_v5 }
 0x151   :  { %v4352_v15 = vpack.c.bf16 %v5084_v13, %v5080_v3  ;;  %4784 = vst [vmem:[%s6374_s2 + $0x58] sm:$0xff] %v4192_v14   ;;  %3042 = vmatmul.msk.bf16.gmra.mxu0 %vm268_vm0, %v4010_v6  ;;  %v5086_v16 = vpop.eup %5085  ;;  %5093 = vtanh.f32 %v434_v9  ;;  %v4013_v14 = vld [vmem:[%s6373_s0 + $0xb8] sm:$0xff] }
 0x152   :  { %3290 = vmatmul.msk.bf16.gmra.mxu1 %vm268_vm0, %v4046_v7  ;;  %v5088_v17 = vpop.eup %5087  ;;  %5095 = vtanh.f32 %v1149_v10 }
 0x153   :  { %4816 = vst [vmem:[%s6374_s2 + $0x158] sm:$0xff] %v4352_v15   ;;  %3602 = vmatmul.msk.bf16.gmra.mxu2 %vm268_vm0, %v4082_v11  ;;  %v4049_v15 = vld [vmem:[%s6373_s0 + $0x1b8] sm:$0xff] }
 0x154   :  { %3914 = vmatmul.msk.bf16.gmra.mxu3 %vm268_vm0, %v4118_v12 }
 0x155   :  { %v5090_v18 = vpop.eup %5089 }
 0x156   :  { %v5092_v19 = vpop.eup %5091  ;;  %v4512_v20 = vpack.c.bf16 %v5090_v18, %v5086_v16  ;;  %v1865_v21 = vpop.f32.mrf.mxu2 }
 0x157   :  { %v2581_v22 = vpop.f32.mrf.mxu3  ;;  %v4672_v23 = vpack.c.bf16 %v5092_v19, %v5088_v17  ;;  %v436_v24 = vpop.f32.mrf.mxu0  ;;  %v4085_v19 = vld [vmem:[%s6373_s0 + $0x2b8] sm:$0xff] }
 0x158   :  { %v1151_v25 = vpop.f32.mrf.mxu1  ;;  %4848 = vst [vmem:[%s6374_s2 + $0x258] sm:$0xff] %v4512_v20   ;;  %5097 = vtanh.f32 %v436_v24  ;;  %v5094_v26 = vpop.eup %5093  ;;  %v4121_v20 = vld [vmem:[%s6373_s0 + $0x3b8] sm:$0xff] }
 0x159   :  { %4880 = vst [vmem:[%s6374_s2 + $0x358] sm:$0xff] %v4672_v23   ;;  %5099 = vtanh.f32 %v1151_v25  ;;  %v5096_v27 = vpop.eup %5095 }
 0x15a   :  { %5101 = vtanh.f32 %v1865_v21 }
 0x15b   :  { %5103 = vtanh.f32 %v2581_v22 }
 0x15e   :  { %v1867_v28 = vpop.f32.mrf.mxu2  ;;  %v5098_v32 = vpop.eup %5097 }
 0x15f   :  { %v2583_v29 = vpop.f32.mrf.mxu3  ;;  %5105 = vtanh.f32 %v1867_v28  ;;  %v439_v33 = vpop.f32.mrf.mxu0  ;;  %v4197_v38 = vpack.c.bf16 %v5098_v32, %v5094_v26 }
 0x160   :  { %v1154_v34 = vpop.f32.mrf.mxu1  ;;  %v5100_v37 = vpop.eup %5099  ;;  %5107 = vtanh.f32 %v2583_v29 }
 0x161   :  { %v4357_v39 = vpack.c.bf16 %v5100_v37, %v5096_v27  ;;  %4785 = vst [vmem:[%s6374_s2 + $0x60] sm:$0xff] %v4197_v38   ;;  %3043 = vmatmul.msk.bf16.gmra.mxu0 %vm268_vm0, %v4011_v30  ;;  %v5102_v40 = vpop.eup %5101  ;;  %5109 = vtanh.f32 %v439_v33  ;;  %v4014_v38 = vld [vmem:[%s6373_s0 + $0xc0] sm:$0xff] }
 0x162   :  { %3291 = vmatmul.msk.bf16.gmra.mxu1 %vm268_vm0, %v4047_v31  ;;  %v5104_v41 = vpop.eup %5103  ;;  %5111 = vtanh.f32 %v1154_v34 }
 0x163   :  { %4817 = vst [vmem:[%s6374_s2 + $0x160] sm:$0xff] %v4357_v39   ;;  %3603 = vmatmul.msk.bf16.gmra.mxu2 %vm268_vm0, %v4083_v35  ;;  %v4050_v39 = vld [vmem:[%s6373_s0 + $0x1c0] sm:$0xff] }
 0x164   :  { %3915 = vmatmul.msk.bf16.gmra.mxu3 %vm268_vm0, %v4119_v36 }
 0x165   :  { %v5106_v42 = vpop.eup %5105 }
 0x166   :  { %v5108_v43 = vpop.eup %5107  ;;  %v4517_v44 = vpack.c.bf16 %v5106_v42, %v5102_v40  ;;  %v1870_v45 = vpop.f32.mrf.mxu2 }
 0x167   :  { %v2586_v46 = vpop.f32.mrf.mxu3  ;;  %v4677_v47 = vpack.c.bf16 %v5108_v43, %v5104_v41  ;;  %v441_v48 = vpop.f32.mrf.mxu0  ;;  %v4086_v43 = vld [vmem:[%s6373_s0 + $0x2c0] sm:$0xff] }
 0x168   :  { %v1156_v49 = vpop.f32.mrf.mxu1  ;;  %4849 = vst [vmem:[%s6374_s2 + $0x260] sm:$0xff] %v4517_v44   ;;  %5113 = vtanh.f32 %v441_v48  ;;  %v5110_v50 = vpop.eup %5109  ;;  %v4122_v44 = vld [vmem:[%s6373_s0 + $0x3c0] sm:$0xff] }
 0x169   :  { %4881 = vst [vmem:[%s6374_s2 + $0x360] sm:$0xff] %v4677_v47   ;;  %5115 = vtanh.f32 %v1156_v49  ;;  %v5112_v51 = vpop.eup %5111 }
 0x16a   :  { %5117 = vtanh.f32 %v1870_v45 }
 0x16b   :  { %5119 = vtanh.f32 %v2586_v46 }
 0x16e   :  { %v1872_v52 = vpop.f32.mrf.mxu2  ;;  %v5114_v56 = vpop.eup %5113 }
 0x16f   :  { %v2588_v53 = vpop.f32.mrf.mxu3  ;;  %5121 = vtanh.f32 %v1872_v52  ;;  %v444_v57 = vpop.f32.mrf.mxu0  ;;  %v4202_v62 = vpack.c.bf16 %v5114_v56, %v5110_v50 }
 0x170   :  { %v1159_v58 = vpop.f32.mrf.mxu1  ;;  %v5116_v61 = vpop.eup %5115  ;;  %5123 = vtanh.f32 %v2588_v53 }
 0x171   :  { %v4362_v63 = vpack.c.bf16 %v5116_v61, %v5112_v51  ;;  %4786 = vst [vmem:[%s6374_s2 + $0x68] sm:$0xff] %v4202_v62   ;;  %3044 = vmatmul.msk.bf16.gmra.mxu0 %vm268_vm0, %v4012_v54  ;;  %v5118_v0 = vpop.eup %5117  ;;  %5125 = vtanh.f32 %v444_v57  ;;  %v4015_v62 = vld [vmem:[%s6373_s0 + $0xc8] sm:$0xff] }
 0x172   :  { %3292 = vmatmul.msk.bf16.gmra.mxu1 %vm268_vm0, %v4048_v55  ;;  %v5120_v1 = vpop.eup %5119  ;;  %5127 = vtanh.f32 %v1159_v58 }
 0x173   :  { %4818 = vst [vmem:[%s6374_s2 + $0x168] sm:$0xff] %v4362_v63   ;;  %3604 = vmatmul.msk.bf16.gmra.mxu2 %vm268_vm0, %v4084_v59  ;;  %v4051_v63 = vld [vmem:[%s6373_s0 + $0x1c8] sm:$0xff] }
 0x174   :  { %3916 = vmatmul.msk.bf16.gmra.mxu3 %vm268_vm0, %v4120_v60 }
 0x175   :  { %v5122_v2 = vpop.eup %5121 }
 0x176   :  { %v5124_v3 = vpop.eup %5123  ;;  %v4522_v4 = vpack.c.bf16 %v5122_v2, %v5118_v0  ;;  %v1875_v5 = vpop.f32.mrf.mxu2 }
 0x177   :  { %v2591_v6 = vpop.f32.mrf.mxu3  ;;  %v4682_v7 = vpack.c.bf16 %v5124_v3, %v5120_v1  ;;  %v446_v8 = vpop.f32.mrf.mxu0  ;;  %v4087_v3 = vld [vmem:[%s6373_s0 + $0x2c8] sm:$0xff] }
 0x178   :  { %v1161_v9 = vpop.f32.mrf.mxu1  ;;  %4850 = vst [vmem:[%s6374_s2 + $0x268] sm:$0xff] %v4522_v4   ;;  %5129 = vtanh.f32 %v446_v8  ;;  %v5126_v10 = vpop.eup %5125  ;;  %v4123_v4 = vld [vmem:[%s6373_s0 + $0x3c8] sm:$0xff] }
 0x179   :  { %4882 = vst [vmem:[%s6374_s2 + $0x368] sm:$0xff] %v4682_v7   ;;  %5131 = vtanh.f32 %v1161_v9  ;;  %v5128_v11 = vpop.eup %5127 }
 0x17a   :  { %5133 = vtanh.f32 %v1875_v5 }
 0x17b   :  { %5135 = vtanh.f32 %v2591_v6 }
 0x17e   :  { %v1877_v12 = vpop.f32.mrf.mxu2  ;;  %v5130_v16 = vpop.eup %5129 }
 0x17f   :  { %v2593_v13 = vpop.f32.mrf.mxu3  ;;  %5137 = vtanh.f32 %v1877_v12  ;;  %v449_v17 = vpop.f32.mrf.mxu0  ;;  %v4207_v22 = vpack.c.bf16 %v5130_v16, %v5126_v10 }
 0x180   :  { %v1164_v18 = vpop.f32.mrf.mxu1  ;;  %v5132_v21 = vpop.eup %5131  ;;  %5139 = vtanh.f32 %v2593_v13 }
 0x181   :  { %v4367_v23 = vpack.c.bf16 %v5132_v21, %v5128_v11  ;;  %4787 = vst [vmem:[%s6374_s2 + $0x70] sm:$0xff] %v4207_v22   ;;  %3045 = vmatmul.msk.bf16.gmra.mxu0 %vm268_vm0, %v4013_v14  ;;  %v5134_v24 = vpop.eup %5133  ;;  %5141 = vtanh.f32 %v449_v17  ;;  %v4016_v22 = vld [vmem:[%s6373_s0 + $0xd0] sm:$0xff] }
 0x182   :  { %3293 = vmatmul.msk.bf16.gmra.mxu1 %vm268_vm0, %v4049_v15  ;;  %v5136_v25 = vpop.eup %5135  ;;  %5143 = vtanh.f32 %v1164_v18 }
 0x183   :  { %4819 = vst [vmem:[%s6374_s2 + $0x170] sm:$0xff] %v4367_v23   ;;  %3605 = vmatmul.msk.bf16.gmra.mxu2 %vm268_vm0, %v4085_v19  ;;  %v4052_v23 = vld [vmem:[%s6373_s0 + $0x1d0] sm:$0xff] }
 0x184   :  { %3917 = vmatmul.msk.bf16.gmra.mxu3 %vm268_vm0, %v4121_v20 }
 0x185   :  { %v5138_v26 = vpop.eup %5137 }
 0x186   :  { %v5140_v27 = vpop.eup %5139  ;;  %v4527_v28 = vpack.c.bf16 %v5138_v26, %v5134_v24  ;;  %v1880_v29 = vpop.f32.mrf.mxu2 }
 0x187   :  { %v2596_v30 = vpop.f32.mrf.mxu3  ;;  %v4687_v31 = vpack.c.bf16 %v5140_v27, %v5136_v25  ;;  %v451_v32 = vpop.f32.mrf.mxu0  ;;  %v4088_v27 = vld [vmem:[%s6373_s0 + $0x2d0] sm:$0xff] }
 0x188   :  { %v1166_v33 = vpop.f32.mrf.mxu1  ;;  %4851 = vst [vmem:[%s6374_s2 + $0x270] sm:$0xff] %v4527_v28   ;;  %5145 = vtanh.f32 %v451_v32  ;;  %v5142_v34 = vpop.eup %5141  ;;  %v4124_v28 = vld [vmem:[%s6373_s0 + $0x3d0] sm:$0xff] }
 0x189   :  { %4883 = vst [vmem:[%s6374_s2 + $0x370] sm:$0xff] %v4687_v31   ;;  %5147 = vtanh.f32 %v1166_v33  ;;  %v5144_v35 = vpop.eup %5143 }
 0x18a   :  { %5149 = vtanh.f32 %v1880_v29 }
 0x18b   :  { %5151 = vtanh.f32 %v2596_v30 }
 0x18e   :  { %v1882_v36 = vpop.f32.mrf.mxu2  ;;  %v5146_v40 = vpop.eup %5145 }
 0x18f   :  { %v2598_v37 = vpop.f32.mrf.mxu3  ;;  %5153 = vtanh.f32 %v1882_v36  ;;  %v454_v41 = vpop.f32.mrf.mxu0  ;;  %v4212_v46 = vpack.c.bf16 %v5146_v40, %v5142_v34 }
 0x190   :  { %v1169_v42 = vpop.f32.mrf.mxu1  ;;  %v5148_v45 = vpop.eup %5147  ;;  %5155 = vtanh.f32 %v2598_v37 }
 0x191   :  { %v4372_v47 = vpack.c.bf16 %v5148_v45, %v5144_v35  ;;  %4788 = vst [vmem:[%s6374_s2 + $0x78] sm:$0xff] %v4212_v46   ;;  %3046 = vmatmul.msk.bf16.gmra.mxu0 %vm268_vm0, %v4014_v38  ;;  %v5150_v48 = vpop.eup %5149  ;;  %5157 = vtanh.f32 %v454_v41  ;;  %v4017_v46 = vld [vmem:[%s6373_s0 + $0xd8] sm:$0xff] }
 0x192   :  { %3294 = vmatmul.msk.bf16.gmra.mxu1 %vm268_vm0, %v4050_v39  ;;  %v5152_v49 = vpop.eup %5151  ;;  %5159 = vtanh.f32 %v1169_v42 }
 0x193   :  { %4820 = vst [vmem:[%s6374_s2 + $0x178] sm:$0xff] %v4372_v47   ;;  %3606 = vmatmul.msk.bf16.gmra.mxu2 %vm268_vm0, %v4086_v43  ;;  %v4053_v47 = vld [vmem:[%s6373_s0 + $0x1d8] sm:$0xff] }
 0x194   :  { %3918 = vmatmul.msk.bf16.gmra.mxu3 %vm268_vm0, %v4122_v44 }
 0x195   :  { %v5154_v50 = vpop.eup %5153 }
 0x196   :  { %v5156_v51 = vpop.eup %5155  ;;  %v4532_v52 = vpack.c.bf16 %v5154_v50, %v5150_v48  ;;  %v1885_v53 = vpop.f32.mrf.mxu2 }
 0x197   :  { %v2601_v54 = vpop.f32.mrf.mxu3  ;;  %v4692_v55 = vpack.c.bf16 %v5156_v51, %v5152_v49  ;;  %v456_v56 = vpop.f32.mrf.mxu0  ;;  %v4089_v51 = vld [vmem:[%s6373_s0 + $0x2d8] sm:$0xff] }
 0x198   :  { %v1171_v57 = vpop.f32.mrf.mxu1  ;;  %4852 = vst [vmem:[%s6374_s2 + $0x278] sm:$0xff] %v4532_v52   ;;  %5161 = vtanh.f32 %v456_v56  ;;  %v5158_v58 = vpop.eup %5157  ;;  %v4125_v52 = vld [vmem:[%s6373_s0 + $0x3d8] sm:$0xff] }
 0x199   :  { %4884 = vst [vmem:[%s6374_s2 + $0x378] sm:$0xff] %v4692_v55   ;;  %5163 = vtanh.f32 %v1171_v57  ;;  %v5160_v59 = vpop.eup %5159 }
 0x19a   :  { %5165 = vtanh.f32 %v1885_v53 }
 0x19b   :  { %5167 = vtanh.f32 %v2601_v54 }
 0x19e   :  { %v1887_v60 = vpop.f32.mrf.mxu2  ;;  %v5162_v0 = vpop.eup %5161 }
 0x19f   :  { %v2603_v61 = vpop.f32.mrf.mxu3  ;;  %5169 = vtanh.f32 %v1887_v60  ;;  %v459_v1 = vpop.f32.mrf.mxu0  ;;  %v4217_v6 = vpack.c.bf16 %v5162_v0, %v5158_v58 }
 0x1a0   :  { %v1174_v2 = vpop.f32.mrf.mxu1  ;;  %v5164_v5 = vpop.eup %5163  ;;  %5171 = vtanh.f32 %v2603_v61 }
 0x1a1   :  { %v4377_v7 = vpack.c.bf16 %v5164_v5, %v5160_v59  ;;  %4789 = vst [vmem:[%s6374_s2 + $0x80] sm:$0xff] %v4217_v6   ;;  %3047 = vmatmul.msk.bf16.gmra.mxu0 %vm268_vm0, %v4015_v62  ;;  %v5166_v8 = vpop.eup %5165  ;;  %5173 = vtanh.f32 %v459_v1  ;;  %v4018_v6 = vld [vmem:[%s6373_s0 + $0xe0] sm:$0xff] }
 0x1a2   :  { %3295 = vmatmul.msk.bf16.gmra.mxu1 %vm268_vm0, %v4051_v63  ;;  %v5168_v9 = vpop.eup %5167  ;;  %5175 = vtanh.f32 %v1174_v2 }
 0x1a3   :  { %4821 = vst [vmem:[%s6374_s2 + $0x180] sm:$0xff] %v4377_v7   ;;  %3607 = vmatmul.msk.bf16.gmra.mxu2 %vm268_vm0, %v4087_v3  ;;  %v4054_v7 = vld [vmem:[%s6373_s0 + $0x1e0] sm:$0xff] }
 0x1a4   :  { %3919 = vmatmul.msk.bf16.gmra.mxu3 %vm268_vm0, %v4123_v4 }
 0x1a5   :  { %v5170_v10 = vpop.eup %5169 }
 0x1a6   :  { %v5172_v11 = vpop.eup %5171  ;;  %v4537_v12 = vpack.c.bf16 %v5170_v10, %v5166_v8  ;;  %v1890_v13 = vpop.f32.mrf.mxu2 }
 0x1a7   :  { %v2606_v14 = vpop.f32.mrf.mxu3  ;;  %v4697_v15 = vpack.c.bf16 %v5172_v11, %v5168_v9  ;;  %v461_v16 = vpop.f32.mrf.mxu0  ;;  %v4090_v11 = vld [vmem:[%s6373_s0 + $0x2e0] sm:$0xff] }
 0x1a8   :  { %v1176_v17 = vpop.f32.mrf.mxu1  ;;  %4853 = vst [vmem:[%s6374_s2 + $0x280] sm:$0xff] %v4537_v12   ;;  %5177 = vtanh.f32 %v461_v16  ;;  %v5174_v18 = vpop.eup %5173  ;;  %v4126_v12 = vld [vmem:[%s6373_s0 + $0x3e0] sm:$0xff] }
 0x1a9   :  { %4885 = vst [vmem:[%s6374_s2 + $0x380] sm:$0xff] %v4697_v15   ;;  %5179 = vtanh.f32 %v1176_v17  ;;  %v5176_v19 = vpop.eup %5175 }
 0x1aa   :  { %5181 = vtanh.f32 %v1890_v13 }
 0x1ab   :  { %5183 = vtanh.f32 %v2606_v14 }
 0x1ae   :  { %v1892_v20 = vpop.f32.mrf.mxu2  ;;  %v5178_v24 = vpop.eup %5177 }
 0x1af   :  { %v2608_v21 = vpop.f32.mrf.mxu3  ;;  %5185 = vtanh.f32 %v1892_v20  ;;  %v464_v25 = vpop.f32.mrf.mxu0  ;;  %v4222_v30 = vpack.c.bf16 %v5178_v24, %v5174_v18 }
 0x1b0   :  { %v1179_v26 = vpop.f32.mrf.mxu1  ;;  %v5180_v29 = vpop.eup %5179  ;;  %5187 = vtanh.f32 %v2608_v21 }
 0x1b1   :  { %v4382_v31 = vpack.c.bf16 %v5180_v29, %v5176_v19  ;;  %4790 = vst [vmem:[%s6374_s2 + $0x88] sm:$0xff] %v4222_v30   ;;  %3048 = vmatmul.msk.bf16.gmra.mxu0 %vm268_vm0, %v4016_v22  ;;  %v5182_v32 = vpop.eup %5181  ;;  %5189 = vtanh.f32 %v464_v25  ;;  %v4019_v30 = vld [vmem:[%s6373_s0 + $0xe8] sm:$0xff] }
 0x1b2   :  { %3296 = vmatmul.msk.bf16.gmra.mxu1 %vm268_vm0, %v4052_v23  ;;  %v5184_v33 = vpop.eup %5183  ;;  %5191 = vtanh.f32 %v1179_v26 }
 0x1b3   :  { %4822 = vst [vmem:[%s6374_s2 + $0x188] sm:$0xff] %v4382_v31   ;;  %3608 = vmatmul.msk.bf16.gmra.mxu2 %vm268_vm0, %v4088_v27  ;;  %v4055_v31 = vld [vmem:[%s6373_s0 + $0x1e8] sm:$0xff] }
 0x1b4   :  { %3920 = vmatmul.msk.bf16.gmra.mxu3 %vm268_vm0, %v4124_v28 }
 0x1b5   :  { %v5186_v34 = vpop.eup %5185 }
 0x1b6   :  { %v5188_v35 = vpop.eup %5187  ;;  %v4542_v36 = vpack.c.bf16 %v5186_v34, %v5182_v32  ;;  %v1895_v37 = vpop.f32.mrf.mxu2 }
 0x1b7   :  { %v2611_v38 = vpop.f32.mrf.mxu3  ;;  %v4702_v39 = vpack.c.bf16 %v5188_v35, %v5184_v33  ;;  %v466_v40 = vpop.f32.mrf.mxu0  ;;  %v4091_v35 = vld [vmem:[%s6373_s0 + $0x2e8] sm:$0xff] }
 0x1b8   :  { %v1181_v41 = vpop.f32.mrf.mxu1  ;;  %4854 = vst [vmem:[%s6374_s2 + $0x288] sm:$0xff] %v4542_v36   ;;  %5193 = vtanh.f32 %v466_v40  ;;  %v5190_v42 = vpop.eup %5189  ;;  %v4127_v36 = vld [vmem:[%s6373_s0 + $0x3e8] sm:$0xff] }
 0x1b9   :  { %4886 = vst [vmem:[%s6374_s2 + $0x388] sm:$0xff] %v4702_v39   ;;  %5195 = vtanh.f32 %v1181_v41  ;;  %v5192_v43 = vpop.eup %5191 }
 0x1ba   :  { %5197 = vtanh.f32 %v1895_v37 }
 0x1bb   :  { %5199 = vtanh.f32 %v2611_v38 }
 0x1be   :  { %v1897_v44 = vpop.f32.mrf.mxu2  ;;  %v5194_v48 = vpop.eup %5193 }
 0x1bf   :  { %v2613_v45 = vpop.f32.mrf.mxu3  ;;  %5201 = vtanh.f32 %v1897_v44  ;;  %v469_v49 = vpop.f32.mrf.mxu0  ;;  %v4227_v54 = vpack.c.bf16 %v5194_v48, %v5190_v42 }
 0x1c0   :  { %v1184_v50 = vpop.f32.mrf.mxu1  ;;  %v5196_v53 = vpop.eup %5195  ;;  %5203 = vtanh.f32 %v2613_v45 }
 0x1c1   :  { %v4387_v55 = vpack.c.bf16 %v5196_v53, %v5192_v43  ;;  %4791 = vst [vmem:[%s6374_s2 + $0x90] sm:$0xff] %v4227_v54   ;;  %3049 = vmatmul.msk.bf16.gmra.mxu0 %vm268_vm0, %v4017_v46  ;;  %v5198_v56 = vpop.eup %5197  ;;  %5205 = vtanh.f32 %v469_v49  ;;  %v4020_v54 = vld [vmem:[%s6373_s0 + $0xf0] sm:$0xff] }
 0x1c2   :  { %3297 = vmatmul.msk.bf16.gmra.mxu1 %vm268_vm0, %v4053_v47  ;;  %v5200_v57 = vpop.eup %5199  ;;  %5207 = vtanh.f32 %v1184_v50 }
 0x1c3   :  { %4823 = vst [vmem:[%s6374_s2 + $0x190] sm:$0xff] %v4387_v55   ;;  %3609 = vmatmul.msk.bf16.gmra.mxu2 %vm268_vm0, %v4089_v51  ;;  %v4056_v55 = vld [vmem:[%s6373_s0 + $0x1f0] sm:$0xff] }
 0x1c4   :  { %3921 = vmatmul.msk.bf16.gmra.mxu3 %vm268_vm0, %v4125_v52 }
 0x1c5   :  { %v5202_v58 = vpop.eup %5201 }
 0x1c6   :  { %v5204_v59 = vpop.eup %5203  ;;  %v4547_v60 = vpack.c.bf16 %v5202_v58, %v5198_v56  ;;  %v1900_v61 = vpop.f32.mrf.mxu2 }
 0x1c7   :  { %v2616_v62 = vpop.f32.mrf.mxu3  ;;  %v4707_v63 = vpack.c.bf16 %v5204_v59, %v5200_v57  ;;  %v471_v0 = vpop.f32.mrf.mxu0  ;;  %v4092_v59 = vld [vmem:[%s6373_s0 + $0x2f0] sm:$0xff] }
 0x1c8   :  { %v1186_v1 = vpop.f32.mrf.mxu1  ;;  %4855 = vst [vmem:[%s6374_s2 + $0x290] sm:$0xff] %v4547_v60   ;;  %5209 = vtanh.f32 %v471_v0  ;;  %v5206_v2 = vpop.eup %5205  ;;  %v4128_v60 = vld [vmem:[%s6373_s0 + $0x3f0] sm:$0xff] }
 0x1c9   :  { %4887 = vst [vmem:[%s6374_s2 + $0x390] sm:$0xff] %v4707_v63   ;;  %5211 = vtanh.f32 %v1186_v1  ;;  %v5208_v3 = vpop.eup %5207 }
 0x1ca   :  { %5213 = vtanh.f32 %v1900_v61 }
 0x1cb   :  { %5215 = vtanh.f32 %v2616_v62 }
 0x1ce   :  { %v1902_v4 = vpop.f32.mrf.mxu2  ;;  %v5210_v8 = vpop.eup %5209 }
 0x1cf   :  { %v2618_v5 = vpop.f32.mrf.mxu3  ;;  %5217 = vtanh.f32 %v1902_v4  ;;  %v474_v9 = vpop.f32.mrf.mxu0  ;;  %v4232_v14 = vpack.c.bf16 %v5210_v8, %v5206_v2 }
 0x1d0   :  { %v1189_v10 = vpop.f32.mrf.mxu1  ;;  %v5212_v13 = vpop.eup %5211  ;;  %5219 = vtanh.f32 %v2618_v5 }
 0x1d1   :  { %v4392_v15 = vpack.c.bf16 %v5212_v13, %v5208_v3  ;;  %4792 = vst [vmem:[%s6374_s2 + $0x98] sm:$0xff] %v4232_v14   ;;  %3050 = vmatmul.msk.bf16.gmra.mxu0 %vm268_vm0, %v4018_v6  ;;  %v5214_v16 = vpop.eup %5213  ;;  %5221 = vtanh.f32 %v474_v9  ;;  %v4021_v14 = vld [vmem:[%s6373_s0 + $0xf8] sm:$0xff] }
 0x1d2   :  { %3298 = vmatmul.msk.bf16.gmra.mxu1 %vm268_vm0, %v4054_v7  ;;  %v5216_v17 = vpop.eup %5215  ;;  %5223 = vtanh.f32 %v1189_v10 }
 0x1d3   :  { %4824 = vst [vmem:[%s6374_s2 + $0x198] sm:$0xff] %v4392_v15   ;;  %3610 = vmatmul.msk.bf16.gmra.mxu2 %vm268_vm0, %v4090_v11  ;;  %v4057_v15 = vld [vmem:[%s6373_s0 + $0x1f8] sm:$0xff] }
 0x1d4   :  { %3922 = vmatmul.msk.bf16.gmra.mxu3 %vm268_vm0, %v4126_v12 }
 0x1d5   :  { %v5218_v18 = vpop.eup %5217 }
 0x1d6   :  { %v5220_v19 = vpop.eup %5219  ;;  %v4552_v20 = vpack.c.bf16 %v5218_v18, %v5214_v16  ;;  %v1905_v21 = vpop.f32.mrf.mxu2 }
 0x1d7   :  { %v2621_v22 = vpop.f32.mrf.mxu3  ;;  %v4712_v23 = vpack.c.bf16 %v5220_v19, %v5216_v17  ;;  %v476_v24 = vpop.f32.mrf.mxu0  ;;  %v4093_v19 = vld [vmem:[%s6373_s0 + $0x2f8] sm:$0xff] }
 0x1d8   :  { %v1191_v25 = vpop.f32.mrf.mxu1  ;;  %4856 = vst [vmem:[%s6374_s2 + $0x298] sm:$0xff] %v4552_v20   ;;  %5225 = vtanh.f32 %v476_v24  ;;  %v5222_v26 = vpop.eup %5221  ;;  %v4129_v20 = vld [vmem:[%s6373_s0 + $0x3f8] sm:$0xff] }
 0x1d9   :  { %4888 = vst [vmem:[%s6374_s2 + $0x398] sm:$0xff] %v4712_v23   ;;  %5227 = vtanh.f32 %v1191_v25  ;;  %v5224_v27 = vpop.eup %5223 }
 0x1da   :  { %5229 = vtanh.f32 %v1905_v21 }
 0x1db   :  { %5231 = vtanh.f32 %v2621_v22 }
 0x1de   :  { %v1907_v28 = vpop.f32.mrf.mxu2  ;;  %v5226_v32 = vpop.eup %5225 }
 0x1df   :  { %v2623_v29 = vpop.f32.mrf.mxu3  ;;  %5233 = vtanh.f32 %v1907_v28  ;;  %v479_v33 = vpop.f32.mrf.mxu0  ;;  %v4237_v38 = vpack.c.bf16 %v5226_v32, %v5222_v26 }
 0x1e0   :  { %v1194_v34 = vpop.f32.mrf.mxu1  ;;  %v5228_v37 = vpop.eup %5227  ;;  %5235 = vtanh.f32 %v2623_v29 }
 0x1e1   :  { %v4397_v39 = vpack.c.bf16 %v5228_v37, %v5224_v27  ;;  %4793 = vst [vmem:[%s6374_s2 + $0xa0] sm:$0xff] %v4237_v38   ;;  %3051 = vmatmul.msk.bf16.gmra.mxu0 %vm268_vm0, %v4019_v30  ;;  %v5230_v40 = vpop.eup %5229  ;;  %5237 = vtanh.f32 %v479_v33 }
 0x1e2   :  { %3299 = vmatmul.msk.bf16.gmra.mxu1 %vm268_vm0, %v4055_v31  ;;  %v5232_v41 = vpop.eup %5231  ;;  %5239 = vtanh.f32 %v1194_v34 }
 0x1e3   :  { %4825 = vst [vmem:[%s6374_s2 + $0x1a0] sm:$0xff] %v4397_v39   ;;  %3611 = vmatmul.msk.bf16.gmra.mxu2 %vm268_vm0, %v4091_v35 }
 0x1e4   :  { %3923 = vmatmul.msk.bf16.gmra.mxu3 %vm268_vm0, %v4127_v36 }
 0x1e5   :  { %v5234_v42 = vpop.eup %5233 }
 0x1e6   :  { %v5236_v43 = vpop.eup %5235  ;;  %v4557_v44 = vpack.c.bf16 %v5234_v42, %v5230_v40  ;;  %v1910_v45 = vpop.f32.mrf.mxu2 }
 0x1e7   :  { %v2626_v46 = vpop.f32.mrf.mxu3  ;;  %v4717_v47 = vpack.c.bf16 %v5236_v43, %v5232_v41  ;;  %v481_v48 = vpop.f32.mrf.mxu0 }
 0x1e8   :  { %v1196_v49 = vpop.f32.mrf.mxu1  ;;  %4857 = vst [vmem:[%s6374_s2 + $0x2a0] sm:$0xff] %v4557_v44   ;;  %5241 = vtanh.f32 %v481_v48  ;;  %v5238_v50 = vpop.eup %5237 }
 0x1e9   :  { %4889 = vst [vmem:[%s6374_s2 + $0x3a0] sm:$0xff] %v4717_v47   ;;  %5243 = vtanh.f32 %v1196_v49  ;;  %v5240_v51 = vpop.eup %5239 }
 0x1ea   :  { %5245 = vtanh.f32 %v1910_v45 }
 0x1eb   :  { %5247 = vtanh.f32 %v2626_v46 }
 0x1ee   :  { %v1912_v52 = vpop.f32.mrf.mxu2  ;;  %v5242_v56 = vpop.eup %5241 }
 0x1ef   :  { %v2628_v53 = vpop.f32.mrf.mxu3  ;;  %5249 = vtanh.f32 %v1912_v52  ;;  %v484_v57 = vpop.f32.mrf.mxu0  ;;  %v4242_v62 = vpack.c.bf16 %v5242_v56, %v5238_v50 }
 0x1f0   :  { %v1199_v58 = vpop.f32.mrf.mxu1  ;;  %v5244_v61 = vpop.eup %5243  ;;  %5251 = vtanh.f32 %v2628_v53 }
 0x1f1   :  { %v4402_v63 = vpack.c.bf16 %v5244_v61, %v5240_v51  ;;  %4794 = vst [vmem:[%s6374_s2 + $0xa8] sm:$0xff] %v4242_v62   ;;  %3052 = vmatmul.msk.bf16.gmra.mxu0 %vm268_vm0, %v4020_v54  ;;  %v5246_v0 = vpop.eup %5245  ;;  %5253 = vtanh.f32 %v484_v57 }
 0x1f2   :  { %3300 = vmatmul.msk.bf16.gmra.mxu1 %vm268_vm0, %v4056_v55  ;;  %v5248_v1 = vpop.eup %5247  ;;  %5255 = vtanh.f32 %v1199_v58 }
 0x1f3   :  { %4826 = vst [vmem:[%s6374_s2 + $0x1a8] sm:$0xff] %v4402_v63   ;;  %3612 = vmatmul.msk.bf16.gmra.mxu2 %vm268_vm0, %v4092_v59 }
 0x1f4   :  { %3924 = vmatmul.msk.bf16.gmra.mxu3 %vm268_vm0, %v4128_v60 }
 0x1f5   :  { %v5250_v2 = vpop.eup %5249 }
 0x1f6   :  { %v5252_v3 = vpop.eup %5251  ;;  %v4562_v4 = vpack.c.bf16 %v5250_v2, %v5246_v0  ;;  %v1915_v5 = vpop.f32.mrf.mxu2 }
 0x1f7   :  { %v2631_v6 = vpop.f32.mrf.mxu3  ;;  %v4722_v7 = vpack.c.bf16 %v5252_v3, %v5248_v1  ;;  %v486_v8 = vpop.f32.mrf.mxu0 }
 0x1f8   :  { %v1201_v9 = vpop.f32.mrf.mxu1  ;;  %4858 = vst [vmem:[%s6374_s2 + $0x2a8] sm:$0xff] %v4562_v4   ;;  %5257 = vtanh.f32 %v486_v8  ;;  %v5254_v10 = vpop.eup %5253 }
 0x1f9   :  { %4890 = vst [vmem:[%s6374_s2 + $0x3a8] sm:$0xff] %v4722_v7   ;;  %5259 = vtanh.f32 %v1201_v9  ;;  %v5256_v11 = vpop.eup %5255 }
 0x1fa   :  { %5261 = vtanh.f32 %v1915_v5 }
 0x1fb   :  { %5263 = vtanh.f32 %v2631_v6 }
 0x1fe   :  { %v1917_v12 = vpop.f32.mrf.mxu2  ;;  %v5258_v16 = vpop.eup %5257 }
 0x1ff   :  { %v2633_v13 = vpop.f32.mrf.mxu3  ;;  %5265 = vtanh.f32 %v1917_v12  ;;  %v489_v17 = vpop.f32.mrf.mxu0  ;;  %v4247_v22 = vpack.c.bf16 %v5258_v16, %v5254_v10 }
 0x200   :  { %v1204_v18 = vpop.f32.mrf.mxu1  ;;  %v5260_v21 = vpop.eup %5259  ;;  %5267 = vtanh.f32 %v2633_v13 }
 0x201   :  { %v4407_v23 = vpack.c.bf16 %v5260_v21, %v5256_v11  ;;  %4795 = vst [vmem:[%s6374_s2 + $0xb0] sm:$0xff] %v4247_v22   ;;  %3053 = vmatmul.msk.bf16.gmra.mxu0 %vm268_vm0, %v4021_v14  ;;  %v5262_v24 = vpop.eup %5261  ;;  %5269 = vtanh.f32 %v489_v17 }
 0x202   :  { %3301 = vmatmul.msk.bf16.gmra.mxu1 %vm268_vm0, %v4057_v15  ;;  %v5264_v25 = vpop.eup %5263  ;;  %5271 = vtanh.f32 %v1204_v18 }
 0x203   :  { %4827 = vst [vmem:[%s6374_s2 + $0x1b0] sm:$0xff] %v4407_v23   ;;  %3613 = vmatmul.msk.bf16.gmra.mxu2 %vm268_vm0, %v4093_v19 }
 0x204   :  { %3925 = vmatmul.msk.bf16.gmra.mxu3 %vm268_vm0, %v4129_v20 }
 0x205   :  { %v5266_v26 = vpop.eup %5265 }
 0x206   :  { %v5268_v27 = vpop.eup %5267  ;;  %v4567_v28 = vpack.c.bf16 %v5266_v26, %v5262_v24  ;;  %v1920_v29 = vpop.f32.mrf.mxu2 }
 0x207   :  { %v2636_v30 = vpop.f32.mrf.mxu3  ;;  %v4727_v31 = vpack.c.bf16 %v5268_v27, %v5264_v25  ;;  %v491_v32 = vpop.f32.mrf.mxu0 }
 0x208   :  { %v1206_v33 = vpop.f32.mrf.mxu1  ;;  %4859 = vst [vmem:[%s6374_s2 + $0x2b0] sm:$0xff] %v4567_v28   ;;  %5273 = vtanh.f32 %v491_v32  ;;  %v5270_v34 = vpop.eup %5269 }
 0x209   :  { %4891 = vst [vmem:[%s6374_s2 + $0x3b0] sm:$0xff] %v4727_v31   ;;  %5275 = vtanh.f32 %v1206_v33  ;;  %v5272_v35 = vpop.eup %5271 }
 0x20a   :  { %5277 = vtanh.f32 %v1920_v29 }
 0x20b   :  { %5279 = vtanh.f32 %v2636_v30 }
 0x20e   :  { %v1922_v36 = vpop.f32.mrf.mxu2  ;;  %v5274_v38 = vpop.eup %5273 }
 0x20f   :  { %v2638_v37 = vpop.f32.mrf.mxu3  ;;  %5281 = vtanh.f32 %v1922_v36  ;;  %v494_v39 = vpop.f32.mrf.mxu0  ;;  %v4252_v42 = vpack.c.bf16 %v5274_v38, %v5270_v34 }
 0x210   :  { %v1209_v40 = vpop.f32.mrf.mxu1  ;;  %v5276_v41 = vpop.eup %5275  ;;  %5283 = vtanh.f32 %v2638_v37 }
 0x211   :  { %v4412_v43 = vpack.c.bf16 %v5276_v41, %v5272_v35  ;;  %4796 = vst [vmem:[%s6374_s2 + $0xb8] sm:$0xff] %v4252_v42   ;;  %v5278_v44 = vpop.eup %5277  ;;  %5285 = vtanh.f32 %v494_v39 }
 0x212   :  { %v5280_v45 = vpop.eup %5279  ;;  %5287 = vtanh.f32 %v1209_v40 }
 0x213   :  { %4828 = vst [vmem:[%s6374_s2 + $0x1b8] sm:$0xff] %v4412_v43  }
 0x215   :  { %v5282_v46 = vpop.eup %5281 }
 0x216   :  { %v5284_v47 = vpop.eup %5283  ;;  %v4572_v48 = vpack.c.bf16 %v5282_v46, %v5278_v44  ;;  %v1925_v49 = vpop.f32.mrf.mxu2 }
 0x217   :  { %v2641_v50 = vpop.f32.mrf.mxu3  ;;  %v4732_v51 = vpack.c.bf16 %v5284_v47, %v5280_v45  ;;  %v496_v52 = vpop.f32.mrf.mxu0 }
 0x218   :  { %v1211_v53 = vpop.f32.mrf.mxu1  ;;  %4860 = vst [vmem:[%s6374_s2 + $0x2b8] sm:$0xff] %v4572_v48   ;;  %5289 = vtanh.f32 %v496_v52  ;;  %v5286_v54 = vpop.eup %5285 }
 0x219   :  { %4892 = vst [vmem:[%s6374_s2 + $0x3b8] sm:$0xff] %v4732_v51   ;;  %5291 = vtanh.f32 %v1211_v53  ;;  %v5288_v55 = vpop.eup %5287 }
 0x21a   :  { %5293 = vtanh.f32 %v1925_v49 }
 0x21b   :  { %5295 = vtanh.f32 %v2641_v50 }
 0x21e   :  { %v1927_v56 = vpop.f32.mrf.mxu2  ;;  %v5290_v58 = vpop.eup %5289 }
 0x21f   :  { %v2643_v57 = vpop.f32.mrf.mxu3  ;;  %5297 = vtanh.f32 %v1927_v56  ;;  %v499_v59 = vpop.f32.mrf.mxu0  ;;  %v4257_v62 = vpack.c.bf16 %v5290_v58, %v5286_v54 }
 0x220   :  { %v1214_v60 = vpop.f32.mrf.mxu1  ;;  %v5292_v61 = vpop.eup %5291  ;;  %5299 = vtanh.f32 %v2643_v57 }
 0x221   :  { %v4417_v63 = vpack.c.bf16 %v5292_v61, %v5288_v55  ;;  %4797 = vst [vmem:[%s6374_s2 + $0xc0] sm:$0xff] %v4257_v62   ;;  %v5294_v0 = vpop.eup %5293  ;;  %5301 = vtanh.f32 %v499_v59 }
 0x222   :  { %v5296_v1 = vpop.eup %5295  ;;  %5303 = vtanh.f32 %v1214_v60 }
 0x223   :  { %4829 = vst [vmem:[%s6374_s2 + $0x1c0] sm:$0xff] %v4417_v63  }
 0x225   :  { %v5298_v2 = vpop.eup %5297 }
 0x226   :  { %v5300_v3 = vpop.eup %5299  ;;  %v4577_v4 = vpack.c.bf16 %v5298_v2, %v5294_v0  ;;  %v1930_v5 = vpop.f32.mrf.mxu2 }
 0x227   :  { %v2646_v6 = vpop.f32.mrf.mxu3  ;;  %v4737_v7 = vpack.c.bf16 %v5300_v3, %v5296_v1  ;;  %v501_v8 = vpop.f32.mrf.mxu0 }
 0x228   :  { %v1216_v9 = vpop.f32.mrf.mxu1  ;;  %4861 = vst [vmem:[%s6374_s2 + $0x2c0] sm:$0xff] %v4577_v4   ;;  %5305 = vtanh.f32 %v501_v8  ;;  %v5302_v10 = vpop.eup %5301 }
 0x229   :  { %4893 = vst [vmem:[%s6374_s2 + $0x3c0] sm:$0xff] %v4737_v7   ;;  %5307 = vtanh.f32 %v1216_v9  ;;  %v5304_v11 = vpop.eup %5303 }
 0x22a   :  { %5309 = vtanh.f32 %v1930_v5 }
 0x22b   :  { %5311 = vtanh.f32 %v2646_v6 }
 0x22e   :  { %v1932_v12 = vpop.f32.mrf.mxu2  ;;  %v5306_v14 = vpop.eup %5305 }
 0x22f   :  { %v2648_v13 = vpop.f32.mrf.mxu3  ;;  %5313 = vtanh.f32 %v1932_v12  ;;  %v504_v15 = vpop.f32.mrf.mxu0  ;;  %v4262_v18 = vpack.c.bf16 %v5306_v14, %v5302_v10 }
 0x230   :  { %v1219_v16 = vpop.f32.mrf.mxu1  ;;  %v5308_v17 = vpop.eup %5307  ;;  %5315 = vtanh.f32 %v2648_v13 }
 0x231   :  { %v4422_v19 = vpack.c.bf16 %v5308_v17, %v5304_v11  ;;  %4798 = vst [vmem:[%s6374_s2 + $0xc8] sm:$0xff] %v4262_v18   ;;  %v5310_v20 = vpop.eup %5309  ;;  %5317 = vtanh.f32 %v504_v15 }
 0x232   :  { %v5312_v21 = vpop.eup %5311  ;;  %5319 = vtanh.f32 %v1219_v16 }
 0x233   :  { %4830 = vst [vmem:[%s6374_s2 + $0x1c8] sm:$0xff] %v4422_v19  }
 0x235   :  { %v5314_v22 = vpop.eup %5313 }
 0x236   :  { %v5316_v23 = vpop.eup %5315  ;;  %v4582_v24 = vpack.c.bf16 %v5314_v22, %v5310_v20  ;;  %v1935_v25 = vpop.f32.mrf.mxu2 }
 0x237   :  { %v2651_v26 = vpop.f32.mrf.mxu3  ;;  %v4742_v27 = vpack.c.bf16 %v5316_v23, %v5312_v21  ;;  %v506_v28 = vpop.f32.mrf.mxu0 }
 0x238   :  { %v1221_v29 = vpop.f32.mrf.mxu1  ;;  %4862 = vst [vmem:[%s6374_s2 + $0x2c8] sm:$0xff] %v4582_v24   ;;  %5321 = vtanh.f32 %v506_v28  ;;  %v5318_v30 = vpop.eup %5317 }
 0x239   :  { %4894 = vst [vmem:[%s6374_s2 + $0x3c8] sm:$0xff] %v4742_v27   ;;  %5323 = vtanh.f32 %v1221_v29  ;;  %v5320_v31 = vpop.eup %5319 }
 0x23a   :  { %5325 = vtanh.f32 %v1935_v25 }
 0x23b   :  { %5327 = vtanh.f32 %v2651_v26 }
 0x23e   :  { %v1937_v32 = vpop.f32.mrf.mxu2  ;;  %v5322_v34 = vpop.eup %5321 }
 0x23f   :  { %v2653_v33 = vpop.f32.mrf.mxu3  ;;  %5329 = vtanh.f32 %v1937_v32  ;;  %v509_v35 = vpop.f32.mrf.mxu0  ;;  %v4267_v38 = vpack.c.bf16 %v5322_v34, %v5318_v30 }
 0x240   :  { %v1224_v36 = vpop.f32.mrf.mxu1  ;;  %v5324_v37 = vpop.eup %5323  ;;  %5331 = vtanh.f32 %v2653_v33 }
 0x241   :  { %v4427_v39 = vpack.c.bf16 %v5324_v37, %v5320_v31  ;;  %4799 = vst [vmem:[%s6374_s2 + $0xd0] sm:$0xff] %v4267_v38   ;;  %v5326_v40 = vpop.eup %5325  ;;  %5333 = vtanh.f32 %v509_v35 }
 0x242   :  { %v5328_v41 = vpop.eup %5327  ;;  %5335 = vtanh.f32 %v1224_v36 }
 0x243   :  { %4831 = vst [vmem:[%s6374_s2 + $0x1d0] sm:$0xff] %v4427_v39  }
 0x245   :  { %v5330_v42 = vpop.eup %5329 }
 0x246   :  { %v5332_v43 = vpop.eup %5331  ;;  %v4587_v44 = vpack.c.bf16 %v5330_v42, %v5326_v40  ;;  %v1940_v45 = vpop.f32.mrf.mxu2 }
 0x247   :  { %v2656_v46 = vpop.f32.mrf.mxu3  ;;  %v4747_v47 = vpack.c.bf16 %v5332_v43, %v5328_v41  ;;  %v511_v48 = vpop.f32.mrf.mxu0 }
 0x248   :  { %v1226_v49 = vpop.f32.mrf.mxu1  ;;  %4863 = vst [vmem:[%s6374_s2 + $0x2d0] sm:$0xff] %v4587_v44   ;;  %5337 = vtanh.f32 %v511_v48  ;;  %v5334_v50 = vpop.eup %5333 }
 0x249   :  { %4895 = vst [vmem:[%s6374_s2 + $0x3d0] sm:$0xff] %v4747_v47   ;;  %5339 = vtanh.f32 %v1226_v49  ;;  %v5336_v51 = vpop.eup %5335 }
 0x24a   :  { %5341 = vtanh.f32 %v1940_v45 }
 0x24b   :  { %5343 = vtanh.f32 %v2656_v46 }
 0x24e   :  { %v1942_v52 = vpop.f32.mrf.mxu2  ;;  %v5338_v54 = vpop.eup %5337 }
 0x24f   :  { %v2658_v53 = vpop.f32.mrf.mxu3  ;;  %5345 = vtanh.f32 %v1942_v52  ;;  %v514_v55 = vpop.f32.mrf.mxu0  ;;  %v4272_v58 = vpack.c.bf16 %v5338_v54, %v5334_v50 }
 0x250   :  { %v1229_v56 = vpop.f32.mrf.mxu1  ;;  %v5340_v57 = vpop.eup %5339  ;;  %5347 = vtanh.f32 %v2658_v53 }
 0x251   :  { %v4432_v59 = vpack.c.bf16 %v5340_v57, %v5336_v51  ;;  %4800 = vst [vmem:[%s6374_s2 + $0xd8] sm:$0xff] %v4272_v58   ;;  %v5342_v60 = vpop.eup %5341  ;;  %5349 = vtanh.f32 %v514_v55 }
 0x252   :  { %v5344_v61 = vpop.eup %5343  ;;  %5351 = vtanh.f32 %v1229_v56 }
 0x253   :  { %4832 = vst [vmem:[%s6374_s2 + $0x1d8] sm:$0xff] %v4432_v59  }
 0x255   :  { %v5346_v62 = vpop.eup %5345 }
 0x256   :  { %v5348_v63 = vpop.eup %5347  ;;  %v4592_v0 = vpack.c.bf16 %v5346_v62, %v5342_v60  ;;  %v1945_v1 = vpop.f32.mrf.mxu2 }
 0x257   :  { %v2661_v2 = vpop.f32.mrf.mxu3  ;;  %v4752_v3 = vpack.c.bf16 %v5348_v63, %v5344_v61  ;;  %v516_v4 = vpop.f32.mrf.mxu0 }
 0x258   :  { %v1231_v5 = vpop.f32.mrf.mxu1  ;;  %4864 = vst [vmem:[%s6374_s2 + $0x2d8] sm:$0xff] %v4592_v0   ;;  %5353 = vtanh.f32 %v516_v4  ;;  %v5350_v6 = vpop.eup %5349 }
 0x259   :  { %4896 = vst [vmem:[%s6374_s2 + $0x3d8] sm:$0xff] %v4752_v3   ;;  %5355 = vtanh.f32 %v1231_v5  ;;  %v5352_v7 = vpop.eup %5351 }
 0x25a   :  { %5357 = vtanh.f32 %v1945_v1 }
 0x25b   :  { %5359 = vtanh.f32 %v2661_v2 }
 0x25e   :  { %v1947_v8 = vpop.f32.mrf.mxu2  ;;  %v5354_v10 = vpop.eup %5353 }
 0x25f   :  { %v2663_v9 = vpop.f32.mrf.mxu3  ;;  %5361 = vtanh.f32 %v1947_v8  ;;  %v519_v11 = vpop.f32.mrf.mxu0  ;;  %v4277_v14 = vpack.c.bf16 %v5354_v10, %v5350_v6 }
 0x260   :  { %v1234_v12 = vpop.f32.mrf.mxu1  ;;  %v5356_v13 = vpop.eup %5355  ;;  %5363 = vtanh.f32 %v2663_v9 }
 0x261   :  { %v4437_v15 = vpack.c.bf16 %v5356_v13, %v5352_v7  ;;  %4801 = vst [vmem:[%s6374_s2 + $0xe0] sm:$0xff] %v4277_v14   ;;  %v5358_v16 = vpop.eup %5357  ;;  %5365 = vtanh.f32 %v519_v11 }
 0x262   :  { %v5360_v17 = vpop.eup %5359  ;;  %5367 = vtanh.f32 %v1234_v12 }
 0x263   :  { %4833 = vst [vmem:[%s6374_s2 + $0x1e0] sm:$0xff] %v4437_v15  }
 0x265   :  { %v5362_v18 = vpop.eup %5361 }
 0x266   :  { %v5364_v19 = vpop.eup %5363  ;;  %v4597_v20 = vpack.c.bf16 %v5362_v18, %v5358_v16  ;;  %v1950_v21 = vpop.f32.mrf.mxu2 }
 0x267   :  { %v2666_v22 = vpop.f32.mrf.mxu3  ;;  %v4757_v23 = vpack.c.bf16 %v5364_v19, %v5360_v17  ;;  %v521_v24 = vpop.f32.mrf.mxu0 }
 0x268   :  { %v1236_v25 = vpop.f32.mrf.mxu1  ;;  %4865 = vst [vmem:[%s6374_s2 + $0x2e0] sm:$0xff] %v4597_v20   ;;  %5369 = vtanh.f32 %v521_v24  ;;  %v5366_v26 = vpop.eup %5365 }
 0x269   :  { %4897 = vst [vmem:[%s6374_s2 + $0x3e0] sm:$0xff] %v4757_v23   ;;  %5371 = vtanh.f32 %v1236_v25  ;;  %v5368_v27 = vpop.eup %5367 }
 0x26a   :  { %5373 = vtanh.f32 %v1950_v21 }
 0x26b   :  { %5375 = vtanh.f32 %v2666_v22 }
 0x26e   :  { %v1952_v28 = vpop.f32.mrf.mxu2  ;;  %v5370_v30 = vpop.eup %5369 }
 0x26f   :  { %v2668_v29 = vpop.f32.mrf.mxu3  ;;  %5377 = vtanh.f32 %v1952_v28  ;;  %v524_v31 = vpop.f32.mrf.mxu0  ;;  %v4282_v34 = vpack.c.bf16 %v5370_v30, %v5366_v26 }
 0x270   :  { %v1239_v32 = vpop.f32.mrf.mxu1  ;;  %v5372_v33 = vpop.eup %5371  ;;  %5379 = vtanh.f32 %v2668_v29 }
 0x271   :  { %v4442_v35 = vpack.c.bf16 %v5372_v33, %v5368_v27  ;;  %4802 = vst [vmem:[%s6374_s2 + $0xe8] sm:$0xff] %v4282_v34   ;;  %v5374_v36 = vpop.eup %5373  ;;  %5381 = vtanh.f32 %v524_v31 }
 0x272   :  { %v5376_v37 = vpop.eup %5375  ;;  %5383 = vtanh.f32 %v1239_v32 }
 0x273   :  { %4834 = vst [vmem:[%s6374_s2 + $0x1e8] sm:$0xff] %v4442_v35  }
 0x275   :  { %v5378_v38 = vpop.eup %5377 }
 0x276   :  { %v5380_v39 = vpop.eup %5379  ;;  %v4602_v40 = vpack.c.bf16 %v5378_v38, %v5374_v36  ;;  %v1955_v41 = vpop.f32.mrf.mxu2 }
 0x277   :  { %v2671_v42 = vpop.f32.mrf.mxu3  ;;  %v4762_v43 = vpack.c.bf16 %v5380_v39, %v5376_v37  ;;  %v526_v44 = vpop.f32.mrf.mxu0 }
 0x278   :  { %v1241_v45 = vpop.f32.mrf.mxu1  ;;  %4866 = vst [vmem:[%s6374_s2 + $0x2e8] sm:$0xff] %v4602_v40   ;;  %5385 = vtanh.f32 %v526_v44  ;;  %v5382_v46 = vpop.eup %5381 }
 0x279   :  { %4898 = vst [vmem:[%s6374_s2 + $0x3e8] sm:$0xff] %v4762_v43   ;;  %5387 = vtanh.f32 %v1241_v45  ;;  %v5384_v47 = vpop.eup %5383 }
 0x27a   :  { %5389 = vtanh.f32 %v1955_v41 }
 0x27b   :  { %5391 = vtanh.f32 %v2671_v42 }
 0x27e   :  { %v1957_v48 = vpop.f32.mrf.mxu2  ;;  %v5386_v50 = vpop.eup %5385 }
 0x27f   :  { %v2673_v49 = vpop.f32.mrf.mxu3  ;;  %5393 = vtanh.f32 %v1957_v48  ;;  %v529_v51 = vpop.f32.mrf.mxu0  ;;  %v4287_v54 = vpack.c.bf16 %v5386_v50, %v5382_v46 }
 0x280   :  { %v1244_v52 = vpop.f32.mrf.mxu1  ;;  %v5388_v53 = vpop.eup %5387  ;;  %5395 = vtanh.f32 %v2673_v49 }
 0x281   :  { %v4447_v55 = vpack.c.bf16 %v5388_v53, %v5384_v47  ;;  %4803 = vst [vmem:[%s6374_s2 + $0xf0] sm:$0xff] %v4287_v54   ;;  %v5390_v56 = vpop.eup %5389  ;;  %5397 = vtanh.f32 %v529_v51 }
 0x282   :  { %v5392_v57 = vpop.eup %5391  ;;  %5399 = vtanh.f32 %v1244_v52 }
 0x283   :  { %4835 = vst [vmem:[%s6374_s2 + $0x1f0] sm:$0xff] %v4447_v55  }
 0x285   :  { %v5394_v58 = vpop.eup %5393 }
 0x286   :  { %v5396_v59 = vpop.eup %5395  ;;  %v4607_v60 = vpack.c.bf16 %v5394_v58, %v5390_v56  ;;  %v1960_v61 = vpop.f32.mrf.mxu2 }
 0x287   :  { %v2676_v62 = vpop.f32.mrf.mxu3  ;;  %v4767_v63 = vpack.c.bf16 %v5396_v59, %v5392_v57  ;;  %v531_v0 = vpop.f32.mrf.mxu0 }
 0x288   :  { %v1246_v1 = vpop.f32.mrf.mxu1  ;;  %4867 = vst [vmem:[%s6374_s2 + $0x2f0] sm:$0xff] %v4607_v60   ;;  %5401 = vtanh.f32 %v531_v0  ;;  %v5398_v2 = vpop.eup %5397 }
 0x289   :  { %4899 = vst [vmem:[%s6374_s2 + $0x3f0] sm:$0xff] %v4767_v63   ;;  %5403 = vtanh.f32 %v1246_v1  ;;  %v5400_v3 = vpop.eup %5399 }
 0x28a   :  { %5405 = vtanh.f32 %v1960_v61 }
 0x28b   :  { %5407 = vtanh.f32 %v2676_v62 }
 0x28e   :  { %v1962_v4 = vpop.f32.mrf.mxu2  ;;  %v5402_v6 = vpop.eup %5401 }
 0x28f   :  { %v2678_v5 = vpop.f32.mrf.mxu3  ;;  %5409 = vtanh.f32 %v1962_v4  ;;  %v5404_v7 = vpop.eup %5403  ;;  %v4292_v8 = vpack.c.bf16 %v5402_v6, %v5398_v2 }
 0x290   :  { %5411 = vtanh.f32 %v2678_v5  ;;  %v4452_v9 = vpack.c.bf16 %v5404_v7, %v5400_v3  ;;  %v5406_v10 = vpop.eup %5405 }
 0x291   :  { %4804 = vst [vmem:[%s6374_s2 + $0xf8] sm:$0xff] %v4292_v8   ;;  %v5408_v11 = vpop.eup %5407 }
 0x292   :  { %4836 = vst [vmem:[%s6374_s2 + $0x1f8] sm:$0xff] %v4452_v9  }
 0x295   :  { %v5410_v12 = vpop.eup %5409 }
 0x296   :  { %v5412_v13 = vpop.eup %5411  ;;  %v4612_v14 = vpack.c.bf16 %v5410_v12, %v5406_v10 }
 0x297   :  { %v4772_v15 = vpack.c.bf16 %v5412_v13, %v5408_v11 }
 0x298   :  { %4868 = vst [vmem:[%s6374_s2 + $0x2f8] sm:$0xff] %v4612_v14  }
 0x299   :  { %4900 = vst [vmem:[%s6374_s2 + $0x3f8] sm:$0xff] %v4772_v15  }

</bundles_post_ra>
